<compile_context>
chip_gen: v6e
topology: v6e:2x2x1
jax: 0.10.0
libtpu: 0.0.40
codegen_flags: <defaults>
</compile_context>

<pallas_src>
import functools

import jax
import jax.numpy as jnp
from jax import lax
from jax.experimental import pallas as pl
from jax.experimental.pallas import tpu as pltpu


# ----------------------------------------------------------------------------
# Pallas kernel: one GRU direction over the WHOLE sequence per grid step.
# grid = (2,)  ("parallel"): program_id(0) == 0 -> forward, == 1 -> backward.
# The sequence, weights and hidden state for this direction live in VMEM.
# ----------------------------------------------------------------------------
def _bi_gru_dir_kernel(x_ref, len_ref, h0_ref, wih_ref, whh_ref, bgi_ref,
                       bhn_ref, out_ref, hfin_ref, gi_scr):
    T, B, D_in = x_ref.shape
    H = whh_ref.shape[0]
    d = pl.program_id(0)                      # 0 = fwd, 1 = bwd (time-reversed)

    # ---- Phase 1: hoisted input projection (no sequential dependence). ----
    # One MXU matmul with M = T*B instead of T tiny M=B matmuls.
    x_all = x_ref[...].reshape(T * B, D_in).astype(jnp.bfloat16)
    gi = jnp.dot(x_all, wih_ref[...], preferred_element_type=jnp.float32)
    gi_scr[...] = (gi + bgi_ref[...]).reshape(T, B, 3 * H)

    lengths = len_ref[...]                    # (B, 1) int32
    bhn = bhn_ref[...]                        # (1, H)  f32 (n-gate hidden bias)

    def step(t_idx, h):
        gi_t = gi_scr[t_idx]                                        # (B, 3H)
        gh = jnp.dot(h.astype(jnp.bfloat16), whh_ref[...],
                     preferred_element_type=jnp.float32)            # (B, 3H)
        r = jax.nn.sigmoid(gi_t[:, 0:H] + gh[:, 0:H])
        z = jax.nn.sigmoid(gi_t[:, H:2 * H] + gh[:, H:2 * H])
        n = jnp.tanh(gi_t[:, 2 * H:] + r * (gh[:, 2 * H:] + bhn))
        h_new = (1.0 - z) * n + z * h
        m = (lengths > t_idx).astype(jnp.float32)                   # (B, 1)
        return m * h_new + (1.0 - m) * h, m * h_new                 # frozen / 0

    # ---- Phase 2: sequential recurrence, fully unrolled (T small/static). --
    h = h0_ref[...]
    for t in range(T):
        # fwd (d=0) walks t = 0..T-1 ; bwd (d=1) walks t = T-1..0
        t_idx = d * (T - 1 - 2 * t) + t
        h, o = step(t_idx, h)
        out_ref[t_idx] = o.astype(out_ref.dtype)
    hfin_ref[...] = h.astype(hfin_ref.dtype)


def bi_gru_layer(x, lengths, h0, wih, whh, b_gi, b_hn):
    """Fused bidirectional GRU layer.

    x:    (T, B, D_in) f32        lengths: (B, 1) int32
    h0:   (2, B, H)    f32        wih:     (2, D_in, 3H) bf16
    whh:  (2, H, 3H)   bf16       b_gi:    (2, 1, 3H) f32 (folded biases)
    b_hn: (2, 1, H)    f32 (n-gate hidden bias)
    Returns out (T, B, 2H) f32 with fwd|bwd halves, and h_fin (2, B, H) f32.
    """
    T, B, D_in = x.shape
    H = whh.shape[1]

    return pl.pallas_call(
        _bi_gru_dir_kernel,
        out_shape=(jax.ShapeDtypeStruct((T, B, 2 * H), jnp.float32),
                   jax.ShapeDtypeStruct((2, B, H), jnp.float32)),
        grid=(2,),
        in_specs=[
            pl.BlockSpec((T, B, D_in), lambda d: (0, 0, 0)),      # x (resident)
            pl.BlockSpec((B, 1), lambda d: (0, 0)),               # lengths
            pl.BlockSpec((None, B, H), lambda d: (d, 0, 0)),      # h0 per dir
            pl.BlockSpec((None, D_in, 3 * H), lambda d: (d, 0, 0)),  # W_ih^T
            pl.BlockSpec((None, H, 3 * H), lambda d: (d, 0, 0)),     # W_hh^T
            pl.BlockSpec((None, 1, 3 * H), lambda d: (d, 0, 0)),     # folded b
            pl.BlockSpec((None, 1, H), lambda d: (d, 0, 0)),         # b_hh_n
        ],
        out_specs=(
            pl.BlockSpec((T, B, H), lambda d: (0, 0, d)),   # out half per dir
            pl.BlockSpec((None, B, H), lambda d: (d, 0, 0)),  # final hidden
        ),
        scratch_shapes=[pltpu.VMEM((T, B, 3 * H), jnp.float32)],  # hoisted gi
        compiler_params=pltpu.CompilerParams(
            dimension_semantics=("parallel",)),   # 2 TCs on v7x; serial on v5e/v6e
    )(x, lengths, h0, wih, whh, b_gi, b_hn)


# ----------------------------------------------------------------------------
# EncoderRNN forward (Pallas-backed)
# ----------------------------------------------------------------------------
def encoder_rnn_forward(input_seq, input_lengths, params, hidden_size, n_layers,
                        hidden=None):
    T, B = input_seq.shape
    H = hidden_size

    # Embedding lookup (gather) kept as plain-JAX glue.
    embedded = params["embedding"][input_seq]                       # (T, B, H)
    lengths = input_lengths.astype(jnp.int32).reshape(B, 1)         # (B, 1)

    if hidden is None:
        hidden = jnp.zeros((2 * n_layers, B, H), jnp.float32)

    def fold_biases(b_ih, b_hh):
        # b_ih + r/z slices of b_hh go into the hoisted projection; the n-gate
        # b_hh must stay inside r*( . ) -> returned separately.
        b_gi = b_ih.at[:, :2 * H].add(b_hh[:, :2 * H])
        return b_gi, b_hh[:, 2 * H:]

    x = embedded
    h_finals = []
    for layer in range(n_layers):
        lp = params["gru"][layer]
        wih = jnp.stack([lp["fwd"][0], lp["bwd"][0]]).astype(jnp.bfloat16)
        whh = jnp.stack([lp["fwd"][1], lp["bwd"][1]]).astype(jnp.bfloat16)
        bgi_f, bhn_f = fold_biases(lp["fwd"][2], lp["fwd"][3])
        bgi_b, bhn_b = fold_biases(lp["bwd"][2], lp["bwd"][3])
        b_gi = jnp.stack([bgi_f, bgi_b])                            # (2, 1, 3H)
        b_hn = jnp.stack([bhn_f, bhn_b])                            # (2, 1, H)

        h0 = hidden[2 * layer:2 * layer + 2]                        # (2, B, H)
        out, h_fin = bi_gru_layer(x, lengths, h0, wih, whh, b_gi, b_hn)
        x = out                       # (T, B, 2H): next layer consumes directly
        h_finals.append(h_fin)

    outputs = x[:, :, :H] + x[:, :, H:]                             # (T, B, H)
    hidden_out = jnp.concatenate(h_finals, axis=0)                  # (2L, B, H)
    return outputs, hidden_out


# ----------------------------------------------------------------------------
# Pure-JAX reference (same math, HIGHEST precision f32 dots) for validation
# ----------------------------------------------------------------------------
def encoder_rnn_reference(input_seq, input_lengths, params, hidden_size, n_layers):
    T, B = input_seq.shape
    H = hidden_size
    emb = params["embedding"][input_seq]
    mask = (jnp.arange(T)[:, None] < input_lengths[None, :]).astype(jnp.float32)
    mask = mask[:, :, None]

    def cell(xt, h, w_ih, w_hh, b_ih, b_hh):
        gi = jnp.dot(xt, w_ih, precision=lax.Precision.HIGHEST) + b_ih
        gh = jnp.dot(h, w_hh, precision=lax.Precision.HIGHEST) + b_hh
        r = jax.nn.sigmoid(gi[:, :H] + gh[:, :H])
        z = jax.nn.sigmoid(gi[:, H:2 * H] + gh[:, H:2 * H])
        n = jnp.tanh(gi[:, 2 * H:] + r * gh[:, 2 * H:])
        return (1.0 - z) * n + z * h

    x = emb
    h_finals = []
    for layer in range(n_layers):
        lp = params["gru"][layer]
        outs = []
        for name, rev in (("fwd", False), ("bwd", True)):
            w_ih, w_hh, b_ih, b_hh = lp[name]
            xs = x[::-1] if rev else x
            ms = mask[::-1] if rev else mask
            h = jnp.zeros((B, H), jnp.float32)
            out_list = []
            for t in range(T):
                h_new = cell(xs[t], h, w_ih, w_hh, b_ih, b_hh)
                m = ms[t]
                h = m * h_new + (1.0 - m) * h
                out_list.append(m * h_new)
            out = jnp.stack(out_list)
            if rev:
                out = out[::-1]
            outs.append(out)
            h_finals.append(h)
        x = jnp.concatenate(outs, axis=-1)
    return x[:, :, :H] + x[:, :, H:], jnp.stack(h_finals, 0)


# ----------------------------------------------------------------------------
# Deterministic parameter init (shapes per nn.Embedding + nn.GRU bidirectional)
# ----------------------------------------------------------------------------
def init_params(key, vocab_size, hidden_size, n_layers):
    H = hidden_size
    scale = 1.0 / jnp.sqrt(jnp.float32(H))
    n_keys = 1 + n_layers * 2 * 4
    keys = jax.random.split(key, n_keys)

    params = {"embedding": 0.1 * jax.random.normal(keys[0], (vocab_size, H),
                                                   jnp.float32),
              "gru": []}
    k = 1
    for layer in range(n_layers):
        d_in = H if layer == 0 else 2 * H
        layer_p = {}
        for name in ("fwd", "bwd"):
            # stored pre-transposed: (D_in, 3H) / (H, 3H); gate order r, z, n
            w_ih = jax.random.uniform(keys[k], (d_in, 3 * H), jnp.float32,
                                      -scale, scale); k += 1
            w_hh = jax.random.uniform(keys[k], (H, 3 * H), jnp.float32,
                                      -scale, scale); k += 1
            b_ih = jax.random.uniform(keys[k], (1, 3 * H), jnp.float32,
                                      -scale, scale); k += 1
            b_hh = jax.random.uniform(keys[k], (1, 3 * H), jnp.float32,
                                      -scale, scale); k += 1
            layer_p[name] = (w_ih, w_hh, b_ih, b_hh)
        params["gru"].append(layer_p)
    return params


if __name__ == "__main__":
    VOCAB = 50
    HIDDEN = 128      # lane-aligned hidden size
    N_LAYERS = 2
    T, B = 6, 8

    key = jax.random.PRNGKey(0)
    pkey, skey = jax.random.split(key)

    params = init_params(pkey, VOCAB, HIDDEN, N_LAYERS)
    input_seq = jax.random.randint(skey, (T, B), 0, VOCAB, dtype=jnp.int32)
    input_lengths = jnp.array([6, 6, 5, 4, 3, 3, 2, 1], dtype=jnp.int32)  # sorted desc

    encoder_fwd = jax.jit(functools.partial(
        encoder_rnn_forward, hidden_size=HIDDEN, n_layers=N_LAYERS))
    outputs, hidden = encoder_fwd(input_seq, input_lengths, params)
    outputs, hidden = jax.block_until_ready((outputs, hidden))

    ref_out, ref_hid = encoder_rnn_reference(input_seq, input_lengths, params,
                                             HIDDEN, N_LAYERS)
    assert outputs.shape == (T, B, HIDDEN)
    assert hidden.shape == (2 * N_LAYERS, B, HIDDEN)
    # Tolerance absorbs bf16 MXU operands (f32 accumulation / f32 state).
    assert jnp.allclose(outputs, ref_out, rtol=3e-2, atol=3e-2), \
        float(jnp.max(jnp.abs(outputs - ref_out)))
    assert jnp.allclose(hidden, ref_hid, rtol=3e-2, atol=3e-2), \
        float(jnp.max(jnp.abs(hidden - ref_hid)))

    print("KERNEL_OK")
</pallas_src>

<mosaic_0001>
module attributes {stable_mosaic.version = 11 : i64} {
  func.func @_bi_gru_dir_kernel(%arg0: i32, %arg1: memref<6x8x128xf32, #tpu.memory_space<vmem>>, %arg2: memref<8x1xi32, #tpu.memory_space<vmem>>, %arg3: memref<1x8x128xf32, #tpu.memory_space<vmem>>, %arg4: memref<1x128x384xbf16, #tpu.memory_space<vmem>>, %arg5: memref<1x128x384xbf16, #tpu.memory_space<vmem>>, %arg6: memref<1x1x384xf32, #tpu.memory_space<vmem>>, %arg7: memref<1x1x128xf32, #tpu.memory_space<vmem>>, %arg8: memref<6x8x128xf32, #tpu.memory_space<vmem>>, %arg9: memref<1x8x128xf32, #tpu.memory_space<vmem>>, %arg10: memref<6x8x384xf32, #tpu.memory_space<vmem>>) attributes {dimension_semantics = [#tpu.dimension_semantics<parallel>], iteration_bounds = array<i64: 2>, scalar_prefetch = 0 : i64, scratch_operands = 1 : i64, tpu.core_type = #tpu.core_type<tc>, window_params = [{pipeline_mode = #tpu.pipeline_mode<synchronous>, transform_indices = @transform_0, window_bounds = array<i64: 6, 8, 128>}, {pipeline_mode = #tpu.pipeline_mode<synchronous>, transform_indices = @transform_1, window_bounds = array<i64: 8, 1>}, {transform_indices = @transform_2, window_bounds = array<i64: 1, 8, 128>}, {transform_indices = @transform_3, window_bounds = array<i64: 1, 128, 384>}, {transform_indices = @transform_4, window_bounds = array<i64: 1, 128, 384>}, {transform_indices = @transform_5, window_bounds = array<i64: 1, 1, 384>}, {transform_indices = @transform_6, window_bounds = array<i64: 1, 1, 128>}, {transform_indices = @transform_7, window_bounds = array<i64: 6, 8, 128>}, {transform_indices = @transform_8, window_bounds = array<i64: 1, 8, 128>}]} {
    %c0 = arith.constant 0 : index
    %c0_0 = arith.constant 0 : index
    %c0_1 = arith.constant 0 : index
    %0 = vector.load %arg1[%c0, %c0_0, %c0_1] : memref<6x8x128xf32, #tpu.memory_space<vmem>>, vector<6x8x128xf32>
    %1 = vector.shape_cast %0 : vector<6x8x128xf32> to vector<48x128xf32>
    %2 = arith.truncf %1 : vector<48x128xf32> to vector<48x128xbf16>
    %c0_2 = arith.constant 0 : index
    %c0_3 = arith.constant 0 : index
    %c0_4 = arith.constant 0 : index
    %3 = vector.load %arg4[%c0_2, %c0_3, %c0_4] : memref<1x128x384xbf16, #tpu.memory_space<vmem>>, vector<1x128x384xbf16>
    %4 = vector.shape_cast %3 : vector<1x128x384xbf16> to vector<128x384xbf16>
    %cst = arith.constant dense<0.000000e+00> : vector<48x384xf32>
    %5 = tpu.matmul %2, %4, %cst {dimension_numbers = #tpu.dot_dimension_numbers<[1], [0], [0], [1], [0, 0, 1, 1], [], []>} : vector<48x128xbf16>, vector<128x384xbf16>, vector<48x384xf32> -> vector<48x384xf32>
    %c0_5 = arith.constant 0 : index
    %c0_6 = arith.constant 0 : index
    %c0_7 = arith.constant 0 : index
    %6 = vector.load %arg6[%c0_5, %c0_6, %c0_7] : memref<1x1x384xf32, #tpu.memory_space<vmem>>, vector<1x1x384xf32>
    %7 = vector.shape_cast %6 : vector<1x1x384xf32> to vector<1x384xf32>
    %8 = vector.broadcast %7 : vector<1x384xf32> to vector<48x384xf32>
    %9 = arith.addf %5, %8 : vector<48x384xf32>
    %10 = vector.shape_cast %9 : vector<48x384xf32> to vector<6x8x384xf32>
    %c0_8 = arith.constant 0 : index
    %c0_9 = arith.constant 0 : index
    %c0_10 = arith.constant 0 : index
    %11 = vector.load %arg10[%c0_8, %c0_9, %c0_10] : memref<6x8x384xf32, #tpu.memory_space<vmem>>, vector<6x8x384xf32>
    tpu.vector_store %arg10[%c0_8, %c0_9, %c0_10], %10 {strides = array<i32>} : memref<6x8x384xf32, #tpu.memory_space<vmem>>, vector<6x8x384xf32>,
    %c0_11 = arith.constant 0 : index
    %c0_12 = arith.constant 0 : index
    %12 = vector.load %arg2[%c0_11, %c0_12] : memref<8x1xi32, #tpu.memory_space<vmem>>, vector<8x1xi32>
    %c0_13 = arith.constant 0 : index
    %c0_14 = arith.constant 0 : index
    %c0_15 = arith.constant 0 : index
    %13 = vector.load %arg7[%c0_13, %c0_14, %c0_15] : memref<1x1x128xf32, #tpu.memory_space<vmem>>, vector<1x1x128xf32>
    %14 = vector.shape_cast %13 : vector<1x1x128xf32> to vector<1x128xf32>
    %c0_16 = arith.constant 0 : index
    %c0_17 = arith.constant 0 : index
    %c0_18 = arith.constant 0 : index
    %15 = vector.load %arg3[%c0_16, %c0_17, %c0_18] : memref<1x8x128xf32, #tpu.memory_space<vmem>>, vector<1x8x128xf32>
    %16 = vector.shape_cast %15 : vector<1x8x128xf32> to vector<8x128xf32>
    %c5_i32 = arith.constant 5 : i32
    %17 = arith.muli %arg0, %c5_i32 : i32
    %c0_i32 = arith.constant 0 : i32
    %18 = arith.addi %17, %c0_i32 : i32
    %19 = arith.index_cast %18 : i32 to index
    %c0_19 = arith.constant 0 : index
    %c0_20 = arith.constant 0 : index
    %20 = vector.load %arg10[%19, %c0_19, %c0_20] : memref<6x8x384xf32, #tpu.memory_space<vmem>>, vector<1x8x384xf32>
    %21 = vector.shape_cast %20 : vector<1x8x384xf32> to vector<8x384xf32>
    %22 = arith.truncf %16 : vector<8x128xf32> to vector<8x128xbf16>
    %c0_21 = arith.constant 0 : index
    %c0_22 = arith.constant 0 : index
    %c0_23 = arith.constant 0 : index
    %23 = vector.load %arg5[%c0_21, %c0_22, %c0_23] : memref<1x128x384xbf16, #tpu.memory_space<vmem>>, vector<1x128x384xbf16>
    %24 = vector.shape_cast %23 : vector<1x128x384xbf16> to vector<128x384xbf16>
    %cst_24 = arith.constant dense<0.000000e+00> : vector<8x384xf32>
    %25 = tpu.matmul %22, %24, %cst_24 {dimension_numbers = #tpu.dot_dimension_numbers<[1], [0], [0], [1], [0, 0, 1, 1], [], []>} : vector<8x128xbf16>, vector<128x384xbf16>, vector<8x384xf32> -> vector<8x384xf32>
    %26 = vector.extract_strided_slice %21 {offsets = [0, 0], sizes = [8, 128], strides = [1, 1]} : vector<8x384xf32> to vector<8x128xf32>
    %27 = vector.extract_strided_slice %25 {offsets = [0, 0], sizes = [8, 128], strides = [1, 1]} : vector<8x384xf32> to vector<8x128xf32>
    %28 = arith.addf %26, %27 : vector<8x128xf32>
    %29 = arith.negf %28 : vector<8x128xf32>
    %30 = math.exp %29 : vector<8x128xf32>
    %cst_25 = arith.constant 1.000000e+00 : f32
    %31 = vector.broadcast %cst_25 : f32 to vector<8x128xf32>
    %32 = arith.addf %31, %30 : vector<8x128xf32>
    %33 = arith.divf %31, %32 : vector<8x128xf32>
    %34 = vector.extract_strided_slice %21 {offsets = [0, 128], sizes = [8, 128], strides = [1, 1]} : vector<8x384xf32> to vector<8x128xf32>
    %35 = vector.extract_strided_slice %25 {offsets = [0, 128], sizes = [8, 128], strides = [1, 1]} : vector<8x384xf32> to vector<8x128xf32>
    %36 = arith.addf %34, %35 : vector<8x128xf32>
    %37 = arith.negf %36 : vector<8x128xf32>
    %38 = math.exp %37 : vector<8x128xf32>
    %cst_26 = arith.constant 1.000000e+00 : f32
    %39 = vector.broadcast %cst_26 : f32 to vector<8x128xf32>
    %40 = arith.addf %39, %38 : vector<8x128xf32>
    %41 = arith.divf %39, %40 : vector<8x128xf32>
    %42 = vector.extract_strided_slice %21 {offsets = [0, 256], sizes = [8, 128], strides = [1, 1]} : vector<8x384xf32> to vector<8x128xf32>
    %43 = vector.extract_strided_slice %25 {offsets = [0, 256], sizes = [8, 128], strides = [1, 1]} : vector<8x384xf32> to vector<8x128xf32>
    %44 = vector.broadcast %14 : vector<1x128xf32> to vector<8x128xf32>
    %45 = arith.addf %43, %44 : vector<8x128xf32>
    %46 = arith.mulf %33, %45 : vector<8x128xf32>
    %47 = arith.addf %42, %46 : vector<8x128xf32>
    %48 = math.tanh %47 : vector<8x128xf32>
    %cst_27 = arith.constant 1.000000e+00 : f32
    %49 = vector.broadcast %cst_27 : f32 to vector<8x128xf32>
    %50 = arith.subf %49, %41 : vector<8x128xf32>
    %51 = arith.mulf %50, %48 : vector<8x128xf32>
    %52 = arith.mulf %41, %16 : vector<8x128xf32>
    %53 = arith.addf %51, %52 : vector<8x128xf32>
    %54 = vector.broadcast %18 : i32 to vector<8x1xi32>
    %55 = arith.cmpi sgt, %12, %54 : vector<8x1xi32>
    %56 = arith.extui %55 : vector<8x1xi1> to vector<8x1xi32>
    %57 = arith.sitofp %56 : vector<8x1xi32> to vector<8x1xf32>
    %58 = vector.broadcast %57 : vector<8x1xf32> to vector<8x128xf32>
    %59 = arith.mulf %58, %53 : vector<8x128xf32>
    %cst_28 = arith.constant 1.000000e+00 : f32
    %60 = vector.broadcast %cst_28 : f32 to vector<8x1xf32>
    %61 = arith.subf %60, %57 : vector<8x1xf32>
    %62 = vector.broadcast %61 : vector<8x1xf32> to vector<8x128xf32>
    %63 = arith.mulf %62, %16 : vector<8x128xf32>
    %64 = arith.addf %59, %63 : vector<8x128xf32>
    %65 = vector.broadcast %57 : vector<8x1xf32> to vector<8x128xf32>
    %66 = arith.mulf %65, %53 : vector<8x128xf32>
    %67 = arith.index_cast %18 : i32 to index
    %c0_29 = arith.constant 0 : index
    %c0_30 = arith.constant 0 : index
    %68 = vector.load %arg8[%67, %c0_29, %c0_30] : memref<6x8x128xf32, #tpu.memory_space<vmem>>, vector<1x8x128xf32>
    %69 = vector.shape_cast %68 : vector<1x8x128xf32> to vector<8x128xf32>
    %70 = vector.shape_cast %66 : vector<8x128xf32> to vector<1x8x128xf32>
    tpu.vector_store %arg8[%67, %c0_29, %c0_30], %70 {strides = array<i32>} : memref<6x8x128xf32, #tpu.memory_space<vmem>>, vector<1x8x128xf32>,
    %c3_i32 = arith.constant 3 : i32
    %71 = arith.muli %arg0, %c3_i32 : i32
    %c1_i32 = arith.constant 1 : i32
    %72 = arith.addi %71, %c1_i32 : i32
    %73 = arith.index_cast %72 : i32 to index
    %c0_31 = arith.constant 0 : index
    %c0_32 = arith.constant 0 : index
    %74 = vector.load %arg10[%73, %c0_31, %c0_32] : memref<6x8x384xf32, #tpu.memory_space<vmem>>, vector<1x8x384xf32>
    %75 = vector.shape_cast %74 : vector<1x8x384xf32> to vector<8x384xf32>
    %76 = arith.truncf %64 : vector<8x128xf32> to vector<8x128xbf16>
    %c0_33 = arith.constant 0 : index
    %c0_34 = arith.constant 0 : index
    %c0_35 = arith.constant 0 : index
    %77 = vector.load %arg5[%c0_33, %c0_34, %c0_35] : memref<1x128x384xbf16, #tpu.memory_space<vmem>>, vector<1x128x384xbf16>
    %78 = vector.shape_cast %77 : vector<1x128x384xbf16> to vector<128x384xbf16>
    %cst_36 = arith.constant dense<0.000000e+00> : vector<8x384xf32>
    %79 = tpu.matmul %76, %78, %cst_36 {dimension_numbers = #tpu.dot_dimension_numbers<[1], [0], [0], [1], [0, 0, 1, 1], [], []>} : vector<8x128xbf16>, vector<128x384xbf16>, vector<8x384xf32> -> vector<8x384xf32>
    %80 = vector.extract_strided_slice %75 {offsets = [0, 0], sizes = [8, 128], strides = [1, 1]} : vector<8x384xf32> to vector<8x128xf32>
    %81 = vector.extract_strided_slice %79 {offsets = [0, 0], sizes = [8, 128], strides = [1, 1]} : vector<8x384xf32> to vector<8x128xf32>
    %82 = arith.addf %80, %81 : vector<8x128xf32>
    %83 = arith.negf %82 : vector<8x128xf32>
    %84 = math.exp %83 : vector<8x128xf32>
    %cst_37 = arith.constant 1.000000e+00 : f32
    %85 = vector.broadcast %cst_37 : f32 to vector<8x128xf32>
    %86 = arith.addf %85, %84 : vector<8x128xf32>
    %87 = arith.divf %85, %86 : vector<8x128xf32>
    %88 = vector.extract_strided_slice %75 {offsets = [0, 128], sizes = [8, 128], strides = [1, 1]} : vector<8x384xf32> to vector<8x128xf32>
    %89 = vector.extract_strided_slice %79 {offsets = [0, 128], sizes = [8, 128], strides = [1, 1]} : vector<8x384xf32> to vector<8x128xf32>
    %90 = arith.addf %88, %89 : vector<8x128xf32>
    %91 = arith.negf %90 : vector<8x128xf32>
    %92 = math.exp %91 : vector<8x128xf32>
    %cst_38 = arith.constant 1.000000e+00 : f32
    %93 = vector.broadcast %cst_38 : f32 to vector<8x128xf32>
    %94 = arith.addf %93, %92 : vector<8x128xf32>
    %95 = arith.divf %93, %94 : vector<8x128xf32>
    %96 = vector.extract_strided_slice %75 {offsets = [0, 256], sizes = [8, 128], strides = [1, 1]} : vector<8x384xf32> to vector<8x128xf32>
    %97 = vector.extract_strided_slice %79 {offsets = [0, 256], sizes = [8, 128], strides = [1, 1]} : vector<8x384xf32> to vector<8x128xf32>
    %98 = vector.broadcast %14 : vector<1x128xf32> to vector<8x128xf32>
    %99 = arith.addf %97, %98 : vector<8x128xf32>
    %100 = arith.mulf %87, %99 : vector<8x128xf32>
    %101 = arith.addf %96, %100 : vector<8x128xf32>
    %102 = math.tanh %101 : vector<8x128xf32>
    %cst_39 = arith.constant 1.000000e+00 : f32
    %103 = vector.broadcast %cst_39 : f32 to vector<8x128xf32>
    %104 = arith.subf %103, %95 : vector<8x128xf32>
    %105 = arith.mulf %104, %102 : vector<8x128xf32>
    %106 = arith.mulf %95, %64 : vector<8x128xf32>
    %107 = arith.addf %105, %106 : vector<8x128xf32>
    %108 = vector.broadcast %72 : i32 to vector<8x1xi32>
    %109 = arith.cmpi sgt, %12, %108 : vector<8x1xi32>
    %110 = arith.extui %109 : vector<8x1xi1> to vector<8x1xi32>
    %111 = arith.sitofp %110 : vector<8x1xi32> to vector<8x1xf32>
    %112 = vector.broadcast %111 : vector<8x1xf32> to vector<8x128xf32>
    %113 = arith.mulf %112, %107 : vector<8x128xf32>
    %cst_40 = arith.constant 1.000000e+00 : f32
    %114 = vector.broadcast %cst_40 : f32 to vector<8x1xf32>
    %115 = arith.subf %114, %111 : vector<8x1xf32>
    %116 = vector.broadcast %115 : vector<8x1xf32> to vector<8x128xf32>
    %117 = arith.mulf %116, %64 : vector<8x128xf32>
    %118 = arith.addf %113, %117 : vector<8x128xf32>
    %119 = vector.broadcast %111 : vector<8x1xf32> to vector<8x128xf32>
    %120 = arith.mulf %119, %107 : vector<8x128xf32>
    %121 = arith.index_cast %72 : i32 to index
    %c0_41 = arith.constant 0 : index
    %c0_42 = arith.constant 0 : index
    %122 = vector.load %arg8[%121, %c0_41, %c0_42] : memref<6x8x128xf32, #tpu.memory_space<vmem>>, vector<1x8x128xf32>
    %123 = vector.shape_cast %122 : vector<1x8x128xf32> to vector<8x128xf32>
    %124 = vector.shape_cast %120 : vector<8x128xf32> to vector<1x8x128xf32>
    tpu.vector_store %arg8[%121, %c0_41, %c0_42], %124 {strides = array<i32>} : memref<6x8x128xf32, #tpu.memory_space<vmem>>, vector<1x8x128xf32>,
    %c1_i32_43 = arith.constant 1 : i32
    %125 = arith.muli %arg0, %c1_i32_43 : i32
    %c2_i32 = arith.constant 2 : i32
    %126 = arith.addi %125, %c2_i32 : i32
    %127 = arith.index_cast %126 : i32 to index
    %c0_44 = arith.constant 0 : index
    %c0_45 = arith.constant 0 : index
    %128 = vector.load %arg10[%127, %c0_44, %c0_45] : memref<6x8x384xf32, #tpu.memory_space<vmem>>, vector<1x8x384xf32>
    %129 = vector.shape_cast %128 : vector<1x8x384xf32> to vector<8x384xf32>
    %130 = arith.truncf %118 : vector<8x128xf32> to vector<8x128xbf16>
    %c0_46 = arith.constant 0 : index
    %c0_47 = arith.constant 0 : index
    %c0_48 = arith.constant 0 : index
    %131 = vector.load %arg5[%c0_46, %c0_47, %c0_48] : memref<1x128x384xbf16, #tpu.memory_space<vmem>>, vector<1x128x384xbf16>
    %132 = vector.shape_cast %131 : vector<1x128x384xbf16> to vector<128x384xbf16>
    %cst_49 = arith.constant dense<0.000000e+00> : vector<8x384xf32>
    %133 = tpu.matmul %130, %132, %cst_49 {dimension_numbers = #tpu.dot_dimension_numbers<[1], [0], [0], [1], [0, 0, 1, 1], [], []>} : vector<8x128xbf16>, vector<128x384xbf16>, vector<8x384xf32> -> vector<8x384xf32>
    %134 = vector.extract_strided_slice %129 {offsets = [0, 0], sizes = [8, 128], strides = [1, 1]} : vector<8x384xf32> to vector<8x128xf32>
    %135 = vector.extract_strided_slice %133 {offsets = [0, 0], sizes = [8, 128], strides = [1, 1]} : vector<8x384xf32> to vector<8x128xf32>
    %136 = arith.addf %134, %135 : vector<8x128xf32>
    %137 = arith.negf %136 : vector<8x128xf32>
    %138 = math.exp %137 : vector<8x128xf32>
    %cst_50 = arith.constant 1.000000e+00 : f32
    %139 = vector.broadcast %cst_50 : f32 to vector<8x128xf32>
    %140 = arith.addf %139, %138 : vector<8x128xf32>
    %141 = arith.divf %139, %140 : vector<8x128xf32>
    %142 = vector.extract_strided_slice %129 {offsets = [0, 128], sizes = [8, 128], strides = [1, 1]} : vector<8x384xf32> to vector<8x128xf32>
    %143 = vector.extract_strided_slice %133 {offsets = [0, 128], sizes = [8, 128], strides = [1, 1]} : vector<8x384xf32> to vector<8x128xf32>
    %144 = arith.addf %142, %143 : vector<8x128xf32>
    %145 = arith.negf %144 : vector<8x128xf32>
    %146 = math.exp %145 : vector<8x128xf32>
    %cst_51 = arith.constant 1.000000e+00 : f32
    %147 = vector.broadcast %cst_51 : f32 to vector<8x128xf32>
    %148 = arith.addf %147, %146 : vector<8x128xf32>
    %149 = arith.divf %147, %148 : vector<8x128xf32>
    %150 = vector.extract_strided_slice %129 {offsets = [0, 256], sizes = [8, 128], strides = [1, 1]} : vector<8x384xf32> to vector<8x128xf32>
    %151 = vector.extract_strided_slice %133 {offsets = [0, 256], sizes = [8, 128], strides = [1, 1]} : vector<8x384xf32> to vector<8x128xf32>
    %152 = vector.broadcast %14 : vector<1x128xf32> to vector<8x128xf32>
    %153 = arith.addf %151, %152 : vector<8x128xf32>
    %154 = arith.mulf %141, %153 : vector<8x128xf32>
    %155 = arith.addf %150, %154 : vector<8x128xf32>
    %156 = math.tanh %155 : vector<8x128xf32>
    %cst_52 = arith.constant 1.000000e+00 : f32
    %157 = vector.broadcast %cst_52 : f32 to vector<8x128xf32>
    %158 = arith.subf %157, %149 : vector<8x128xf32>
    %159 = arith.mulf %158, %156 : vector<8x128xf32>
    %160 = arith.mulf %149, %118 : vector<8x128xf32>
    %161 = arith.addf %159, %160 : vector<8x128xf32>
    %162 = vector.broadcast %126 : i32 to vector<8x1xi32>
    %163 = arith.cmpi sgt, %12, %162 : vector<8x1xi32>
    %164 = arith.extui %163 : vector<8x1xi1> to vector<8x1xi32>
    %165 = arith.sitofp %164 : vector<8x1xi32> to vector<8x1xf32>
    %166 = vector.broadcast %165 : vector<8x1xf32> to vector<8x128xf32>
    %167 = arith.mulf %166, %161 : vector<8x128xf32>
    %cst_53 = arith.constant 1.000000e+00 : f32
    %168 = vector.broadcast %cst_53 : f32 to vector<8x1xf32>
    %169 = arith.subf %168, %165 : vector<8x1xf32>
    %170 = vector.broadcast %169 : vector<8x1xf32> to vector<8x128xf32>
    %171 = arith.mulf %170, %118 : vector<8x128xf32>
    %172 = arith.addf %167, %171 : vector<8x128xf32>
    %173 = vector.broadcast %165 : vector<8x1xf32> to vector<8x128xf32>
    %174 = arith.mulf %173, %161 : vector<8x128xf32>
    %175 = arith.index_cast %126 : i32 to index
    %c0_54 = arith.constant 0 : index
    %c0_55 = arith.constant 0 : index
    %176 = vector.load %arg8[%175, %c0_54, %c0_55] : memref<6x8x128xf32, #tpu.memory_space<vmem>>, vector<1x8x128xf32>
    %177 = vector.shape_cast %176 : vector<1x8x128xf32> to vector<8x128xf32>
    %178 = vector.shape_cast %174 : vector<8x128xf32> to vector<1x8x128xf32>
    tpu.vector_store %arg8[%175, %c0_54, %c0_55], %178 {strides = array<i32>} : memref<6x8x128xf32, #tpu.memory_space<vmem>>, vector<1x8x128xf32>,
    %c-1_i32 = arith.constant -1 : i32
    %179 = arith.muli %arg0, %c-1_i32 : i32
    %c3_i32_56 = arith.constant 3 : i32
    %180 = arith.addi %179, %c3_i32_56 : i32
    %181 = arith.index_cast %180 : i32 to index
    %c0_57 = arith.constant 0 : index
    %c0_58 = arith.constant 0 : index
    %182 = vector.load %arg10[%181, %c0_57, %c0_58] : memref<6x8x384xf32, #tpu.memory_space<vmem>>, vector<1x8x384xf32>
    %183 = vector.shape_cast %182 : vector<1x8x384xf32> to vector<8x384xf32>
    %184 = arith.truncf %172 : vector<8x128xf32> to vector<8x128xbf16>
    %c0_59 = arith.constant 0 : index
    %c0_60 = arith.constant 0 : index
    %c0_61 = arith.constant 0 : index
    %185 = vector.load %arg5[%c0_59, %c0_60, %c0_61] : memref<1x128x384xbf16, #tpu.memory_space<vmem>>, vector<1x128x384xbf16>
    %186 = vector.shape_cast %185 : vector<1x128x384xbf16> to vector<128x384xbf16>
    %cst_62 = arith.constant dense<0.000000e+00> : vector<8x384xf32>
    %187 = tpu.matmul %184, %186, %cst_62 {dimension_numbers = #tpu.dot_dimension_numbers<[1], [0], [0], [1], [0, 0, 1, 1], [], []>} : vector<8x128xbf16>, vector<128x384xbf16>, vector<8x384xf32> -> vector<8x384xf32>
    %188 = vector.extract_strided_slice %183 {offsets = [0, 0], sizes = [8, 128], strides = [1, 1]} : vector<8x384xf32> to vector<8x128xf32>
    %189 = vector.extract_strided_slice %187 {offsets = [0, 0], sizes = [8, 128], strides = [1, 1]} : vector<8x384xf32> to vector<8x128xf32>
    %190 = arith.addf %188, %189 : vector<8x128xf32>
    %191 = arith.negf %190 : vector<8x128xf32>
    %192 = math.exp %191 : vector<8x128xf32>
    %cst_63 = arith.constant 1.000000e+00 : f32
    %193 = vector.broadcast %cst_63 : f32 to vector<8x128xf32>
    %194 = arith.addf %193, %192 : vector<8x128xf32>
    %195 = arith.divf %193, %194 : vector<8x128xf32>
    %196 = vector.extract_strided_slice %183 {offsets = [0, 128], sizes = [8, 128], strides = [1, 1]} : vector<8x384xf32> to vector<8x128xf32>
    %197 = vector.extract_strided_slice %187 {offsets = [0, 128], sizes = [8, 128], strides = [1, 1]} : vector<8x384xf32> to vector<8x128xf32>
    %198 = arith.addf %196, %197 : vector<8x128xf32>
    %199 = arith.negf %198 : vector<8x128xf32>
    %200 = math.exp %199 : vector<8x128xf32>
    %cst_64 = arith.constant 1.000000e+00 : f32
    %201 = vector.broadcast %cst_64 : f32 to vector<8x128xf32>
    %202 = arith.addf %201, %200 : vector<8x128xf32>
    %203 = arith.divf %201, %202 : vector<8x128xf32>
    %204 = vector.extract_strided_slice %183 {offsets = [0, 256], sizes = [8, 128], strides = [1, 1]} : vector<8x384xf32> to vector<8x128xf32>
    %205 = vector.extract_strided_slice %187 {offsets = [0, 256], sizes = [8, 128], strides = [1, 1]} : vector<8x384xf32> to vector<8x128xf32>
    %206 = vector.broadcast %14 : vector<1x128xf32> to vector<8x128xf32>
    %207 = arith.addf %205, %206 : vector<8x128xf32>
    %208 = arith.mulf %195, %207 : vector<8x128xf32>
    %209 = arith.addf %204, %208 : vector<8x128xf32>
    %210 = math.tanh %209 : vector<8x128xf32>
    %cst_65 = arith.constant 1.000000e+00 : f32
    %211 = vector.broadcast %cst_65 : f32 to vector<8x128xf32>
    %212 = arith.subf %211, %203 : vector<8x128xf32>
    %213 = arith.mulf %212, %210 : vector<8x128xf32>
    %214 = arith.mulf %203, %172 : vector<8x128xf32>
    %215 = arith.addf %213, %214 : vector<8x128xf32>
    %216 = vector.broadcast %180 : i32 to vector<8x1xi32>
    %217 = arith.cmpi sgt, %12, %216 : vector<8x1xi32>
    %218 = arith.extui %217 : vector<8x1xi1> to vector<8x1xi32>
    %219 = arith.sitofp %218 : vector<8x1xi32> to vector<8x1xf32>
    %220 = vector.broadcast %219 : vector<8x1xf32> to vector<8x128xf32>
    %221 = arith.mulf %220, %215 : vector<8x128xf32>
    %cst_66 = arith.constant 1.000000e+00 : f32
    %222 = vector.broadcast %cst_66 : f32 to vector<8x1xf32>
    %223 = arith.subf %222, %219 : vector<8x1xf32>
    %224 = vector.broadcast %223 : vector<8x1xf32> to vector<8x128xf32>
    %225 = arith.mulf %224, %172 : vector<8x128xf32>
    %226 = arith.addf %221, %225 : vector<8x128xf32>
    %227 = vector.broadcast %219 : vector<8x1xf32> to vector<8x128xf32>
    %228 = arith.mulf %227, %215 : vector<8x128xf32>
    %229 = arith.index_cast %180 : i32 to index
    %c0_67 = arith.constant 0 : index
    %c0_68 = arith.constant 0 : index
    %230 = vector.load %arg8[%229, %c0_67, %c0_68] : memref<6x8x128xf32, #tpu.memory_space<vmem>>, vector<1x8x128xf32>
    %231 = vector.shape_cast %230 : vector<1x8x128xf32> to vector<8x128xf32>
    %232 = vector.shape_cast %228 : vector<8x128xf32> to vector<1x8x128xf32>
    tpu.vector_store %arg8[%229, %c0_67, %c0_68], %232 {strides = array<i32>} : memref<6x8x128xf32, #tpu.memory_space<vmem>>, vector<1x8x128xf32>,
    %c-3_i32 = arith.constant -3 : i32
    %233 = arith.muli %arg0, %c-3_i32 : i32
    %c4_i32 = arith.constant 4 : i32
    %234 = arith.addi %233, %c4_i32 : i32
    %235 = arith.index_cast %234 : i32 to index
    %c0_69 = arith.constant 0 : index
    %c0_70 = arith.constant 0 : index
    %236 = vector.load %arg10[%235, %c0_69, %c0_70] : memref<6x8x384xf32, #tpu.memory_space<vmem>>, vector<1x8x384xf32>
    %237 = vector.shape_cast %236 : vector<1x8x384xf32> to vector<8x384xf32>
    %238 = arith.truncf %226 : vector<8x128xf32> to vector<8x128xbf16>
    %c0_71 = arith.constant 0 : index
    %c0_72 = arith.constant 0 : index
    %c0_73 = arith.constant 0 : index
    %239 = vector.load %arg5[%c0_71, %c0_72, %c0_73] : memref<1x128x384xbf16, #tpu.memory_space<vmem>>, vector<1x128x384xbf16>
    %240 = vector.shape_cast %239 : vector<1x128x384xbf16> to vector<128x384xbf16>
    %cst_74 = arith.constant dense<0.000000e+00> : vector<8x384xf32>
    %241 = tpu.matmul %238, %240, %cst_74 {dimension_numbers = #tpu.dot_dimension_numbers<[1], [0], [0], [1], [0, 0, 1, 1], [], []>} : vector<8x128xbf16>, vector<128x384xbf16>, vector<8x384xf32> -> vector<8x384xf32>
    %242 = vector.extract_strided_slice %237 {offsets = [0, 0], sizes = [8, 128], strides = [1, 1]} : vector<8x384xf32> to vector<8x128xf32>
    %243 = vector.extract_strided_slice %241 {offsets = [0, 0], sizes = [8, 128], strides = [1, 1]} : vector<8x384xf32> to vector<8x128xf32>
    %244 = arith.addf %242, %243 : vector<8x128xf32>
    %245 = arith.negf %244 : vector<8x128xf32>
    %246 = math.exp %245 : vector<8x128xf32>
    %cst_75 = arith.constant 1.000000e+00 : f32
    %247 = vector.broadcast %cst_75 : f32 to vector<8x128xf32>
    %248 = arith.addf %247, %246 : vector<8x128xf32>
    %249 = arith.divf %247, %248 : vector<8x128xf32>
    %250 = vector.extract_strided_slice %237 {offsets = [0, 128], sizes = [8, 128], strides = [1, 1]} : vector<8x384xf32> to vector<8x128xf32>
    %251 = vector.extract_strided_slice %241 {offsets = [0, 128], sizes = [8, 128], strides = [1, 1]} : vector<8x384xf32> to vector<8x128xf32>
    %252 = arith.addf %250, %251 : vector<8x128xf32>
    %253 = arith.negf %252 : vector<8x128xf32>
    %254 = math.exp %253 : vector<8x128xf32>
    %cst_76 = arith.constant 1.000000e+00 : f32
    %255 = vector.broadcast %cst_76 : f32 to vector<8x128xf32>
    %256 = arith.addf %255, %254 : vector<8x128xf32>
    %257 = arith.divf %255, %256 : vector<8x128xf32>
    %258 = vector.extract_strided_slice %237 {offsets = [0, 256], sizes = [8, 128], strides = [1, 1]} : vector<8x384xf32> to vector<8x128xf32>
    %259 = vector.extract_strided_slice %241 {offsets = [0, 256], sizes = [8, 128], strides = [1, 1]} : vector<8x384xf32> to vector<8x128xf32>
    %260 = vector.broadcast %14 : vector<1x128xf32> to vector<8x128xf32>
    %261 = arith.addf %259, %260 : vector<8x128xf32>
    %262 = arith.mulf %249, %261 : vector<8x128xf32>
    %263 = arith.addf %258, %262 : vector<8x128xf32>
    %264 = math.tanh %263 : vector<8x128xf32>
    %cst_77 = arith.constant 1.000000e+00 : f32
    %265 = vector.broadcast %cst_77 : f32 to vector<8x128xf32>
    %266 = arith.subf %265, %257 : vector<8x128xf32>
    %267 = arith.mulf %266, %264 : vector<8x128xf32>
    %268 = arith.mulf %257, %226 : vector<8x128xf32>
    %269 = arith.addf %267, %268 : vector<8x128xf32>
    %270 = vector.broadcast %234 : i32 to vector<8x1xi32>
    %271 = arith.cmpi sgt, %12, %270 : vector<8x1xi32>
    %272 = arith.extui %271 : vector<8x1xi1> to vector<8x1xi32>
    %273 = arith.sitofp %272 : vector<8x1xi32> to vector<8x1xf32>
    %274 = vector.broadcast %273 : vector<8x1xf32> to vector<8x128xf32>
    %275 = arith.mulf %274, %269 : vector<8x128xf32>
    %cst_78 = arith.constant 1.000000e+00 : f32
    %276 = vector.broadcast %cst_78 : f32 to vector<8x1xf32>
    %277 = arith.subf %276, %273 : vector<8x1xf32>
    %278 = vector.broadcast %277 : vector<8x1xf32> to vector<8x128xf32>
    %279 = arith.mulf %278, %226 : vector<8x128xf32>
    %280 = arith.addf %275, %279 : vector<8x128xf32>
    %281 = vector.broadcast %273 : vector<8x1xf32> to vector<8x128xf32>
    %282 = arith.mulf %281, %269 : vector<8x128xf32>
    %283 = arith.index_cast %234 : i32 to index
    %c0_79 = arith.constant 0 : index
    %c0_80 = arith.constant 0 : index
    %284 = vector.load %arg8[%283, %c0_79, %c0_80] : memref<6x8x128xf32, #tpu.memory_space<vmem>>, vector<1x8x128xf32>
    %285 = vector.shape_cast %284 : vector<1x8x128xf32> to vector<8x128xf32>
    %286 = vector.shape_cast %282 : vector<8x128xf32> to vector<1x8x128xf32>
    tpu.vector_store %arg8[%283, %c0_79, %c0_80], %286 {strides = array<i32>} : memref<6x8x128xf32, #tpu.memory_space<vmem>>, vector<1x8x128xf32>,
    %c-5_i32 = arith.constant -5 : i32
    %287 = arith.muli %arg0, %c-5_i32 : i32
    %c5_i32_81 = arith.constant 5 : i32
    %288 = arith.addi %287, %c5_i32_81 : i32
    %289 = arith.index_cast %288 : i32 to index
    %c0_82 = arith.constant 0 : index
    %c0_83 = arith.constant 0 : index
    %290 = vector.load %arg10[%289, %c0_82, %c0_83] : memref<6x8x384xf32, #tpu.memory_space<vmem>>, vector<1x8x384xf32>
    %291 = vector.shape_cast %290 : vector<1x8x384xf32> to vector<8x384xf32>
    %292 = arith.truncf %280 : vector<8x128xf32> to vector<8x128xbf16>
    %c0_84 = arith.constant 0 : index
    %c0_85 = arith.constant 0 : index
    %c0_86 = arith.constant 0 : index
    %293 = vector.load %arg5[%c0_84, %c0_85, %c0_86] : memref<1x128x384xbf16, #tpu.memory_space<vmem>>, vector<1x128x384xbf16>
    %294 = vector.shape_cast %293 : vector<1x128x384xbf16> to vector<128x384xbf16>
    %cst_87 = arith.constant dense<0.000000e+00> : vector<8x384xf32>
    %295 = tpu.matmul %292, %294, %cst_87 {dimension_numbers = #tpu.dot_dimension_numbers<[1], [0], [0], [1], [0, 0, 1, 1], [], []>} : vector<8x128xbf16>, vector<128x384xbf16>, vector<8x384xf32> -> vector<8x384xf32>
    %296 = vector.extract_strided_slice %291 {offsets = [0, 0], sizes = [8, 128], strides = [1, 1]} : vector<8x384xf32> to vector<8x128xf32>
    %297 = vector.extract_strided_slice %295 {offsets = [0, 0], sizes = [8, 128], strides = [1, 1]} : vector<8x384xf32> to vector<8x128xf32>
    %298 = arith.addf %296, %297 : vector<8x128xf32>
    %299 = arith.negf %298 : vector<8x128xf32>
    %300 = math.exp %299 : vector<8x128xf32>
    %cst_88 = arith.constant 1.000000e+00 : f32
    %301 = vector.broadcast %cst_88 : f32 to vector<8x128xf32>
    %302 = arith.addf %301, %300 : vector<8x128xf32>
    %303 = arith.divf %301, %302 : vector<8x128xf32>
    %304 = vector.extract_strided_slice %291 {offsets = [0, 128], sizes = [8, 128], strides = [1, 1]} : vector<8x384xf32> to vector<8x128xf32>
    %305 = vector.extract_strided_slice %295 {offsets = [0, 128], sizes = [8, 128], strides = [1, 1]} : vector<8x384xf32> to vector<8x128xf32>
    %306 = arith.addf %304, %305 : vector<8x128xf32>
    %307 = arith.negf %306 : vector<8x128xf32>
    %308 = math.exp %307 : vector<8x128xf32>
    %cst_89 = arith.constant 1.000000e+00 : f32
    %309 = vector.broadcast %cst_89 : f32 to vector<8x128xf32>
    %310 = arith.addf %309, %308 : vector<8x128xf32>
    %311 = arith.divf %309, %310 : vector<8x128xf32>
    %312 = vector.extract_strided_slice %291 {offsets = [0, 256], sizes = [8, 128], strides = [1, 1]} : vector<8x384xf32> to vector<8x128xf32>
    %313 = vector.extract_strided_slice %295 {offsets = [0, 256], sizes = [8, 128], strides = [1, 1]} : vector<8x384xf32> to vector<8x128xf32>
    %314 = vector.broadcast %14 : vector<1x128xf32> to vector<8x128xf32>
    %315 = arith.addf %313, %314 : vector<8x128xf32>
    %316 = arith.mulf %303, %315 : vector<8x128xf32>
    %317 = arith.addf %312, %316 : vector<8x128xf32>
    %318 = math.tanh %317 : vector<8x128xf32>
    %cst_90 = arith.constant 1.000000e+00 : f32
    %319 = vector.broadcast %cst_90 : f32 to vector<8x128xf32>
    %320 = arith.subf %319, %311 : vector<8x128xf32>
    %321 = arith.mulf %320, %318 : vector<8x128xf32>
    %322 = arith.mulf %311, %280 : vector<8x128xf32>
    %323 = arith.addf %321, %322 : vector<8x128xf32>
    %324 = vector.broadcast %288 : i32 to vector<8x1xi32>
    %325 = arith.cmpi sgt, %12, %324 : vector<8x1xi32>
    %326 = arith.extui %325 : vector<8x1xi1> to vector<8x1xi32>
    %327 = arith.sitofp %326 : vector<8x1xi32> to vector<8x1xf32>
    %328 = vector.broadcast %327 : vector<8x1xf32> to vector<8x128xf32>
    %329 = arith.mulf %328, %323 : vector<8x128xf32>
    %cst_91 = arith.constant 1.000000e+00 : f32
    %330 = vector.broadcast %cst_91 : f32 to vector<8x1xf32>
    %331 = arith.subf %330, %327 : vector<8x1xf32>
    %332 = vector.broadcast %331 : vector<8x1xf32> to vector<8x128xf32>
    %333 = arith.mulf %332, %280 : vector<8x128xf32>
    %334 = arith.addf %329, %333 : vector<8x128xf32>
    %335 = vector.broadcast %327 : vector<8x1xf32> to vector<8x128xf32>
    %336 = arith.mulf %335, %323 : vector<8x128xf32>
    %337 = arith.index_cast %288 : i32 to index
    %c0_92 = arith.constant 0 : index
    %c0_93 = arith.constant 0 : index
    %338 = vector.load %arg8[%337, %c0_92, %c0_93] : memref<6x8x128xf32, #tpu.memory_space<vmem>>, vector<1x8x128xf32>
    %339 = vector.shape_cast %338 : vector<1x8x128xf32> to vector<8x128xf32>
    %340 = vector.shape_cast %336 : vector<8x128xf32> to vector<1x8x128xf32>
    tpu.vector_store %arg8[%337, %c0_92, %c0_93], %340 {strides = array<i32>} : memref<6x8x128xf32, #tpu.memory_space<vmem>>, vector<1x8x128xf32>,
    %c0_94 = arith.constant 0 : index
    %c0_95 = arith.constant 0 : index
    %c0_96 = arith.constant 0 : index
    %341 = vector.load %arg9[%c0_94, %c0_95, %c0_96] : memref<1x8x128xf32, #tpu.memory_space<vmem>>, vector<1x8x128xf32>
    %342 = vector.shape_cast %341 : vector<1x8x128xf32> to vector<8x128xf32>
    %343 = vector.shape_cast %334 : vector<8x128xf32> to vector<1x8x128xf32>
    tpu.vector_store %arg9[%c0_94, %c0_95, %c0_96], %343 {strides = array<i32>} : memref<1x8x128xf32, #tpu.memory_space<vmem>>, vector<1x8x128xf32>,
    return
  }
  func.func @transform_0(%arg0: i32) -> (i32, i32, i32) {
    %c0_i32 = arith.constant 0 : i32
    %c0_i32_0 = arith.constant 0 : i32
    %c0_i32_1 = arith.constant 0 : i32
    %c0_i32_2 = arith.constant 0 : i32
    return %c0_i32, %c0_i32_0, %c0_i32_1 : i32, i32, i32
  }
  func.func @transform_1(%arg0: i32) -> (i32, i32) {
    %c0_i32 = arith.constant 0 : i32
    %c0_i32_0 = arith.constant 0 : i32
    %c0_i32_1 = arith.constant 0 : i32
    return %c0_i32, %c0_i32_0 : i32, i32
  }
  func.func @transform_2(%arg0: i32) -> (i32, i32, i32) {
    %c0_i32 = arith.constant 0 : i32
    %c0_i32_0 = arith.constant 0 : i32
    %c0_i32_1 = arith.constant 0 : i32
    return %arg0, %c0_i32, %c0_i32_0 : i32, i32, i32
  }
  func.func @transform_3(%arg0: i32) -> (i32, i32, i32) {
    %c0_i32 = arith.constant 0 : i32
    %c0_i32_0 = arith.constant 0 : i32
    %c0_i32_1 = arith.constant 0 : i32
    return %arg0, %c0_i32, %c0_i32_0 : i32, i32, i32
  }
  func.func @transform_4(%arg0: i32) -> (i32, i32, i32) {
    %c0_i32 = arith.constant 0 : i32
    %c0_i32_0 = arith.constant 0 : i32
    %c0_i32_1 = arith.constant 0 : i32
    return %arg0, %c0_i32, %c0_i32_0 : i32, i32, i32
  }
  func.func @transform_5(%arg0: i32) -> (i32, i32, i32) {
    %c0_i32 = arith.constant 0 : i32
    %c0_i32_0 = arith.constant 0 : i32
    %c0_i32_1 = arith.constant 0 : i32
    return %arg0, %c0_i32, %c0_i32_0 : i32, i32, i32
  }
  func.func @transform_6(%arg0: i32) -> (i32, i32, i32) {
    %c0_i32 = arith.constant 0 : i32
    %c0_i32_0 = arith.constant 0 : i32
    %c0_i32_1 = arith.constant 0 : i32
    return %arg0, %c0_i32, %c0_i32_0 : i32, i32, i32
  }
  func.func @transform_7(%arg0: i32) -> (i32, i32, i32) {
    %c0_i32 = arith.constant 0 : i32
    %c0_i32_0 = arith.constant 0 : i32
    %c0_i32_1 = arith.constant 0 : i32
    return %c0_i32, %c0_i32_0, %arg0 : i32, i32, i32
  }
  func.func @transform_8(%arg0: i32) -> (i32, i32, i32) {
    %c0_i32 = arith.constant 0 : i32
    %c0_i32_0 = arith.constant 0 : i32
    %c0_i32_1 = arith.constant 0 : i32
    return %arg0, %c0_i32, %c0_i32_0 : i32, i32, i32
  }
}

module attributes {stable_mosaic.version = 11 : i64} {
  func.func @_bi_gru_dir_kernel(%arg0: i32, %arg1: memref<6x8x256xf32, #tpu.memory_space<vmem>>, %arg2: memref<8x1xi32, #tpu.memory_space<vmem>>, %arg3: memref<1x8x128xf32, #tpu.memory_space<vmem>>, %arg4: memref<1x256x384xbf16, #tpu.memory_space<vmem>>, %arg5: memref<1x128x384xbf16, #tpu.memory_space<vmem>>, %arg6: memref<1x1x384xf32, #tpu.memory_space<vmem>>, %arg7: memref<1x1x128xf32, #tpu.memory_space<vmem>>, %arg8: memref<6x8x128xf32, #tpu.memory_space<vmem>>, %arg9: memref<1x8x128xf32, #tpu.memory_space<vmem>>, %arg10: memref<6x8x384xf32, #tpu.memory_space<vmem>>) attributes {dimension_semantics = [#tpu.dimension_semantics<parallel>], iteration_bounds = array<i64: 2>, scalar_prefetch = 0 : i64, scratch_operands = 1 : i64, tpu.core_type = #tpu.core_type<tc>, window_params = [{pipeline_mode = #tpu.pipeline_mode<synchronous>, transform_indices = @transform_0, window_bounds = array<i64: 6, 8, 256>}, {pipeline_mode = #tpu.pipeline_mode<synchronous>, transform_indices = @transform_1, window_bounds = array<i64: 8, 1>}, {transform_indices = @transform_2, window_bounds = array<i64: 1, 8, 128>}, {transform_indices = @transform_3, window_bounds = array<i64: 1, 256, 384>}, {transform_indices = @transform_4, window_bounds = array<i64: 1, 128, 384>}, {transform_indices = @transform_5, window_bounds = array<i64: 1, 1, 384>}, {transform_indices = @transform_6, window_bounds = array<i64: 1, 1, 128>}, {transform_indices = @transform_7, window_bounds = array<i64: 6, 8, 128>}, {transform_indices = @transform_8, window_bounds = array<i64: 1, 8, 128>}]} {
    %c0 = arith.constant 0 : index
    %c0_0 = arith.constant 0 : index
    %c0_1 = arith.constant 0 : index
    %0 = vector.load %arg1[%c0, %c0_0, %c0_1] : memref<6x8x256xf32, #tpu.memory_space<vmem>>, vector<6x8x256xf32>
    %1 = vector.shape_cast %0 : vector<6x8x256xf32> to vector<48x256xf32>
    %2 = arith.truncf %1 : vector<48x256xf32> to vector<48x256xbf16>
    %c0_2 = arith.constant 0 : index
    %c0_3 = arith.constant 0 : index
    %c0_4 = arith.constant 0 : index
    %3 = vector.load %arg4[%c0_2, %c0_3, %c0_4] : memref<1x256x384xbf16, #tpu.memory_space<vmem>>, vector<1x256x384xbf16>
    %4 = vector.shape_cast %3 : vector<1x256x384xbf16> to vector<256x384xbf16>
    %cst = arith.constant dense<0.000000e+00> : vector<48x384xf32>
    %5 = tpu.matmul %2, %4, %cst {dimension_numbers = #tpu.dot_dimension_numbers<[1], [0], [0], [1], [0, 0, 1, 1], [], []>} : vector<48x256xbf16>, vector<256x384xbf16>, vector<48x384xf32> -> vector<48x384xf32>
    %c0_5 = arith.constant 0 : index
    %c0_6 = arith.constant 0 : index
    %c0_7 = arith.constant 0 : index
    %6 = vector.load %arg6[%c0_5, %c0_6, %c0_7] : memref<1x1x384xf32, #tpu.memory_space<vmem>>, vector<1x1x384xf32>
    %7 = vector.shape_cast %6 : vector<1x1x384xf32> to vector<1x384xf32>
    %8 = vector.broadcast %7 : vector<1x384xf32> to vector<48x384xf32>
    %9 = arith.addf %5, %8 : vector<48x384xf32>
    %10 = vector.shape_cast %9 : vector<48x384xf32> to vector<6x8x384xf32>
    %c0_8 = arith.constant 0 : index
    %c0_9 = arith.constant 0 : index
    %c0_10 = arith.constant 0 : index
    %11 = vector.load %arg10[%c0_8, %c0_9, %c0_10] : memref<6x8x384xf32, #tpu.memory_space<vmem>>, vector<6x8x384xf32>
    tpu.vector_store %arg10[%c0_8, %c0_9, %c0_10], %10 {strides = array<i32>} : memref<6x8x384xf32, #tpu.memory_space<vmem>>, vector<6x8x384xf32>,
    %c0_11 = arith.constant 0 : index
    %c0_12 = arith.constant 0 : index
    %12 = vector.load %arg2[%c0_11, %c0_12] : memref<8x1xi32, #tpu.memory_space<vmem>>, vector<8x1xi32>
    %c0_13 = arith.constant 0 : index
    %c0_14 = arith.constant 0 : index
    %c0_15 = arith.constant 0 : index
    %13 = vector.load %arg7[%c0_13, %c0_14, %c0_15] : memref<1x1x128xf32, #tpu.memory_space<vmem>>, vector<1x1x128xf32>
    %14 = vector.shape_cast %13 : vector<1x1x128xf32> to vector<1x128xf32>
    %c0_16 = arith.constant 0 : index
    %c0_17 = arith.constant 0 : index
    %c0_18 = arith.constant 0 : index
    %15 = vector.load %arg3[%c0_16, %c0_17, %c0_18] : memref<1x8x128xf32, #tpu.memory_space<vmem>>, vector<1x8x128xf32>
    %16 = vector.shape_cast %15 : vector<1x8x128xf32> to vector<8x128xf32>
    %c5_i32 = arith.constant 5 : i32
    %17 = arith.muli %arg0, %c5_i32 : i32
    %c0_i32 = arith.constant 0 : i32
    %18 = arith.addi %17, %c0_i32 : i32
    %19 = arith.index_cast %18 : i32 to index
    %c0_19 = arith.constant 0 : index
    %c0_20 = arith.constant 0 : index
    %20 = vector.load %arg10[%19, %c0_19, %c0_20] : memref<6x8x384xf32, #tpu.memory_space<vmem>>, vector<1x8x384xf32>
    %21 = vector.shape_cast %20 : vector<1x8x384xf32> to vector<8x384xf32>
    %22 = arith.truncf %16 : vector<8x128xf32> to vector<8x128xbf16>
    %c0_21 = arith.constant 0 : index
    %c0_22 = arith.constant 0 : index
    %c0_23 = arith.constant 0 : index
    %23 = vector.load %arg5[%c0_21, %c0_22, %c0_23] : memref<1x128x384xbf16, #tpu.memory_space<vmem>>, vector<1x128x384xbf16>
    %24 = vector.shape_cast %23 : vector<1x128x384xbf16> to vector<128x384xbf16>
    %cst_24 = arith.constant dense<0.000000e+00> : vector<8x384xf32>
    %25 = tpu.matmul %22, %24, %cst_24 {dimension_numbers = #tpu.dot_dimension_numbers<[1], [0], [0], [1], [0, 0, 1, 1], [], []>} : vector<8x128xbf16>, vector<128x384xbf16>, vector<8x384xf32> -> vector<8x384xf32>
    %26 = vector.extract_strided_slice %21 {offsets = [0, 0], sizes = [8, 128], strides = [1, 1]} : vector<8x384xf32> to vector<8x128xf32>
    %27 = vector.extract_strided_slice %25 {offsets = [0, 0], sizes = [8, 128], strides = [1, 1]} : vector<8x384xf32> to vector<8x128xf32>
    %28 = arith.addf %26, %27 : vector<8x128xf32>
    %29 = arith.negf %28 : vector<8x128xf32>
    %30 = math.exp %29 : vector<8x128xf32>
    %cst_25 = arith.constant 1.000000e+00 : f32
    %31 = vector.broadcast %cst_25 : f32 to vector<8x128xf32>
    %32 = arith.addf %31, %30 : vector<8x128xf32>
    %33 = arith.divf %31, %32 : vector<8x128xf32>
    %34 = vector.extract_strided_slice %21 {offsets = [0, 128], sizes = [8, 128], strides = [1, 1]} : vector<8x384xf32> to vector<8x128xf32>
    %35 = vector.extract_strided_slice %25 {offsets = [0, 128], sizes = [8, 128], strides = [1, 1]} : vector<8x384xf32> to vector<8x128xf32>
    %36 = arith.addf %34, %35 : vector<8x128xf32>
    %37 = arith.negf %36 : vector<8x128xf32>
    %38 = math.exp %37 : vector<8x128xf32>
    %cst_26 = arith.constant 1.000000e+00 : f32
    %39 = vector.broadcast %cst_26 : f32 to vector<8x128xf32>
    %40 = arith.addf %39, %38 : vector<8x128xf32>
    %41 = arith.divf %39, %40 : vector<8x128xf32>
    %42 = vector.extract_strided_slice %21 {offsets = [0, 256], sizes = [8, 128], strides = [1, 1]} : vector<8x384xf32> to vector<8x128xf32>
    %43 = vector.extract_strided_slice %25 {offsets = [0, 256], sizes = [8, 128], strides = [1, 1]} : vector<8x384xf32> to vector<8x128xf32>
    %44 = vector.broadcast %14 : vector<1x128xf32> to vector<8x128xf32>
    %45 = arith.addf %43, %44 : vector<8x128xf32>
    %46 = arith.mulf %33, %45 : vector<8x128xf32>
    %47 = arith.addf %42, %46 : vector<8x128xf32>
    %48 = math.tanh %47 : vector<8x128xf32>
    %cst_27 = arith.constant 1.000000e+00 : f32
    %49 = vector.broadcast %cst_27 : f32 to vector<8x128xf32>
    %50 = arith.subf %49, %41 : vector<8x128xf32>
    %51 = arith.mulf %50, %48 : vector<8x128xf32>
    %52 = arith.mulf %41, %16 : vector<8x128xf32>
    %53 = arith.addf %51, %52 : vector<8x128xf32>
    %54 = vector.broadcast %18 : i32 to vector<8x1xi32>
    %55 = arith.cmpi sgt, %12, %54 : vector<8x1xi32>
    %56 = arith.extui %55 : vector<8x1xi1> to vector<8x1xi32>
    %57 = arith.sitofp %56 : vector<8x1xi32> to vector<8x1xf32>
    %58 = vector.broadcast %57 : vector<8x1xf32> to vector<8x128xf32>
    %59 = arith.mulf %58, %53 : vector<8x128xf32>
    %cst_28 = arith.constant 1.000000e+00 : f32
    %60 = vector.broadcast %cst_28 : f32 to vector<8x1xf32>
    %61 = arith.subf %60, %57 : vector<8x1xf32>
    %62 = vector.broadcast %61 : vector<8x1xf32> to vector<8x128xf32>
    %63 = arith.mulf %62, %16 : vector<8x128xf32>
    %64 = arith.addf %59, %63 : vector<8x128xf32>
    %65 = vector.broadcast %57 : vector<8x1xf32> to vector<8x128xf32>
    %66 = arith.mulf %65, %53 : vector<8x128xf32>
    %67 = arith.index_cast %18 : i32 to index
    %c0_29 = arith.constant 0 : index
    %c0_30 = arith.constant 0 : index
    %68 = vector.load %arg8[%67, %c0_29, %c0_30] : memref<6x8x128xf32, #tpu.memory_space<vmem>>, vector<1x8x128xf32>
    %69 = vector.shape_cast %68 : vector<1x8x128xf32> to vector<8x128xf32>
    %70 = vector.shape_cast %66 : vector<8x128xf32> to vector<1x8x128xf32>
    tpu.vector_store %arg8[%67, %c0_29, %c0_30], %70 {strides = array<i32>} : memref<6x8x128xf32, #tpu.memory_space<vmem>>, vector<1x8x128xf32>,
    %c3_i32 = arith.constant 3 : i32
    %71 = arith.muli %arg0, %c3_i32 : i32
    %c1_i32 = arith.constant 1 : i32
    %72 = arith.addi %71, %c1_i32 : i32
    %73 = arith.index_cast %72 : i32 to index
    %c0_31 = arith.constant 0 : index
    %c0_32 = arith.constant 0 : index
    %74 = vector.load %arg10[%73, %c0_31, %c0_32] : memref<6x8x384xf32, #tpu.memory_space<vmem>>, vector<1x8x384xf32>
    %75 = vector.shape_cast %74 : vector<1x8x384xf32> to vector<8x384xf32>
    %76 = arith.truncf %64 : vector<8x128xf32> to vector<8x128xbf16>
    %c0_33 = arith.constant 0 : index
    %c0_34 = arith.constant 0 : index
    %c0_35 = arith.constant 0 : index
    %77 = vector.load %arg5[%c0_33, %c0_34, %c0_35] : memref<1x128x384xbf16, #tpu.memory_space<vmem>>, vector<1x128x384xbf16>
    %78 = vector.shape_cast %77 : vector<1x128x384xbf16> to vector<128x384xbf16>
    %cst_36 = arith.constant dense<0.000000e+00> : vector<8x384xf32>
    %79 = tpu.matmul %76, %78, %cst_36 {dimension_numbers = #tpu.dot_dimension_numbers<[1], [0], [0], [1], [0, 0, 1, 1], [], []>} : vector<8x128xbf16>, vector<128x384xbf16>, vector<8x384xf32> -> vector<8x384xf32>
    %80 = vector.extract_strided_slice %75 {offsets = [0, 0], sizes = [8, 128], strides = [1, 1]} : vector<8x384xf32> to vector<8x128xf32>
    %81 = vector.extract_strided_slice %79 {offsets = [0, 0], sizes = [8, 128], strides = [1, 1]} : vector<8x384xf32> to vector<8x128xf32>
    %82 = arith.addf %80, %81 : vector<8x128xf32>
    %83 = arith.negf %82 : vector<8x128xf32>
    %84 = math.exp %83 : vector<8x128xf32>
    %cst_37 = arith.constant 1.000000e+00 : f32
    %85 = vector.broadcast %cst_37 : f32 to vector<8x128xf32>
    %86 = arith.addf %85, %84 : vector<8x128xf32>
    %87 = arith.divf %85, %86 : vector<8x128xf32>
    %88 = vector.extract_strided_slice %75 {offsets = [0, 128], sizes = [8, 128], strides = [1, 1]} : vector<8x384xf32> to vector<8x128xf32>
    %89 = vector.extract_strided_slice %79 {offsets = [0, 128], sizes = [8, 128], strides = [1, 1]} : vector<8x384xf32> to vector<8x128xf32>
    %90 = arith.addf %88, %89 : vector<8x128xf32>
    %91 = arith.negf %90 : vector<8x128xf32>
    %92 = math.exp %91 : vector<8x128xf32>
    %cst_38 = arith.constant 1.000000e+00 : f32
    %93 = vector.broadcast %cst_38 : f32 to vector<8x128xf32>
    %94 = arith.addf %93, %92 : vector<8x128xf32>
    %95 = arith.divf %93, %94 : vector<8x128xf32>
    %96 = vector.extract_strided_slice %75 {offsets = [0, 256], sizes = [8, 128], strides = [1, 1]} : vector<8x384xf32> to vector<8x128xf32>
    %97 = vector.extract_strided_slice %79 {offsets = [0, 256], sizes = [8, 128], strides = [1, 1]} : vector<8x384xf32> to vector<8x128xf32>
    %98 = vector.broadcast %14 : vector<1x128xf32> to vector<8x128xf32>
    %99 = arith.addf %97, %98 : vector<8x128xf32>
    %100 = arith.mulf %87, %99 : vector<8x128xf32>
    %101 = arith.addf %96, %100 : vector<8x128xf32>
    %102 = math.tanh %101 : vector<8x128xf32>
    %cst_39 = arith.constant 1.000000e+00 : f32
    %103 = vector.broadcast %cst_39 : f32 to vector<8x128xf32>
    %104 = arith.subf %103, %95 : vector<8x128xf32>
    %105 = arith.mulf %104, %102 : vector<8x128xf32>
    %106 = arith.mulf %95, %64 : vector<8x128xf32>
    %107 = arith.addf %105, %106 : vector<8x128xf32>
    %108 = vector.broadcast %72 : i32 to vector<8x1xi32>
    %109 = arith.cmpi sgt, %12, %108 : vector<8x1xi32>
    %110 = arith.extui %109 : vector<8x1xi1> to vector<8x1xi32>
    %111 = arith.sitofp %110 : vector<8x1xi32> to vector<8x1xf32>
    %112 = vector.broadcast %111 : vector<8x1xf32> to vector<8x128xf32>
    %113 = arith.mulf %112, %107 : vector<8x128xf32>
    %cst_40 = arith.constant 1.000000e+00 : f32
    %114 = vector.broadcast %cst_40 : f32 to vector<8x1xf32>
    %115 = arith.subf %114, %111 : vector<8x1xf32>
    %116 = vector.broadcast %115 : vector<8x1xf32> to vector<8x128xf32>
    %117 = arith.mulf %116, %64 : vector<8x128xf32>
    %118 = arith.addf %113, %117 : vector<8x128xf32>
    %119 = vector.broadcast %111 : vector<8x1xf32> to vector<8x128xf32>
    %120 = arith.mulf %119, %107 : vector<8x128xf32>
    %121 = arith.index_cast %72 : i32 to index
    %c0_41 = arith.constant 0 : index
    %c0_42 = arith.constant 0 : index
    %122 = vector.load %arg8[%121, %c0_41, %c0_42] : memref<6x8x128xf32, #tpu.memory_space<vmem>>, vector<1x8x128xf32>
    %123 = vector.shape_cast %122 : vector<1x8x128xf32> to vector<8x128xf32>
    %124 = vector.shape_cast %120 : vector<8x128xf32> to vector<1x8x128xf32>
    tpu.vector_store %arg8[%121, %c0_41, %c0_42], %124 {strides = array<i32>} : memref<6x8x128xf32, #tpu.memory_space<vmem>>, vector<1x8x128xf32>,
    %c1_i32_43 = arith.constant 1 : i32
    %125 = arith.muli %arg0, %c1_i32_43 : i32
    %c2_i32 = arith.constant 2 : i32
    %126 = arith.addi %125, %c2_i32 : i32
    %127 = arith.index_cast %126 : i32 to index
    %c0_44 = arith.constant 0 : index
    %c0_45 = arith.constant 0 : index
    %128 = vector.load %arg10[%127, %c0_44, %c0_45] : memref<6x8x384xf32, #tpu.memory_space<vmem>>, vector<1x8x384xf32>
    %129 = vector.shape_cast %128 : vector<1x8x384xf32> to vector<8x384xf32>
    %130 = arith.truncf %118 : vector<8x128xf32> to vector<8x128xbf16>
    %c0_46 = arith.constant 0 : index
    %c0_47 = arith.constant 0 : index
    %c0_48 = arith.constant 0 : index
    %131 = vector.load %arg5[%c0_46, %c0_47, %c0_48] : memref<1x128x384xbf16, #tpu.memory_space<vmem>>, vector<1x128x384xbf16>
    %132 = vector.shape_cast %131 : vector<1x128x384xbf16> to vector<128x384xbf16>
    %cst_49 = arith.constant dense<0.000000e+00> : vector<8x384xf32>
    %133 = tpu.matmul %130, %132, %cst_49 {dimension_numbers = #tpu.dot_dimension_numbers<[1], [0], [0], [1], [0, 0, 1, 1], [], []>} : vector<8x128xbf16>, vector<128x384xbf16>, vector<8x384xf32> -> vector<8x384xf32>
    %134 = vector.extract_strided_slice %129 {offsets = [0, 0], sizes = [8, 128], strides = [1, 1]} : vector<8x384xf32> to vector<8x128xf32>
    %135 = vector.extract_strided_slice %133 {offsets = [0, 0], sizes = [8, 128], strides = [1, 1]} : vector<8x384xf32> to vector<8x128xf32>
    %136 = arith.addf %134, %135 : vector<8x128xf32>
    %137 = arith.negf %136 : vector<8x128xf32>
    %138 = math.exp %137 : vector<8x128xf32>
    %cst_50 = arith.constant 1.000000e+00 : f32
    %139 = vector.broadcast %cst_50 : f32 to vector<8x128xf32>
    %140 = arith.addf %139, %138 : vector<8x128xf32>
    %141 = arith.divf %139, %140 : vector<8x128xf32>
    %142 = vector.extract_strided_slice %129 {offsets = [0, 128], sizes = [8, 128], strides = [1, 1]} : vector<8x384xf32> to vector<8x128xf32>
    %143 = vector.extract_strided_slice %133 {offsets = [0, 128], sizes = [8, 128], strides = [1, 1]} : vector<8x384xf32> to vector<8x128xf32>
    %144 = arith.addf %142, %143 : vector<8x128xf32>
    %145 = arith.negf %144 : vector<8x128xf32>
    %146 = math.exp %145 : vector<8x128xf32>
    %cst_51 = arith.constant 1.000000e+00 : f32
    %147 = vector.broadcast %cst_51 : f32 to vector<8x128xf32>
    %148 = arith.addf %147, %146 : vector<8x128xf32>
    %149 = arith.divf %147, %148 : vector<8x128xf32>
    %150 = vector.extract_strided_slice %129 {offsets = [0, 256], sizes = [8, 128], strides = [1, 1]} : vector<8x384xf32> to vector<8x128xf32>
    %151 = vector.extract_strided_slice %133 {offsets = [0, 256], sizes = [8, 128], strides = [1, 1]} : vector<8x384xf32> to vector<8x128xf32>
    %152 = vector.broadcast %14 : vector<1x128xf32> to vector<8x128xf32>
    %153 = arith.addf %151, %152 : vector<8x128xf32>
    %154 = arith.mulf %141, %153 : vector<8x128xf32>
    %155 = arith.addf %150, %154 : vector<8x128xf32>
    %156 = math.tanh %155 : vector<8x128xf32>
    %cst_52 = arith.constant 1.000000e+00 : f32
    %157 = vector.broadcast %cst_52 : f32 to vector<8x128xf32>
    %158 = arith.subf %157, %149 : vector<8x128xf32>
    %159 = arith.mulf %158, %156 : vector<8x128xf32>
    %160 = arith.mulf %149, %118 : vector<8x128xf32>
    %161 = arith.addf %159, %160 : vector<8x128xf32>
    %162 = vector.broadcast %126 : i32 to vector<8x1xi32>
    %163 = arith.cmpi sgt, %12, %162 : vector<8x1xi32>
    %164 = arith.extui %163 : vector<8x1xi1> to vector<8x1xi32>
    %165 = arith.sitofp %164 : vector<8x1xi32> to vector<8x1xf32>
    %166 = vector.broadcast %165 : vector<8x1xf32> to vector<8x128xf32>
    %167 = arith.mulf %166, %161 : vector<8x128xf32>
    %cst_53 = arith.constant 1.000000e+00 : f32
    %168 = vector.broadcast %cst_53 : f32 to vector<8x1xf32>
    %169 = arith.subf %168, %165 : vector<8x1xf32>
    %170 = vector.broadcast %169 : vector<8x1xf32> to vector<8x128xf32>
    %171 = arith.mulf %170, %118 : vector<8x128xf32>
    %172 = arith.addf %167, %171 : vector<8x128xf32>
    %173 = vector.broadcast %165 : vector<8x1xf32> to vector<8x128xf32>
    %174 = arith.mulf %173, %161 : vector<8x128xf32>
    %175 = arith.index_cast %126 : i32 to index
    %c0_54 = arith.constant 0 : index
    %c0_55 = arith.constant 0 : index
    %176 = vector.load %arg8[%175, %c0_54, %c0_55] : memref<6x8x128xf32, #tpu.memory_space<vmem>>, vector<1x8x128xf32>
    %177 = vector.shape_cast %176 : vector<1x8x128xf32> to vector<8x128xf32>
    %178 = vector.shape_cast %174 : vector<8x128xf32> to vector<1x8x128xf32>
    tpu.vector_store %arg8[%175, %c0_54, %c0_55], %178 {strides = array<i32>} : memref<6x8x128xf32, #tpu.memory_space<vmem>>, vector<1x8x128xf32>,
    %c-1_i32 = arith.constant -1 : i32
    %179 = arith.muli %arg0, %c-1_i32 : i32
    %c3_i32_56 = arith.constant 3 : i32
    %180 = arith.addi %179, %c3_i32_56 : i32
    %181 = arith.index_cast %180 : i32 to index
    %c0_57 = arith.constant 0 : index
    %c0_58 = arith.constant 0 : index
    %182 = vector.load %arg10[%181, %c0_57, %c0_58] : memref<6x8x384xf32, #tpu.memory_space<vmem>>, vector<1x8x384xf32>
    %183 = vector.shape_cast %182 : vector<1x8x384xf32> to vector<8x384xf32>
    %184 = arith.truncf %172 : vector<8x128xf32> to vector<8x128xbf16>
    %c0_59 = arith.constant 0 : index
    %c0_60 = arith.constant 0 : index
    %c0_61 = arith.constant 0 : index
    %185 = vector.load %arg5[%c0_59, %c0_60, %c0_61] : memref<1x128x384xbf16, #tpu.memory_space<vmem>>, vector<1x128x384xbf16>
    %186 = vector.shape_cast %185 : vector<1x128x384xbf16> to vector<128x384xbf16>
    %cst_62 = arith.constant dense<0.000000e+00> : vector<8x384xf32>
    %187 = tpu.matmul %184, %186, %cst_62 {dimension_numbers = #tpu.dot_dimension_numbers<[1], [0], [0], [1], [0, 0, 1, 1], [], []>} : vector<8x128xbf16>, vector<128x384xbf16>, vector<8x384xf32> -> vector<8x384xf32>
    %188 = vector.extract_strided_slice %183 {offsets = [0, 0], sizes = [8, 128], strides = [1, 1]} : vector<8x384xf32> to vector<8x128xf32>
    %189 = vector.extract_strided_slice %187 {offsets = [0, 0], sizes = [8, 128], strides = [1, 1]} : vector<8x384xf32> to vector<8x128xf32>
    %190 = arith.addf %188, %189 : vector<8x128xf32>
    %191 = arith.negf %190 : vector<8x128xf32>
    %192 = math.exp %191 : vector<8x128xf32>
    %cst_63 = arith.constant 1.000000e+00 : f32
    %193 = vector.broadcast %cst_63 : f32 to vector<8x128xf32>
    %194 = arith.addf %193, %192 : vector<8x128xf32>
    %195 = arith.divf %193, %194 : vector<8x128xf32>
    %196 = vector.extract_strided_slice %183 {offsets = [0, 128], sizes = [8, 128], strides = [1, 1]} : vector<8x384xf32> to vector<8x128xf32>
    %197 = vector.extract_strided_slice %187 {offsets = [0, 128], sizes = [8, 128], strides = [1, 1]} : vector<8x384xf32> to vector<8x128xf32>
    %198 = arith.addf %196, %197 : vector<8x128xf32>
    %199 = arith.negf %198 : vector<8x128xf32>
    %200 = math.exp %199 : vector<8x128xf32>
    %cst_64 = arith.constant 1.000000e+00 : f32
    %201 = vector.broadcast %cst_64 : f32 to vector<8x128xf32>
    %202 = arith.addf %201, %200 : vector<8x128xf32>
    %203 = arith.divf %201, %202 : vector<8x128xf32>
    %204 = vector.extract_strided_slice %183 {offsets = [0, 256], sizes = [8, 128], strides = [1, 1]} : vector<8x384xf32> to vector<8x128xf32>
    %205 = vector.extract_strided_slice %187 {offsets = [0, 256], sizes = [8, 128], strides = [1, 1]} : vector<8x384xf32> to vector<8x128xf32>
    %206 = vector.broadcast %14 : vector<1x128xf32> to vector<8x128xf32>
    %207 = arith.addf %205, %206 : vector<8x128xf32>
    %208 = arith.mulf %195, %207 : vector<8x128xf32>
    %209 = arith.addf %204, %208 : vector<8x128xf32>
    %210 = math.tanh %209 : vector<8x128xf32>
    %cst_65 = arith.constant 1.000000e+00 : f32
    %211 = vector.broadcast %cst_65 : f32 to vector<8x128xf32>
    %212 = arith.subf %211, %203 : vector<8x128xf32>
    %213 = arith.mulf %212, %210 : vector<8x128xf32>
    %214 = arith.mulf %203, %172 : vector<8x128xf32>
    %215 = arith.addf %213, %214 : vector<8x128xf32>
    %216 = vector.broadcast %180 : i32 to vector<8x1xi32>
    %217 = arith.cmpi sgt, %12, %216 : vector<8x1xi32>
    %218 = arith.extui %217 : vector<8x1xi1> to vector<8x1xi32>
    %219 = arith.sitofp %218 : vector<8x1xi32> to vector<8x1xf32>
    %220 = vector.broadcast %219 : vector<8x1xf32> to vector<8x128xf32>
    %221 = arith.mulf %220, %215 : vector<8x128xf32>
    %cst_66 = arith.constant 1.000000e+00 : f32
    %222 = vector.broadcast %cst_66 : f32 to vector<8x1xf32>
    %223 = arith.subf %222, %219 : vector<8x1xf32>
    %224 = vector.broadcast %223 : vector<8x1xf32> to vector<8x128xf32>
    %225 = arith.mulf %224, %172 : vector<8x128xf32>
    %226 = arith.addf %221, %225 : vector<8x128xf32>
    %227 = vector.broadcast %219 : vector<8x1xf32> to vector<8x128xf32>
    %228 = arith.mulf %227, %215 : vector<8x128xf32>
    %229 = arith.index_cast %180 : i32 to index
    %c0_67 = arith.constant 0 : index
    %c0_68 = arith.constant 0 : index
    %230 = vector.load %arg8[%229, %c0_67, %c0_68] : memref<6x8x128xf32, #tpu.memory_space<vmem>>, vector<1x8x128xf32>
    %231 = vector.shape_cast %230 : vector<1x8x128xf32> to vector<8x128xf32>
    %232 = vector.shape_cast %228 : vector<8x128xf32> to vector<1x8x128xf32>
    tpu.vector_store %arg8[%229, %c0_67, %c0_68], %232 {strides = array<i32>} : memref<6x8x128xf32, #tpu.memory_space<vmem>>, vector<1x8x128xf32>,
    %c-3_i32 = arith.constant -3 : i32
    %233 = arith.muli %arg0, %c-3_i32 : i32
    %c4_i32 = arith.constant 4 : i32
    %234 = arith.addi %233, %c4_i32 : i32
    %235 = arith.index_cast %234 : i32 to index
    %c0_69 = arith.constant 0 : index
    %c0_70 = arith.constant 0 : index
    %236 = vector.load %arg10[%235, %c0_69, %c0_70] : memref<6x8x384xf32, #tpu.memory_space<vmem>>, vector<1x8x384xf32>
    %237 = vector.shape_cast %236 : vector<1x8x384xf32> to vector<8x384xf32>
    %238 = arith.truncf %226 : vector<8x128xf32> to vector<8x128xbf16>
    %c0_71 = arith.constant 0 : index
    %c0_72 = arith.constant 0 : index
    %c0_73 = arith.constant 0 : index
    %239 = vector.load %arg5[%c0_71, %c0_72, %c0_73] : memref<1x128x384xbf16, #tpu.memory_space<vmem>>, vector<1x128x384xbf16>
    %240 = vector.shape_cast %239 : vector<1x128x384xbf16> to vector<128x384xbf16>
    %cst_74 = arith.constant dense<0.000000e+00> : vector<8x384xf32>
    %241 = tpu.matmul %238, %240, %cst_74 {dimension_numbers = #tpu.dot_dimension_numbers<[1], [0], [0], [1], [0, 0, 1, 1], [], []>} : vector<8x128xbf16>, vector<128x384xbf16>, vector<8x384xf32> -> vector<8x384xf32>
    %242 = vector.extract_strided_slice %237 {offsets = [0, 0], sizes = [8, 128], strides = [1, 1]} : vector<8x384xf32> to vector<8x128xf32>
    %243 = vector.extract_strided_slice %241 {offsets = [0, 0], sizes = [8, 128], strides = [1, 1]} : vector<8x384xf32> to vector<8x128xf32>
    %244 = arith.addf %242, %243 : vector<8x128xf32>
    %245 = arith.negf %244 : vector<8x128xf32>
    %246 = math.exp %245 : vector<8x128xf32>
    %cst_75 = arith.constant 1.000000e+00 : f32
    %247 = vector.broadcast %cst_75 : f32 to vector<8x128xf32>
    %248 = arith.addf %247, %246 : vector<8x128xf32>
    %249 = arith.divf %247, %248 : vector<8x128xf32>
    %250 = vector.extract_strided_slice %237 {offsets = [0, 128], sizes = [8, 128], strides = [1, 1]} : vector<8x384xf32> to vector<8x128xf32>
    %251 = vector.extract_strided_slice %241 {offsets = [0, 128], sizes = [8, 128], strides = [1, 1]} : vector<8x384xf32> to vector<8x128xf32>
    %252 = arith.addf %250, %251 : vector<8x128xf32>
    %253 = arith.negf %252 : vector<8x128xf32>
    %254 = math.exp %253 : vector<8x128xf32>
    %cst_76 = arith.constant 1.000000e+00 : f32
    %255 = vector.broadcast %cst_76 : f32 to vector<8x128xf32>
    %256 = arith.addf %255, %254 : vector<8x128xf32>
    %257 = arith.divf %255, %256 : vector<8x128xf32>
    %258 = vector.extract_strided_slice %237 {offsets = [0, 256], sizes = [8, 128], strides = [1, 1]} : vector<8x384xf32> to vector<8x128xf32>
    %259 = vector.extract_strided_slice %241 {offsets = [0, 256], sizes = [8, 128], strides = [1, 1]} : vector<8x384xf32> to vector<8x128xf32>
    %260 = vector.broadcast %14 : vector<1x128xf32> to vector<8x128xf32>
    %261 = arith.addf %259, %260 : vector<8x128xf32>
    %262 = arith.mulf %249, %261 : vector<8x128xf32>
    %263 = arith.addf %258, %262 : vector<8x128xf32>
    %264 = math.tanh %263 : vector<8x128xf32>
    %cst_77 = arith.constant 1.000000e+00 : f32
    %265 = vector.broadcast %cst_77 : f32 to vector<8x128xf32>
    %266 = arith.subf %265, %257 : vector<8x128xf32>
    %267 = arith.mulf %266, %264 : vector<8x128xf32>
    %268 = arith.mulf %257, %226 : vector<8x128xf32>
    %269 = arith.addf %267, %268 : vector<8x128xf32>
    %270 = vector.broadcast %234 : i32 to vector<8x1xi32>
    %271 = arith.cmpi sgt, %12, %270 : vector<8x1xi32>
    %272 = arith.extui %271 : vector<8x1xi1> to vector<8x1xi32>
    %273 = arith.sitofp %272 : vector<8x1xi32> to vector<8x1xf32>
    %274 = vector.broadcast %273 : vector<8x1xf32> to vector<8x128xf32>
    %275 = arith.mulf %274, %269 : vector<8x128xf32>
    %cst_78 = arith.constant 1.000000e+00 : f32
    %276 = vector.broadcast %cst_78 : f32 to vector<8x1xf32>
    %277 = arith.subf %276, %273 : vector<8x1xf32>
    %278 = vector.broadcast %277 : vector<8x1xf32> to vector<8x128xf32>
    %279 = arith.mulf %278, %226 : vector<8x128xf32>
    %280 = arith.addf %275, %279 : vector<8x128xf32>
    %281 = vector.broadcast %273 : vector<8x1xf32> to vector<8x128xf32>
    %282 = arith.mulf %281, %269 : vector<8x128xf32>
    %283 = arith.index_cast %234 : i32 to index
    %c0_79 = arith.constant 0 : index
    %c0_80 = arith.constant 0 : index
    %284 = vector.load %arg8[%283, %c0_79, %c0_80] : memref<6x8x128xf32, #tpu.memory_space<vmem>>, vector<1x8x128xf32>
    %285 = vector.shape_cast %284 : vector<1x8x128xf32> to vector<8x128xf32>
    %286 = vector.shape_cast %282 : vector<8x128xf32> to vector<1x8x128xf32>
    tpu.vector_store %arg8[%283, %c0_79, %c0_80], %286 {strides = array<i32>} : memref<6x8x128xf32, #tpu.memory_space<vmem>>, vector<1x8x128xf32>,
    %c-5_i32 = arith.constant -5 : i32
    %287 = arith.muli %arg0, %c-5_i32 : i32
    %c5_i32_81 = arith.constant 5 : i32
    %288 = arith.addi %287, %c5_i32_81 : i32
    %289 = arith.index_cast %288 : i32 to index
    %c0_82 = arith.constant 0 : index
    %c0_83 = arith.constant 0 : index
    %290 = vector.load %arg10[%289, %c0_82, %c0_83] : memref<6x8x384xf32, #tpu.memory_space<vmem>>, vector<1x8x384xf32>
    %291 = vector.shape_cast %290 : vector<1x8x384xf32> to vector<8x384xf32>
    %292 = arith.truncf %280 : vector<8x128xf32> to vector<8x128xbf16>
    %c0_84 = arith.constant 0 : index
    %c0_85 = arith.constant 0 : index
    %c0_86 = arith.constant 0 : index
    %293 = vector.load %arg5[%c0_84, %c0_85, %c0_86] : memref<1x128x384xbf16, #tpu.memory_space<vmem>>, vector<1x128x384xbf16>
    %294 = vector.shape_cast %293 : vector<1x128x384xbf16> to vector<128x384xbf16>
    %cst_87 = arith.constant dense<0.000000e+00> : vector<8x384xf32>
    %295 = tpu.matmul %292, %294, %cst_87 {dimension_numbers = #tpu.dot_dimension_numbers<[1], [0], [0], [1], [0, 0, 1, 1], [], []>} : vector<8x128xbf16>, vector<128x384xbf16>, vector<8x384xf32> -> vector<8x384xf32>
    %296 = vector.extract_strided_slice %291 {offsets = [0, 0], sizes = [8, 128], strides = [1, 1]} : vector<8x384xf32> to vector<8x128xf32>
    %297 = vector.extract_strided_slice %295 {offsets = [0, 0], sizes = [8, 128], strides = [1, 1]} : vector<8x384xf32> to vector<8x128xf32>
    %298 = arith.addf %296, %297 : vector<8x128xf32>
    %299 = arith.negf %298 : vector<8x128xf32>
    %300 = math.exp %299 : vector<8x128xf32>
    %cst_88 = arith.constant 1.000000e+00 : f32
    %301 = vector.broadcast %cst_88 : f32 to vector<8x128xf32>
    %302 = arith.addf %301, %300 : vector<8x128xf32>
    %303 = arith.divf %301, %302 : vector<8x128xf32>
    %304 = vector.extract_strided_slice %291 {offsets = [0, 128], sizes = [8, 128], strides = [1, 1]} : vector<8x384xf32> to vector<8x128xf32>
    %305 = vector.extract_strided_slice %295 {offsets = [0, 128], sizes = [8, 128], strides = [1, 1]} : vector<8x384xf32> to vector<8x128xf32>
    %306 = arith.addf %304, %305 : vector<8x128xf32>
    %307 = arith.negf %306 : vector<8x128xf32>
    %308 = math.exp %307 : vector<8x128xf32>
    %cst_89 = arith.constant 1.000000e+00 : f32
    %309 = vector.broadcast %cst_89 : f32 to vector<8x128xf32>
    %310 = arith.addf %309, %308 : vector<8x128xf32>
    %311 = arith.divf %309, %310 : vector<8x128xf32>
    %312 = vector.extract_strided_slice %291 {offsets = [0, 256], sizes = [8, 128], strides = [1, 1]} : vector<8x384xf32> to vector<8x128xf32>
    %313 = vector.extract_strided_slice %295 {offsets = [0, 256], sizes = [8, 128], strides = [1, 1]} : vector<8x384xf32> to vector<8x128xf32>
    %314 = vector.broadcast %14 : vector<1x128xf32> to vector<8x128xf32>
    %315 = arith.addf %313, %314 : vector<8x128xf32>
    %316 = arith.mulf %303, %315 : vector<8x128xf32>
    %317 = arith.addf %312, %316 : vector<8x128xf32>
    %318 = math.tanh %317 : vector<8x128xf32>
    %cst_90 = arith.constant 1.000000e+00 : f32
    %319 = vector.broadcast %cst_90 : f32 to vector<8x128xf32>
    %320 = arith.subf %319, %311 : vector<8x128xf32>
    %321 = arith.mulf %320, %318 : vector<8x128xf32>
    %322 = arith.mulf %311, %280 : vector<8x128xf32>
    %323 = arith.addf %321, %322 : vector<8x128xf32>
    %324 = vector.broadcast %288 : i32 to vector<8x1xi32>
    %325 = arith.cmpi sgt, %12, %324 : vector<8x1xi32>
    %326 = arith.extui %325 : vector<8x1xi1> to vector<8x1xi32>
    %327 = arith.sitofp %326 : vector<8x1xi32> to vector<8x1xf32>
    %328 = vector.broadcast %327 : vector<8x1xf32> to vector<8x128xf32>
    %329 = arith.mulf %328, %323 : vector<8x128xf32>
    %cst_91 = arith.constant 1.000000e+00 : f32
    %330 = vector.broadcast %cst_91 : f32 to vector<8x1xf32>
    %331 = arith.subf %330, %327 : vector<8x1xf32>
    %332 = vector.broadcast %331 : vector<8x1xf32> to vector<8x128xf32>
    %333 = arith.mulf %332, %280 : vector<8x128xf32>
    %334 = arith.addf %329, %333 : vector<8x128xf32>
    %335 = vector.broadcast %327 : vector<8x1xf32> to vector<8x128xf32>
    %336 = arith.mulf %335, %323 : vector<8x128xf32>
    %337 = arith.index_cast %288 : i32 to index
    %c0_92 = arith.constant 0 : index
    %c0_93 = arith.constant 0 : index
    %338 = vector.load %arg8[%337, %c0_92, %c0_93] : memref<6x8x128xf32, #tpu.memory_space<vmem>>, vector<1x8x128xf32>
    %339 = vector.shape_cast %338 : vector<1x8x128xf32> to vector<8x128xf32>
    %340 = vector.shape_cast %336 : vector<8x128xf32> to vector<1x8x128xf32>
    tpu.vector_store %arg8[%337, %c0_92, %c0_93], %340 {strides = array<i32>} : memref<6x8x128xf32, #tpu.memory_space<vmem>>, vector<1x8x128xf32>,
    %c0_94 = arith.constant 0 : index
    %c0_95 = arith.constant 0 : index
    %c0_96 = arith.constant 0 : index
    %341 = vector.load %arg9[%c0_94, %c0_95, %c0_96] : memref<1x8x128xf32, #tpu.memory_space<vmem>>, vector<1x8x128xf32>
    %342 = vector.shape_cast %341 : vector<1x8x128xf32> to vector<8x128xf32>
    %343 = vector.shape_cast %334 : vector<8x128xf32> to vector<1x8x128xf32>
    tpu.vector_store %arg9[%c0_94, %c0_95, %c0_96], %343 {strides = array<i32>} : memref<1x8x128xf32, #tpu.memory_space<vmem>>, vector<1x8x128xf32>,
    return
  }
  func.func @transform_0(%arg0: i32) -> (i32, i32, i32) {
    %c0_i32 = arith.constant 0 : i32
    %c0_i32_0 = arith.constant 0 : i32
    %c0_i32_1 = arith.constant 0 : i32
    %c0_i32_2 = arith.constant 0 : i32
    return %c0_i32, %c0_i32_0, %c0_i32_1 : i32, i32, i32
  }
  func.func @transform_1(%arg0: i32) -> (i32, i32) {
    %c0_i32 = arith.constant 0 : i32
    %c0_i32_0 = arith.constant 0 : i32
    %c0_i32_1 = arith.constant 0 : i32
    return %c0_i32, %c0_i32_0 : i32, i32
  }
  func.func @transform_2(%arg0: i32) -> (i32, i32, i32) {
    %c0_i32 = arith.constant 0 : i32
    %c0_i32_0 = arith.constant 0 : i32
    %c0_i32_1 = arith.constant 0 : i32
    return %arg0, %c0_i32, %c0_i32_0 : i32, i32, i32
  }
  func.func @transform_3(%arg0: i32) -> (i32, i32, i32) {
    %c0_i32 = arith.constant 0 : i32
    %c0_i32_0 = arith.constant 0 : i32
    %c0_i32_1 = arith.constant 0 : i32
    return %arg0, %c0_i32, %c0_i32_0 : i32, i32, i32
  }
  func.func @transform_4(%arg0: i32) -> (i32, i32, i32) {
    %c0_i32 = arith.constant 0 : i32
    %c0_i32_0 = arith.constant 0 : i32
    %c0_i32_1 = arith.constant 0 : i32
    return %arg0, %c0_i32, %c0_i32_0 : i32, i32, i32
  }
  func.func @transform_5(%arg0: i32) -> (i32, i32, i32) {
    %c0_i32 = arith.constant 0 : i32
    %c0_i32_0 = arith.constant 0 : i32
    %c0_i32_1 = arith.constant 0 : i32
    return %arg0, %c0_i32, %c0_i32_0 : i32, i32, i32
  }
  func.func @transform_6(%arg0: i32) -> (i32, i32, i32) {
    %c0_i32 = arith.constant 0 : i32
    %c0_i32_0 = arith.constant 0 : i32
    %c0_i32_1 = arith.constant 0 : i32
    return %arg0, %c0_i32, %c0_i32_0 : i32, i32, i32
  }
  func.func @transform_7(%arg0: i32) -> (i32, i32, i32) {
    %c0_i32 = arith.constant 0 : i32
    %c0_i32_0 = arith.constant 0 : i32
    %c0_i32_1 = arith.constant 0 : i32
    return %c0_i32, %c0_i32_0, %arg0 : i32, i32, i32
  }
  func.func @transform_8(%arg0: i32) -> (i32, i32, i32) {
    %c0_i32 = arith.constant 0 : i32
    %c0_i32_0 = arith.constant 0 : i32
    %c0_i32_1 = arith.constant 0 : i32
    return %arg0, %c0_i32, %c0_i32_0 : i32, i32, i32
  }
}

</mosaic_0001>

<bundles_post_ra>
// kernel: encoder_rnn_forward.2
= control target key start
LH: loop header
LB: loop body
LE: loop exit
PB: predicated region body
PF: predicated region fallthrough
CT: control target
= control target key end

     0   :  { %s3429_s27 = smov 0   ;;  %s3431_s28 = smov 0   ;;  %s3992_s0 = inlined_call_operand.vmem [shape: f32[6,8,128], index: 0, kind: input, shape index: {}]   ;;  %s3993_s1 = inlined_call_operand.vmem [shape: s32[8,1], index: 1, kind: input, shape index: {}]   ;;  %s3994_s2 = inlined_call_operand.vmem [shape: f32[2,8,128], index: 2, kind: input, shape index: {}]   ;;  %s3995_s3 = inlined_call_operand.vmem [shape: bf16[2,128,384], index: 3, kind: input, shape index: {}]   ;;  %s3996_s4 = inlined_call_operand.vmem [shape: bf16[2,128,384], index: 4, kind: input, shape index: {}]   ;;  %s3997_s5 = inlined_call_operand.vmem [shape: f32[2,1,384], index: 5, kind: input, shape index: {}]   ;;  %s3998_s6 = inlined_call_operand.vmem [shape: f32[2,1,128], index: 6, kind: input, shape index: {}]   ;;  %s3999_s7 = inlined_call_operand.vmem [shape: f32[6,8,256], index: 7, kind: output, shape index: {0}]   ;;  %s4000_s8 = inlined_call_operand.vmem [shape: f32[2,8,128], index: 8, kind: output, shape index: {1}]  }
   0x1   :  { %s3433_s29 = smov 0  }
   0x2 LB: > { %s3442_s30 = sadd.s32 4294967295, %s3379_s29   ;;  %s3444_s9 = sadd.s32 1, %s3379_s29   ;;  %s3379_s29 = sphi %s3433_s29, %s4004_s29   ;;  %s3375_s28 = sphi %s3431_s28, %s4003_s28   ;;  %s3371_s27 = sphi %s3429_s27, %s4002_s27  }
   0x3   : > { %s195_s10 = ssub.s32 %s3379_s29, %s3444_s9  ;;  %s198_s11 = sadd.s32 1, %s3375_s28 }
   0x4   : > { %p196_p0 = scmp.eq.s32.totalorder %s195_s10, 0  ;;  %p208_p1 = scmp.ne.s32.totalorder %s3375_s28, %s3371_s27 }
   0x5   : > { %p209_p2 = scmp.eq.s32.totalorder %s3442_s30, 1  ;;  %p2699_p3 = scmp.ge.s32.totalorder %s3379_s29, 1 }
   0x6   : > { %s3452_s12 = scalar_select %p196_p0, %s3375_s28, %s198_s11  }
   0x7   : > { %p3454_p4 = por %p209_p2, %p208_p1  ;;  %p301_p5 = scmp.lt.s32.totalorder %s3379_s29, 3 }
   0x9   : > { %p302_p6 = pnand %p2699_p3, %p301_p5 }
   0xa   : > { %p354_p7 = scmp.lt.s32.totalorder (!%p302_p6), %s3442_s30, 1  ;;  %s707_s14 = smul.u32 (!%p302_p6), 5, %s3442_s30 }
   0xb   : > { %305 = sbr.rel (%p302_p6) target bundleno = 1623 (0x657), region = 48  ;;  %s1298_s15 = sadd.s32 (!%p302_p6), 2, %s3442_s30 }
   0xc   : > { %s3479_s20 = ssub.s32 (!%p302_p6), 3, %s3442_s30  ;;  %s1882_s24 = smul.u32 (!%p302_p6), 4294967293, %s3442_s30 }
   0xd   : > { %s2175_s26 = smul.u32 (!%p302_p6), 4294967291, %s3442_s30  ;;  %s345_s18 = sand.u32 (!%p302_p6), 1, %s3371_s27  }
   0xe   : > { %s1883_s25 = sadd.s32 (!%p302_p6), 4, %s1882_s24  ;;  %s1005_s10 = smul.u32 (!%p302_p6), 3, %s3442_s30 }
   0xf   : > { %s2176_s29 = sadd.s32 (!%p302_p6), 5, %s2175_s26  ;;  %s2922_s26 = smul.u32 (!%p302_p6), 120, %s3442_s30 }
  0x10   : > { %v3381_v0 = vmov 0.0   ;;  %vm3382_vm0 = vmmov 0   ;;  %s3465_s16 = scalar_select %p354_p7, %s3442_s30, 1  ;;  %v3383_v1 = vmov 0   ;;  %v3472_v2 = vld [vmem:[%s3993_s1] sm:$0xff]  ;;  %v984_v3 = vstv %s707_s14  ;;  %v381_v41 = vld [vmem:[%s3992_s0 + $0x8] sm:$0xff] }
  0x11   : > { %2989 = vmatprep.subr.bf16.mxu1 %v3381_v0  ;;  %3005 = vmatprep.mubr.msk.bf16.mxu1 %vm3382_vm0, %v3381_v0  ;;  %vm985_vm1 = vcmp.gt.s32.totalorder %v3472_v2, %v984_v3  ;;  %v1569_v5 = vstv %s1298_s15  ;;  %v1861_v9 = vstv %s3479_s20  ;;  %v2154_v22 = vstv %s1883_s25  ;;  %s1006_s17 = sadd.s32 1, %s1005_s10  ;;  %v380_v39 = vld [vmem:[%s3992_s0] sm:$0xff]  ;;  %s2759_s27 = smul.u32 72, %s3442_s30 }
  0x12   : > { %598 = vmatprep.mubr.bf16.mxu0 %v3383_v1  ;;  %3167 = vset.pattern.permute.xlu0 %v3383_v1  ;;  %s3138_s19 = smul.u32 192, %s3465_s16  ;;  %v2757_v4 = vsel %vm985_vm1, 1.0, %v3381_v0  ;;  %vm1570_vm2 = vcmp.gt.s32.totalorder %v3472_v2, %v1569_v5  ;;  %vm1862_vm3 = vcmp.gt.s32.totalorder %v3472_v2, %v1861_v9  ;;  %vm2155_vm4 = vcmp.gt.s32.totalorder %v3472_v2, %v2154_v22  ;;  %v382_v49 = vld [vmem:[%s3992_s0 + $0x10] sm:$0xff]  ;;  %v383_v51 = vld [vmem:[%s3992_s0 + $0x18] sm:$0xff]  ;;  %v384_v60 = vld [vmem:[%s3992_s0 + $0x20] sm:$0xff]  ;;  %s374_s14 = scalar_lea.vmem %s3998_s6, %s3465_s16 }
  0x13   : > { %3168 = vset.pattern.permute.xlu1 %v3383_v1  ;;  %v994_v6 = vsub.f32 1.0, %v2757_v4  ;;  %990 = vperm.xlu0 %3167, %v2757_v4   ;;  %v3498_v14 = vsel %vm1570_vm2, 1.0, %v3381_v0  ;;  %v3505_v17 = vsel %vm1862_vm3, 1.0, %v3381_v0  ;;  %v3519_v24 = vsel %vm2155_vm4, 1.0, %v3381_v0  ;;  %v385_v61 = vld [vmem:[%s3992_s0 + $0x28] sm:$0xff]  ;;  %s3139_s22 = smul.u32 3, %s3465_s16 }
  0x14   : > { %s3486_s23 = scalar_lea.vmem %s3995_s3, %s3138_s19  ;;  %v2447_v26 = vstv %s2176_s29  ;;  %s3532_s15 = scalar_lea.vmem %s3996_s4, %s3138_s19  ;;  %v1277_v33 = vstv %s1006_s17  ;;  %v1579_v44 = vsub.f32 1.0, %v3498_v14  ;;  %v386_v45 = vpack.c.bf16 %v381_v41, %v380_v39 }
  0x15   : > { %v3169_v7 = vld [vmem:[%s3486_s23 + $0xac] ss:$12 sps:$4 sm:$0xff]   ;;  %v3171_v8 = vld [vmem:[%s3486_s23 + $0xb0] ss:$12 sps:$4 sm:$0xff]   ;;  %v3172_v10 = vld [vmem:[%s3486_s23 + $0xa8] ss:$12 sps:$4 sm:$0xff]   ;;  %vm2448_vm5 = vcmp.gt.s32.totalorder %v3472_v2, %v2447_v26  ;;  %vm1278_vm6 = vcmp.gt.s32.totalorder %v3472_v2, %v1277_v33  ;;  %v387_v56 = vpack.c.bf16 %v383_v51, %v382_v49  ;;  %v388_v3 = vpack.c.bf16 %v385_v61, %v384_v60  ;;  %s371_s25 = scalar_lea.vmem %s3997_s5, %s3139_s22 }
  0x16   : > { %566 = vmatprep.subr.bf16.mxu0 %v3169_v7  ;;  %2990 = vmatpush3.bf16.msra.mxu1 %v3171_v8  ;;  %v3173_v11 = vld [vmem:[%s3486_s23 + $0x94] ss:$12 sps:$4 sm:$0xff]   ;;  %v3175_v12 = vld [vmem:[%s3486_s23 + $0x98] ss:$12 sps:$4 sm:$0xff]   ;;  %v3176_v13 = vld [vmem:[%s3486_s23 + $0x90] ss:$12 sps:$4 sm:$0xff]   ;;  %v423_v26 = vlaneseq }
  0x17   : > { %997 = vperm.xlu0 %3167, %v994_v6   ;;  %567 = vmatpush1.bf16.msra.mxu0 %v3172_v10  ;;  %v3177_v15 = vld [vmem:[%s3486_s23 + $0x7c] ss:$12 sps:$4 sm:$0xff]   ;;  %v3179_v16 = vld [vmem:[%s3486_s23 + $0x80] ss:$12 sps:$4 sm:$0xff]   ;;  %v3180_v18 = vld [vmem:[%s3486_s23 + $0x78] ss:$12 sps:$4 sm:$0xff]  }
  0x18   : > { %2991 = vmatprep.subr.bf16.mxu1 %v3381_v0  ;;  %568 = vmatprep.subr.bf16.mxu0 %v3173_v11  ;;  %v3181_v19 = vld [vmem:[%s3486_s23 + $0x64] ss:$12 sps:$4 sm:$0xff]   ;;  %v3183_v20 = vld [vmem:[%s3486_s23 + $0x68] ss:$12 sps:$4 sm:$0xff]   ;;  %v3184_v21 = vld [vmem:[%s3486_s23 + $0x60] ss:$12 sps:$4 sm:$0xff]  }
  0x19   : > { %v3185_v23 = vld [vmem:[%s3486_s23 + $0x4c] ss:$12 sps:$4 sm:$0xff]   ;;  %v3187_v25 = vld [vmem:[%s3486_s23 + $0x50] ss:$12 sps:$4 sm:$0xff]   ;;  %v3188_v27 = vld [vmem:[%s3486_s23 + $0x48] ss:$12 sps:$4 sm:$0xff]  }
  0x1a   : > { %2992 = vmatpush3.bf16.msra.mxu1 %v3175_v12  ;;  %v3189_v28 = vld [vmem:[%s3486_s23 + $0x34] ss:$12 sps:$4 sm:$0xff]   ;;  %v3536_v29 = vsel %vm2448_vm5, 1.0, %v3381_v0  ;;  %v3191_v30 = vld [vmem:[%s3486_s23 + $0x38] ss:$12 sps:$4 sm:$0xff]   ;;  %v2789_v35 = vsel %vm1278_vm6, 1.0, %v3381_v0 }
  0x1b   : > { %1575 = vperm.xlu0 %3167, %v3498_v14   ;;  %569 = vmatpush1.bf16.msra.mxu0 %v3176_v13  ;;  %v3192_v31 = vld [vmem:[%s3486_s23 + $0x30] ss:$12 sps:$4 sm:$0xff]   ;;  %v3195_v34 = vld [vmem:[%s3486_s23 + $0x20] ss:$12 sps:$4 sm:$0xff]   ;;  %v3196_v36 = vld [vmem:[%s3486_s23 + $0x18] ss:$12 sps:$4 sm:$0xff]  }
  0x1c   : > { %2993 = vmatprep.subr.bf16.mxu1 %v3381_v0  ;;  %570 = vmatprep.subr.bf16.mxu0 %v3177_v15  ;;  %v3193_v32 = vld [vmem:[%s3486_s23 + $0x1c] ss:$12 sps:$4 sm:$0xff]   ;;  %v3197_v37 = vld [vmem:[%s3486_s23 + $0x4] ss:$12 sps:$4 sm:$0xff]   ;;  %v1287_v38 = vsub.f32 1.0, %v2789_v35  ;;  %v1871_v50 = vsub.f32 1.0, %v3505_v17 }
  0x1d   : > { %1283 = vperm.xlu1 %3168, %v2789_v35   ;;  %v3199_v40 = vld [vmem:[%s3486_s23 + $0x8] ss:$12 sps:$4 sm:$0xff]   ;;  %v3200_v42 = vld [vmem:[%s3486_s23] ss:$12 sps:$4 sm:$0xff]   ;;  %v3222_v48 = vld [vmem:[%s3532_s15 + $0xb0] ss:$12 sps:$4 sm:$0xff]  }
  0x1e   : > { %2994 = vmatpush3.bf16.msra.mxu1 %v3179_v16  ;;  %v3559_v43 = vld [vmem:[%s3532_s15 + $0xac] ss:$12 sps:$4 sm:$0xff]   ;;  %v3563_v46 = vld [vmem:[%s3532_s15 + $0xa8] ss:$12 sps:$4 sm:$0xff]   ;;  %v2164_v52 = vsub.f32 1.0, %v3519_v24  ;;  %v2457_v8 = vsub.f32 1.0, %v3536_v29 }
  0x1f   : > { %1867 = vperm.xlu0 %3167, %v3505_v17   ;;  %571 = vmatpush1.bf16.msra.mxu0 %v3180_v18  ;;  %v3566_v47 = vld [vmem:[%s3532_s15 + $0x94] ss:$12 sps:$4 sm:$0xff]   ;;  %v3583_v53 = vld [vmem:[%s3532_s15 + $0x90] ss:$12 sps:$4 sm:$0xff]   ;;  %v3226_v55 = vld [vmem:[%s3532_s15 + $0x98] ss:$12 sps:$4 sm:$0xff]  }
  0x20   : > { %2995 = vmatprep.subr.bf16.mxu1 %v3381_v0  ;;  %572 = vmatprep.subr.bf16.mxu0 %v3181_v19  ;;  %v3588_v54 = vld [vmem:[%s3532_s15 + $0x7c] ss:$12 sps:$4 sm:$0xff]   ;;  %v3592_v57 = vld [vmem:[%s3532_s15 + $0x78] ss:$12 sps:$4 sm:$0xff]   ;;  %v3227_v59 = vld [vmem:[%s3532_s15 + $0x80] ss:$12 sps:$4 sm:$0xff]  }
  0x21   : > { %1290 = vperm.xlu1 %3168, %v1287_v38   ;;  %v3596_v58 = vld [vmem:[%s3532_s15 + $0x64] ss:$12 sps:$4 sm:$0xff]   ;;  %v3608_v62 = vld [vmem:[%s3532_s15 + $0x60] ss:$12 sps:$4 sm:$0xff]   ;;  %v3228_v2 = vld [vmem:[%s3532_s15 + $0x68] ss:$12 sps:$4 sm:$0xff]  }
  0x22   : > { %2996 = vmatpush3.bf16.msra.mxu1 %v3183_v20  ;;  %v3614_v63 = vld [vmem:[%s3532_s15 + $0x4c] ss:$12 sps:$4 sm:$0xff]   ;;  %v3621_v4 = vld [vmem:[%s3532_s15 + $0x48] ss:$12 sps:$4 sm:$0xff]   ;;  %v3229_v6 = vld [vmem:[%s3532_s15 + $0x50] ss:$12 sps:$4 sm:$0xff]  }
  0x23   : > { %2160 = vperm.xlu0 %3167, %v3519_v24   ;;  %573 = vmatpush1.bf16.msra.mxu0 %v3184_v21  ;;  %v3625_v5 = vld [vmem:[%s3532_s15 + $0x34] ss:$12 sps:$4 sm:$0xff]   ;;  %v3631_v7 = vld [vmem:[%s3532_s15 + $0x30] ss:$12 sps:$4 sm:$0xff]   ;;  %v3230_v10 = vld [vmem:[%s3532_s15 + $0x38] ss:$12 sps:$4 sm:$0xff]  }
  0x24   : > { %2997 = vmatprep.subr.bf16.mxu1 %v3381_v0  ;;  %574 = vmatprep.subr.bf16.mxu0 %v3185_v23  ;;  %v3636_v9 = vld [vmem:[%s3532_s15 + $0x1c] ss:$12 sps:$4 sm:$0xff]   ;;  %s2700_s17 = sshll.u32 %s3465_s16, 3  ;;  %v3646_v11 = vld [vmem:[%s3532_s15 + $0x18] ss:$12 sps:$4 sm:$0xff]   ;;  %s710_s29 = scalar_lea.vmem [#allocation2], %s2922_s26 }
  0x25   : > { %1582 = vperm.xlu1 %3168, %v1579_v44   ;;  %v3650_v12 = vld [vmem:[%s3532_s15 + $0x4] ss:$12 sps:$4 sm:$0xff]   ;;  %s357_s21 = scalar_lea.vmem %s3994_s2, %s2700_s17  ;;  %v3231_v13 = vld [vmem:[%s3532_s15 + $0x20] ss:$12 sps:$4 sm:$0xff]   ;;  %v3232_v16 = vld [vmem:[%s3532_s15 + $0x8] ss:$12 sps:$4 sm:$0xff]  }
  0x26   : > { %2998 = vmatpush3.bf16.msra.mxu1 %v3187_v25  ;;  %v3661_v14 = vld [vmem:[%s3532_s15] ss:$12 sps:$4 sm:$0xff]   ;;  %v3233_v18 = vld [vmem:[%s3532_s15 + $0xb0] ss:$12 sps:$4 sm:$0xff]   ;;  %v3234_v19 = vld [vmem:[%s3532_s15 + $0x98] ss:$12 sps:$4 sm:$0xff]  }
  0x27   : > { %2453 = vperm.xlu0 %3167, %v3536_v29   ;;  %575 = vmatpush1.bf16.msra.mxu0 %v3188_v27  ;;  %v3663_v15 = vld [vmem:[%s357_s21] sm:$0xff]  ;;  %v3236_v21 = vld [vmem:[%s3532_s15 + $0x68] ss:$12 sps:$4 sm:$0xff]   ;;  %v3237_v22 = vld [vmem:[%s3532_s15 + $0x50] ss:$12 sps:$4 sm:$0xff]   ;;  %v424_v27 = vshrl.u32 %v423_v26, 7 }
  0x28   : > { %2999 = vmatprep.subr.bf16.mxu1 %v3381_v0  ;;  %576 = vmatprep.subr.bf16.mxu0 %v3189_v28  ;;  %v714_v17 = vpack.c.bf16 %v3663_v15, %v3663_v15  ;;  %v3235_v20 = vld [vmem:[%s3532_s15 + $0x80] ss:$12 sps:$4 sm:$0xff]   ;;  %v3238_v23 = vld [vmem:[%s3532_s15 + $0x38] ss:$12 sps:$4 sm:$0xff]   ;;  %v3240_v25 = vld [vmem:[%s3532_s15 + $0x8] ss:$12 sps:$4 sm:$0xff]  }
  0x29   : > { %1874 = vperm.xlu1 %3168, %v1871_v50   ;;  %v3239_v24 = vld [vmem:[%s3532_s15 + $0x20] ss:$12 sps:$4 sm:$0xff]   ;;  %v433_v28 = vsub.s32 2, %v424_v27  ;;  %v425_v29 = vsub.s32 0, %v424_v27  ;;  %s3137_s19 = smul.u32 48, %s345_s18  ;;  %s2596_s24 = scalar_lea.vmem [#allocation2], %s2759_s27 }
  0x2a   : > { %3000 = vmatpush3.bf16.msra.mxu1 %v3191_v30  ;;  %v421_v30 = vld [vmem:[%s371_s25] sm:$0x7]  ;;  %s2758_s21 = smul.u32 40, %s3442_s30  ;;  %s2822_s10 = sshll.u32 %s3442_s30, 3 }
  0x2b   : > { %577 = vmatpush1.bf16.msra.mxu0 %v3192_v31  ;;  %3001 = vmatprep.subr.bf16.mxu1 %v3381_v0  ;;  %v429_v31 = vsub.s32 1, %v424_v27  ;;  %v426_v33 = vrot.slane %v421_v30, %v425_v29  ;;  %s3725_s22 = scalar_lea.vmem [#allocation3], %s3137_s19  ;;  %s2790_s25 = smul.u32 24, %s3442_s30 }
  0x2c   : > { %578 = vmatprep.subr.bf16.mxu0 %v3193_v32  ;;  %v434_v32 = vrot.slane %v421_v30, %v433_v28  ;;  %s1003_s23 = scalar_lea.vmem %s3725_s22, %s2758_s21 [#allocation3]  ;;  %s2606_s11 = scalar_lea.vmem %s3725_s22, %s2822_s10 [#allocation3] }
  0x2d   : > { %2167 = vperm.xlu1 %3168, %v2164_v52   ;;  %v430_v35 = vrot.slane %v421_v30, %v429_v31  ;;  %s2600_s26 = scalar_lea.vmem %s3725_s22, %s2790_s25 [#allocation3]  ;;  %s2852_s19 = sshll.u32 %s3479_s20, 3 }
  0x2e   : > { %3002 = vmatpush3.bf16.msra.mxu1 %v3195_v34  ;;  %s1880_s21 = scalar_lea.vmem %s3725_s22, %s2852_s19 [#allocation3]  ;;  %s2481_s16 = scalar_lea.vmem (%p3454_p4), %s3999_s7, %s2822_s10 }
  0x2f   : > { %579 = vmatpush1.bf16.msra.mxu0 %v3196_v36  ;;  %3003 = vmatprep.subr.bf16.mxu1 %v3381_v0 }
  0x30   : > { %580 = vmatprep.subr.bf16.mxu0 %v3197_v37 }
  0x31   : > { %2460 = vperm.xlu1 %3168, %v2457_v8  }
  0x32   : > { %3004 = vmatpush3.bf16.msra.mxu1 %v3199_v40 }
  0x33   : > { %581 = vmatpush1.bf16.msra.mxu0 %v3200_v42  ;;  %3017 = vmatprep.subr.bf16.mxu1 %v3381_v0 }
  0x34   : > { %875 = vmatprep.subr.bf16.mxu0 %v3559_v43 }
  0x35   : > { %3006 = vmatmul.mubr.bf16.vlgmr.msra.gmra.mxu1 %v386_v45 }
  0x36   : > { %599 = vmatmul.mubr.bf16.vlgmr.msra.gmra.mxu0 %v386_v45  ;;  %3009 = vmatprep.mubr.msk.bf16.mxu1 %vm3382_vm0, %v3381_v0 }
  0x37   : > { %876 = vmatpush1.bf16.msra.mxu0 %v3563_v46  ;;  %608 = vmatprep.mubr.bf16.mxu0 %v3383_v1 }
  0x38   : > { %877 = vmatprep.subr.bf16.mxu0 %v3566_v47  ;;  %3018 = vmatpush3.bf16.msra.mxu1 %v3222_v48 }
  0x39   : > { %3019 = vmatprep.subr.bf16.mxu1 %v3381_v0 }
  0x3b   : > { %878 = vmatpush1.bf16.msra.mxu0 %v3583_v53 }
  0x3c   : > { %879 = vmatprep.subr.bf16.mxu0 %v3588_v54  ;;  %3020 = vmatpush3.bf16.msra.mxu1 %v3226_v55 }
  0x3d   : > { %3010 = vmatmul.mubr.bf16.gmra.mxu1 %v387_v56  ;;  %3021 = vmatprep.subr.bf16.mxu1 %v3381_v0 }
  0x3e   : > { %609 = vmatmul.mubr.bf16.gmra.mxu0 %v387_v56  ;;  %3013 = vmatprep.mubr.msk.bf16.mxu1 %vm3382_vm0, %v3381_v0 }
  0x3f   : > { %880 = vmatpush1.bf16.msra.mxu0 %v3592_v57  ;;  %618 = vmatprep.mubr.bf16.mxu0 %v3383_v1 }
  0x40   : > { %881 = vmatprep.subr.bf16.mxu0 %v3596_v58  ;;  %3022 = vmatpush3.bf16.msra.mxu1 %v3227_v59 }
  0x41   : > { %3023 = vmatprep.subr.bf16.mxu1 %v3381_v0 }
  0x43   : > { %882 = vmatpush1.bf16.msra.mxu0 %v3608_v62 }
  0x44   : > { %883 = vmatprep.subr.bf16.mxu0 %v3614_v63  ;;  %3024 = vmatpush3.bf16.msra.mxu1 %v3228_v2 }
  0x45   : > { %3014 = vmatmul.mubr.bf16.gmra.mxu1 %v388_v3  ;;  %3025 = vmatprep.subr.bf16.mxu1 %v3381_v0 }
  0x46   : > { %619 = vmatmul.mubr.bf16.gmra.mxu0 %v388_v3  ;;  %3033 = vmatprep.mubr.msk.bf16.mxu1 %vm3382_vm0, %v3381_v0 }
  0x47   : > { %884 = vmatpush1.bf16.msra.mxu0 %v3621_v4  ;;  %907 = vmatprep.mubr.bf16.mxu0 %v3383_v1 }
  0x48   : > { %885 = vmatprep.subr.bf16.mxu0 %v3625_v5  ;;  %3026 = vmatpush3.bf16.msra.mxu1 %v3229_v6 }
  0x49   : > { %3027 = vmatprep.subr.bf16.mxu1 %v3381_v0 }
  0x4b   : > { %886 = vmatpush1.bf16.msra.mxu0 %v3631_v7 }
  0x4c   : > { %887 = vmatprep.subr.bf16.mxu0 %v3636_v9  ;;  %3028 = vmatpush3.bf16.msra.mxu1 %v3230_v10 }
  0x4d   : > { %3029 = vmatprep.subr.bf16.mxu1 %v3381_v0 }
  0x4f   : > { %888 = vmatpush1.bf16.msra.mxu0 %v3646_v11 }
  0x50   : > { %889 = vmatprep.subr.bf16.mxu0 %v3650_v12  ;;  %3030 = vmatpush3.bf16.msra.mxu1 %v3231_v13 }
  0x51   : > { %3031 = vmatprep.subr.bf16.mxu1 %v3381_v0 }
  0x53   : > { %890 = vmatpush1.bf16.msra.mxu0 %v3661_v14 }
  0x54   : > { %3032 = vmatpush3.bf16.msra.mxu1 %v3232_v16  ;;  %1174 = vmatprep.subr.bf16.mxu0 %v3559_v43 }
  0x55   : > { %3037 = vmatprep.subr.bf16.mxu1 %v3381_v0 }
  0x56   : > { %908 = vmatmul.mubr.bf16.vlgmr.msra.gmra.mxu0 %v714_v17 }
  0x57   : > { %3034 = vmatmul.mubr.bf16.vlgmr.msra.gmra.mxu1 %v714_v17  ;;  %1175 = vmatpush1.bf16.msra.mxu0 %v3563_v46 }
  0x58   : > { %1176 = vmatprep.subr.bf16.mxu0 %v3566_v47  ;;  %1206 = vmatprep.mubr.bf16.mxu0 %v3383_v1 }
  0x59   : > { %3053 = vmatprep.mubr.msk.bf16.mxu1 %vm3382_vm0, %v3381_v0  ;;  %3038 = vmatpush3.bf16.msra.mxu1 %v3233_v18 }
  0x5a   : > { %3039 = vmatprep.subr.bf16.mxu1 %v3381_v0 }
  0x5b   : > { %1177 = vmatpush1.bf16.msra.mxu0 %v3583_v53 }
  0x5c   : > { %1178 = vmatprep.subr.bf16.mxu0 %v3588_v54 }
  0x5d   : > { %3040 = vmatpush3.bf16.msra.mxu1 %v3234_v19 }
  0x5e   : > { %3041 = vmatprep.subr.bf16.mxu1 %v3381_v0 }
  0x5f   : > { %1179 = vmatpush1.bf16.msra.mxu0 %v3592_v57 }
  0x60   : > { %1180 = vmatprep.subr.bf16.mxu0 %v3596_v58 }
  0x61   : > { %3042 = vmatpush3.bf16.msra.mxu1 %v3235_v20 }
  0x62   : > { %3043 = vmatprep.subr.bf16.mxu1 %v3381_v0 }
  0x63   : > { %1181 = vmatpush1.bf16.msra.mxu0 %v3608_v62 }
  0x64   : > { %1182 = vmatprep.subr.bf16.mxu0 %v3614_v63 }
  0x65   : > { %3044 = vmatpush3.bf16.msra.mxu1 %v3236_v21 }
  0x66   : > { %3045 = vmatprep.subr.bf16.mxu1 %v3381_v0 }
  0x67   : > { %1183 = vmatpush1.bf16.msra.mxu0 %v3621_v4 }
  0x68   : > { %1184 = vmatprep.subr.bf16.mxu0 %v3625_v5 }
  0x69   : > { %3046 = vmatpush3.bf16.msra.mxu1 %v3237_v22 }
  0x6a   : > { %3047 = vmatprep.subr.bf16.mxu1 %v3381_v0 }
  0x6b   : > { %1185 = vmatpush1.bf16.msra.mxu0 %v3631_v7 }
  0x6c   : > { %1186 = vmatprep.subr.bf16.mxu0 %v3636_v9 }
  0x6d   : > { %3048 = vmatpush3.bf16.msra.mxu1 %v3238_v23 }
  0x6e   : > { %3049 = vmatprep.subr.bf16.mxu1 %v3381_v0 }
  0x6f   : > { %1187 = vmatpush1.bf16.msra.mxu0 %v3646_v11 }
  0x70   : > { %1188 = vmatprep.subr.bf16.mxu0 %v3650_v12 }
  0x71   : > { %3050 = vmatpush3.bf16.msra.mxu1 %v3239_v24 }
  0x72   : > { %3051 = vmatprep.subr.bf16.mxu1 %v3381_v0 }
  0x73   : > { %1189 = vmatpush1.bf16.msra.mxu0 %v3661_v14 }
  0x74   : > { %1466 = vmatprep.subr.bf16.mxu0 %v3559_v43 }
  0x75   : > { %3052 = vmatpush3.bf16.msra.mxu1 %v3240_v25 }
  0x76   : > { %3057 = vmatprep.subr.bf16.mxu1 %v3381_v0 }
  0xf5   : > { %v663_v34 = vpop.f32.mrf.mxu1 }
  0xf6   : > { %v664_v36 = vadd.f32 %v663_v34, %v434_v32  ;;  %v600_v37 = vpop.f32.mrf.mxu0 }
  0xf7   : > { %v601_v38 = vadd.f32 %v600_v37, %v426_v33  ;;  %v3007_v39 = vpop.f32.mrf.mxu1 }
  0xf8   : > { %688 = vst [vmem:[#allocation2 + $0x10] sm:$0xff] %v664_v36  ;;  %v602_v40 = vpop.f32.mrf.mxu0 }
  0xf9   : > { %686 = vst [vmem:[#allocation2] sm:$0xff] %v601_v38  ;;  %v603_v41 = vadd.f32 %v602_v40, %v430_v35  ;;  %v666_v42 = vpop.f32.mrf.mxu1 }
  0xfa   : > { %v667_v43 = vadd.f32 %v666_v42, %v434_v32  ;;  %v604_v44 = vpop.f32.mrf.mxu0 }
  0xfb   : > { %687 = vst [vmem:[#allocation2 + $0x8] sm:$0xff] %v603_v41  ;;  %v605_v45 = vadd.f32 %v604_v44, %v426_v33  ;;  %v3008_v48 = vpop.f32.mrf.mxu1 }
  0xfc   : > { %691 = vst [vmem:[#allocation2 + $0x28] sm:$0xff] %v667_v43  ;;  %v606_v49 = vpop.f32.mrf.mxu0 }
  0xfd   : > { %689 = vst [vmem:[#allocation2 + $0x18] sm:$0xff] %v605_v45  ;;  %v607_v50 = vadd.f32 %v606_v49, %v430_v35  ;;  %v671_v51 = vpop.f32.mrf.mxu1 }
  0xfe   : > { %v672_v52 = vadd.f32 %v671_v51, %v434_v32  ;;  %v610_v55 = vpop.f32.mrf.mxu0 }
  0xff   : > { %690 = vst [vmem:[#allocation2 + $0x20] sm:$0xff] %v607_v50  ;;  %v611_v56 = vadd.f32 %v610_v55, %v426_v33  ;;  %v3011_v59 = vpop.f32.mrf.mxu1  ;;  %v3719_v50 = vld [vmem:[%s374_s14] ss:$0 sm:$0xff]  ;;  %s2923_s14 = smul.u32 24, %s3479_s20 }
 0x100   : > { %694 = vst [vmem:[#allocation2 + $0x40] sm:$0xff] %v672_v52  ;;  %v612_v60 = vpop.f32.mrf.mxu0  ;;  %s2853_s20 = smul.u32 4294967224, %s3442_s30 }
 0x101   : > { %692 = vst [vmem:[#allocation2 + $0x30] sm:$0xff] %v611_v56  ;;  %v613_v61 = vadd.f32 %v612_v60, %v430_v35  ;;  %v674_v2 = vpop.f32.mrf.mxu1  ;;  %s1593_s18 = scalar_lea.vmem [#allocation2], %s2923_s14 }
 0x102   : > { %v675_v3 = vadd.f32 %v674_v2, %v434_v32  ;;  %v614_v6 = vpop.f32.mrf.mxu0  ;;  %v991_v2 = vpop.permute.xlu0 %990 }
 0x103   : > { %693 = vst [vmem:[#allocation2 + $0x38] sm:$0xff] %v613_v61  ;;  %v615_v8 = vadd.f32 %v614_v6, %v426_v33  ;;  %v3012_v10 = vpop.f32.mrf.mxu1 }
 0x104   : > { %697 = vst [vmem:[#allocation2 + $0x58] sm:$0xff] %v675_v3  ;;  %v616_v13 = vpop.f32.mrf.mxu0 }
 0x105   : > { %695 = vst [vmem:[#allocation2 + $0x48] sm:$0xff] %v615_v8  ;;  %v617_v16 = vadd.f32 %v616_v13, %v430_v35  ;;  %v679_v17 = vpop.f32.mrf.mxu1 }
 0x106   : > { %v680_v18 = vadd.f32 %v679_v17, %v434_v32  ;;  %v620_v19 = vpop.f32.mrf.mxu0 }
 0x107   : > { %696 = vst [vmem:[#allocation2 + $0x50] sm:$0xff] %v617_v16  ;;  %v621_v20 = vadd.f32 %v620_v19, %v426_v33  ;;  %v3015_v21 = vpop.f32.mrf.mxu1  ;;  %v998_v16 = vpop.permute.xlu0 %997 }
 0x108   : > { %700 = vst [vmem:[#allocation2 + $0x70] sm:$0xff] %v680_v18  ;;  %v622_v22 = vpop.f32.mrf.mxu0  ;;  %v1000_v18 = vmul.f32 %v998_v16, %v3663_v15  ;;  %v3825_v16 = vld [vmem:[%s3532_s15 + $0x48] ss:$12 sps:$4 sm:$0xff]  }
 0x109   : > { %698 = vst [vmem:[#allocation2 + $0x60] sm:$0xff] %v621_v20  ;;  %v623_v23 = vadd.f32 %v622_v22, %v430_v35  ;;  %v682_v24 = vpop.f32.mrf.mxu1 }
 0x10a   : > { %v683_v25 = vadd.f32 %v682_v24, %v434_v32  ;;  %v624_v26 = vpop.f32.mrf.mxu0 }
 0x10b   : > { %699 = vst [vmem:[#allocation2 + $0x68] sm:$0xff] %v623_v23  ;;  %v625_v27 = vadd.f32 %v624_v26, %v426_v33  ;;  %v3016_v28 = vpop.f32.mrf.mxu1 }
 0x10c   : > { %703 = vst [vmem:[#allocation2 + $0x88] sm:$0xff] %v683_v25  ;;  %v626_v29 = vpop.f32.mrf.mxu0 }
 0x10d   : > { %701 = vst [vmem:[#allocation2 + $0x78] sm:$0xff] %v625_v27  ;;  %v627_v30 = vadd.f32 %v626_v29, %v430_v35 }
 0x10f   : > { %702 = vst [vmem:[#allocation2 + $0x80] sm:$0xff] %v627_v30 }
 0x116   : > { %v711_v31 = vld [vmem:[%s710_s29] sm:$0xff]  ;;  %v909_v34 = vpop.f32.mrf.mxu0  ;;  %v712_v33 = vld [vmem:[%s710_s29 + $0x8] sm:$0xff]  ;;  %v713_v59 = vld [vmem:[%s710_s29 + $0x10] sm:$0xff]  ;;  %s2603_s29 = scalar_lea.vmem [#allocation2], %s2790_s25 }
 0x117   : > { %v956_v36 = vadd.f32 %v909_v34, %v711_v31  ;;  %v950_v37 = vpop.f32.mrf.mxu1  ;;  %v2761_v22 = vld [vmem:[%s2596_s24 + $0x20] sm:$0xff] }
 0x118   : > { %v911_v38 = vpop.f32.mrf.mxu0  ;;  %v976_v52 = vadd.f32 %v3719_v50, %v950_v37  ;;  %v2762_v37 = vld [vmem:[%s2596_s24 + $0x28] sm:$0xff] }
 0x119   : > { %v2754_v39 = vmul.f32 -1.442695, %v956_v36  ;;  %v3035_v40 = vpop.f32.mrf.mxu1  ;;  %v963_v43 = vadd.f32 %v911_v38, %v712_v33 }
 0x11a   : > { %v913_v32 = vpop.f32.mrf.mxu0  ;;  %v1284_v40 = vpop.permute.xlu1 %1283 }
 0x11b   : > { %3297 = vpow2.f32 %v2754_v39  ;;  %v953_v41 = vpop.f32.mrf.mxu1  ;;  %v2755_v45 = vmul.f32 -1.442695, %v963_v43 }
 0x11c   : > { %v914_v42 = vpop.f32.mrf.mxu0 }
 0x11d   : > { %v3036_v44 = vpop.f32.mrf.mxu1  ;;  %3299 = vpow2.f32 %v2755_v45 }
 0x11e   : > { %v1291_v43 = vpop.permute.xlu1 %1290 }
 0x128   : > { %v3298_v35 = vpop.eup %3297 }
 0x129   : > { %v960_v48 = vadd.f32 1.0, %v3298_v35 }
 0x12a   : > { %v3300_v49 = vpop.eup %3299 }
 0x12b   : > { %3301 = vrcp.f32 %v960_v48  ;;  %v967_v51 = vadd.f32 1.0, %v3300_v49 }
 0x12d   : > { %3303 = vrcp.f32 %v967_v51  ;;  %v3783_v51 = vld [vmem:[%s3532_s15 + $0xac] ss:$12 sps:$4 sm:$0xff]  }
 0x138   : > { %v3302_v55 = vpop.eup %3301 }
 0x139   : > { %v977_v56 = vmul.f32 %v3302_v55, %v976_v52  ;;  %v3786_v52 = vld [vmem:[%s3532_s15 + $0xa8] ss:$12 sps:$4 sm:$0xff]   ;;  %v3252_v55 = vld [vmem:[%s3532_s15 + $0xb0] ss:$12 sps:$4 sm:$0xff]  }
 0x13a   : > { %v3304_v61 = vpop.eup %3303 }
 0x13b   : > { %v978_v60 = vadd.f32 %v977_v56, %v713_v59  ;;  %v980_v3 = vsub.f32 1.0, %v3304_v61  ;;  %v982_v10 = vmul.f32 %v3304_v61, %v3663_v15  ;;  %v3792_v56 = vld [vmem:[%s3532_s15 + $0x94] ss:$12 sps:$4 sm:$0xff]   ;;  %v3796_v59 = vld [vmem:[%s3532_s15 + $0x90] ss:$12 sps:$4 sm:$0xff]  }
 0x13c   : > { %v3802_v61 = vld [vmem:[%s3532_s15 + $0x78] ss:$12 sps:$4 sm:$0xff]  }
 0x13d   : > { %3305 = vtanh.f32 %v978_v60  ;;  %v3256_v60 = vld [vmem:[%s3532_s15 + $0x98] ss:$12 sps:$4 sm:$0xff]  }
 0x14a   : > { %v3306_v6 = vpop.eup %3305 }
 0x14b   : > { %v981_v8 = vmul.f32 %v3306_v6, %v980_v3  ;;  %v3260_v3 = vld [vmem:[%s3532_s15 + $0x80] ss:$12 sps:$4 sm:$0xff]   ;;  %v3810_v6 = vld [vmem:[%s3532_s15 + $0x64] ss:$12 sps:$4 sm:$0xff]  }
 0x14d   : > { %v983_v13 = vadd.f32 %v982_v10, %v981_v8  ;;  %v3815_v8 = vld [vmem:[%s3532_s15 + $0x60] ss:$12 sps:$4 sm:$0xff]   ;;  %v3264_v10 = vld [vmem:[%s3532_s15 + $0x68] ss:$12 sps:$4 sm:$0xff]  }
 0x14f   : > { %v993_v17 = vmul.f32 %v991_v2, %v983_v13  ;;  %v3805_v2 = vld [vmem:[%s3532_s15 + $0x7c] ss:$12 sps:$4 sm:$0xff]   ;;  %v3821_v13 = vld [vmem:[%s3532_s15 + $0x4c] ss:$12 sps:$4 sm:$0xff]  }
 0x151   : > { %1004 = vst [vmem:[%s1003_s23] sm:$0xff] %v993_v17  ;;  %v3729_v19 = vadd.f32 %v1000_v18, %v993_v17  ;;  %v3268_v17 = vld [vmem:[%s3532_s15 + $0x50] ss:$12 sps:$4 sm:$0xff]   ;;  %v3831_v18 = vld [vmem:[%s3532_s15 + $0x34] ss:$12 sps:$4 sm:$0xff]   ;;  %s2614_s23 = scalar_lea.vmem [#allocation2], %s2853_s20 }
 0x153   : > { %v1013_v20 = vpack.c.bf16 %v3729_v19, %v3729_v19  ;;  %v1293_v45 = vmul.f32 %v1291_v43, %v3729_v19 }
 0x155   : > { %1207 = vmatmul.mubr.bf16.vlgmr.msra.gmra.mxu0 %v1013_v20  ;;  %3054 = vmatmul.mubr.bf16.vlgmr.msra.gmra.mxu1 %v1013_v20  ;;  %v3272_v20 = vld [vmem:[%s3532_s15 + $0x38] ss:$12 sps:$4 sm:$0xff]  }
 0x156   : > { %1467 = vmatpush1.bf16.msra.mxu0 %v3563_v46  ;;  %1498 = vmatprep.mubr.bf16.mxu0 %v3383_v1  ;;  %v3241_v46 = vld [vmem:[%s3532_s15 + $0xb0] ss:$12 sps:$4 sm:$0xff]  }
 0x157   : > { %1468 = vmatprep.subr.bf16.mxu0 %v3566_v47  ;;  %3073 = vmatprep.mubr.msk.bf16.mxu1 %vm3382_vm0, %v3381_v0  ;;  %v3242_v47 = vld [vmem:[%s3532_s15 + $0x98] ss:$12 sps:$4 sm:$0xff]  }
 0x158   : > { %3058 = vmatpush3.bf16.msra.mxu1 %v3241_v46  ;;  %v3841_v46 = vld [vmem:[%s3532_s15 + $0x1c] ss:$12 sps:$4 sm:$0xff]  }
 0x159   : > { %3059 = vmatprep.subr.bf16.mxu1 %v3381_v0 }
 0x15a   : > { %1469 = vmatpush1.bf16.msra.mxu0 %v3583_v53  ;;  %v3243_v53 = vld [vmem:[%s3532_s15 + $0x80] ss:$12 sps:$4 sm:$0xff]  }
 0x15b   : > { %1470 = vmatprep.subr.bf16.mxu0 %v3588_v54  ;;  %v3244_v54 = vld [vmem:[%s3532_s15 + $0x68] ss:$12 sps:$4 sm:$0xff]  }
 0x15c   : > { %3060 = vmatpush3.bf16.msra.mxu1 %v3242_v47  ;;  %v3845_v47 = vld [vmem:[%s3532_s15 + $0x18] ss:$12 sps:$4 sm:$0xff]  }
 0x15d   : > { %3061 = vmatprep.subr.bf16.mxu1 %v3381_v0 }
 0x15e   : > { %1471 = vmatpush1.bf16.msra.mxu0 %v3592_v57  ;;  %v3245_v57 = vld [vmem:[%s3532_s15 + $0x50] ss:$12 sps:$4 sm:$0xff]  }
 0x15f   : > { %1472 = vmatprep.subr.bf16.mxu0 %v3596_v58  ;;  %v3246_v58 = vld [vmem:[%s3532_s15 + $0x38] ss:$12 sps:$4 sm:$0xff]  }
 0x160   : > { %3062 = vmatpush3.bf16.msra.mxu1 %v3243_v53  ;;  %v3276_v53 = vld [vmem:[%s3532_s15 + $0x20] ss:$12 sps:$4 sm:$0xff]  }
 0x161   : > { %3063 = vmatprep.subr.bf16.mxu1 %v3381_v0 }
 0x162   : > { %1473 = vmatpush1.bf16.msra.mxu0 %v3608_v62  ;;  %v3247_v62 = vld [vmem:[%s3532_s15 + $0x20] ss:$12 sps:$4 sm:$0xff]  }
 0x163   : > { %1474 = vmatprep.subr.bf16.mxu0 %v3614_v63  ;;  %v3248_v63 = vld [vmem:[%s3532_s15 + $0x8] ss:$12 sps:$4 sm:$0xff]  }
 0x164   : > { %3064 = vmatpush3.bf16.msra.mxu1 %v3244_v54  ;;  %v3851_v54 = vld [vmem:[%s3532_s15 + $0x4] ss:$12 sps:$4 sm:$0xff]  }
 0x165   : > { %3065 = vmatprep.subr.bf16.mxu1 %v3381_v0 }
 0x166   : > { %1475 = vmatpush1.bf16.msra.mxu0 %v3621_v4  ;;  %v2760_v4 = vld [vmem:[%s2596_s24 + $0x18] sm:$0xff]  ;;  %s2886_s24 = smul.u32 4294967176, %s3442_s30 }
 0x167   : > { %1476 = vmatprep.subr.bf16.mxu0 %v3625_v5 }
 0x168   : > { %3066 = vmatpush3.bf16.msra.mxu1 %v3245_v57  ;;  %v3855_v57 = vld [vmem:[%s3532_s15] ss:$12 sps:$4 sm:$0xff]   ;;  %s2622_s25 = scalar_lea.vmem [#allocation2], %s2886_s24 }
 0x169   : > { %3067 = vmatprep.subr.bf16.mxu1 %v3381_v0 }
 0x16a   : > { %1477 = vmatpush1.bf16.msra.mxu0 %v3631_v7 }
 0x16b   : > { %1478 = vmatprep.subr.bf16.mxu0 %v3636_v9 }
 0x16c   : > { %3068 = vmatpush3.bf16.msra.mxu1 %v3246_v58  ;;  %v3280_v58 = vld [vmem:[%s3532_s15 + $0x8] ss:$12 sps:$4 sm:$0xff]  }
 0x16d   : > { %3069 = vmatprep.subr.bf16.mxu1 %v3381_v0 }
 0x16e   : > { %1479 = vmatpush1.bf16.msra.mxu0 %v3646_v11 }
 0x16f   : > { %1480 = vmatprep.subr.bf16.mxu0 %v3650_v12 }
 0x170   : > { %3070 = vmatpush3.bf16.msra.mxu1 %v3247_v62  ;;  %v2792_v62 = vld [vmem:[%s2603_s29 + $0x30] sm:$0xff] }
 0x171   : > { %3071 = vmatprep.subr.bf16.mxu1 %v3381_v0 }
 0x172   : > { %1481 = vmatpush1.bf16.msra.mxu0 %v3661_v14 }
 0x173   : > { %1758 = vmatprep.subr.bf16.mxu0 %v3783_v51 }
 0x174   : > { %3072 = vmatpush3.bf16.msra.mxu1 %v3248_v63 }
 0x175   : > { %3077 = vmatprep.subr.bf16.mxu1 %v3381_v0 }
 0x215   : > { %v1208_v5 = vpop.f32.mrf.mxu0  ;;  %v1249_v7 = vpop.f32.mrf.mxu1 }
 0x216   : > { %v1255_v9 = vadd.f32 %v2760_v4, %v1208_v5  ;;  %v1269_v31 = vadd.f32 %v3719_v50, %v1249_v7 }
 0x217   : > { %v1210_v11 = vpop.f32.mrf.mxu0  ;;  %v3055_v12 = vpop.f32.mrf.mxu1 }
 0x218   : > { %v2787_v14 = vmul.f32 -1.442695, %v1255_v9  ;;  %v1262_v25 = vadd.f32 %v2761_v22, %v1210_v11 }
 0x219   : > { %v1212_v15 = vpop.f32.mrf.mxu0  ;;  %v1252_v21 = vpop.f32.mrf.mxu1 }
 0x21a   : > { %3307 = vpow2.f32 %v2787_v14  ;;  %v2788_v26 = vmul.f32 -1.442695, %v1262_v25  ;;  %v2793_v15 = vld [vmem:[%s2603_s29 + $0x38] sm:$0xff] }
 0x21b   : > { %v1213_v23 = vpop.f32.mrf.mxu0  ;;  %v3056_v24 = vpop.f32.mrf.mxu1 }
 0x21c   : > { %3309 = vpow2.f32 %v2788_v26 }
 0x227   : > { %v3308_v27 = vpop.eup %3307 }
 0x228   : > { %v1259_v28 = vadd.f32 1.0, %v3308_v27 }
 0x229   : > { %v3310_v29 = vpop.eup %3309 }
 0x22a   : > { %3311 = vrcp.f32 %v1259_v28  ;;  %v1266_v30 = vadd.f32 1.0, %v3310_v29 }
 0x22c   : > { %3313 = vrcp.f32 %v1266_v30 }
 0x237   : > { %v3312_v34 = vpop.eup %3311 }
 0x238   : > { %v1270_v36 = vmul.f32 %v3312_v34, %v1269_v31  ;;  %v2794_v34 = vld [vmem:[%s2603_s29 + $0x40] sm:$0xff] }
 0x239   : > { %v3314_v39 = vpop.eup %3313 }
 0x23a   : > { %v1271_v38 = vadd.f32 %v2762_v37, %v1270_v36  ;;  %v1273_v32 = vsub.f32 1.0, %v3314_v39  ;;  %v1275_v42 = vmul.f32 %v3314_v39, %v3729_v19  ;;  %v3835_v19 = vld [vmem:[%s3532_s15 + $0x30] ss:$12 sps:$4 sm:$0xff]  }
 0x23c   : > { %3315 = vtanh.f32 %v1271_v38 }
 0x249   : > { %v3316_v41 = vpop.eup %3315 }
 0x24a   : > { %v1274_v33 = vmul.f32 %v3316_v41, %v1273_v32 }
 0x24c   : > { %v1276_v44 = vadd.f32 %v1275_v42, %v1274_v33  ;;  %v1576_v33 = vpop.permute.xlu0 %1575  ;;  %v1583_v42 = vpop.permute.xlu1 %1582 }
 0x24e   : > { %v1286_v35 = vmul.f32 %v1284_v40, %v1276_v44 }
 0x250   : > { %v3775_v48 = vadd.f32 %v1293_v45, %v1286_v35  ;;  %2791 = vst [vmem:[%s2600_s26 + $0x8] sm:$0xff] %v1286_v35  ;;  %s2917_s26 = smul.u32 4294967256, %s3442_s30 }
 0x252   : > { %v1305_v49 = vpack.c.bf16 %v3775_v48, %v3775_v48  ;;  %v1585_v43 = vmul.f32 %v1583_v42, %v3775_v48  ;;  %s2626_s29 = scalar_lea.vmem %s3725_s22, %s2917_s26 [#allocation3] }
 0x254   : > { %1499 = vmatmul.mubr.bf16.vlgmr.msra.gmra.mxu0 %v1305_v49  ;;  %3074 = vmatmul.mubr.bf16.vlgmr.msra.gmra.mxu1 %v1305_v49  ;;  %v3282_v49 = vld [vmem:[%s3532_s15 + $0x98] ss:$12 sps:$4 sm:$0xff]  }
 0x255   : > { %1790 = vmatprep.mubr.bf16.mxu0 %v3383_v1  ;;  %3093 = vmatprep.mubr.msk.bf16.mxu1 %vm3382_vm0, %v3381_v0 }
 0x256   : > { %1759 = vmatpush1.bf16.msra.mxu0 %v3786_v52  ;;  %3078 = vmatpush3.bf16.msra.mxu1 %v3252_v55  ;;  %v3283_v55 = vld [vmem:[%s3532_s15 + $0x80] ss:$12 sps:$4 sm:$0xff]  }
 0x257   : > { %3079 = vmatprep.subr.bf16.mxu1 %v3381_v0  ;;  %1760 = vmatprep.subr.bf16.mxu0 %v3792_v56 }
 0x25a   : > { %1761 = vmatpush1.bf16.msra.mxu0 %v3796_v59  ;;  %3080 = vmatpush3.bf16.msra.mxu1 %v3256_v60  ;;  %v3284_v60 = vld [vmem:[%s3532_s15 + $0x68] ss:$12 sps:$4 sm:$0xff]  }
 0x25b   : > { %3081 = vmatprep.subr.bf16.mxu1 %v3381_v0  ;;  %1762 = vmatprep.subr.bf16.mxu0 %v3805_v2 }
 0x25e   : > { %1763 = vmatpush1.bf16.msra.mxu0 %v3802_v61  ;;  %3082 = vmatpush3.bf16.msra.mxu1 %v3260_v3  ;;  %v3285_v3 = vld [vmem:[%s3532_s15 + $0x50] ss:$12 sps:$4 sm:$0xff]  }
 0x25f   : > { %1764 = vmatprep.subr.bf16.mxu0 %v3810_v6  ;;  %3083 = vmatprep.subr.bf16.mxu1 %v3381_v0 }
 0x262   : > { %1765 = vmatpush1.bf16.msra.mxu0 %v3815_v8  ;;  %3084 = vmatpush3.bf16.msra.mxu1 %v3264_v10  ;;  %v3287_v10 = vld [vmem:[%s3532_s15 + $0x20] ss:$12 sps:$4 sm:$0xff]  }
 0x263   : > { %1766 = vmatprep.subr.bf16.mxu0 %v3821_v13  ;;  %3085 = vmatprep.subr.bf16.mxu1 %v3381_v0 }
 0x266   : > { %1767 = vmatpush1.bf16.msra.mxu0 %v3825_v16  ;;  %3086 = vmatpush3.bf16.msra.mxu1 %v3268_v17  ;;  %v3288_v17 = vld [vmem:[%s3532_s15 + $0x8] ss:$12 sps:$4 sm:$0xff]  }
 0x267   : > { %1768 = vmatprep.subr.bf16.mxu0 %v3831_v18  ;;  %3087 = vmatprep.subr.bf16.mxu1 %v3381_v0 }
 0x26a   : > { %1769 = vmatpush1.bf16.msra.mxu0 %v3835_v19  ;;  %3088 = vmatpush3.bf16.msra.mxu1 %v3272_v20  ;;  %v1594_v20 = vld [vmem:[%s1593_s18] sm:$0xff] }
 0x26b   : > { %1770 = vmatprep.subr.bf16.mxu0 %v3841_v46  ;;  %3089 = vmatprep.subr.bf16.mxu1 %v3381_v0 }
 0x26e   : > { %1771 = vmatpush1.bf16.msra.mxu0 %v3845_v47  ;;  %3090 = vmatpush3.bf16.msra.mxu1 %v3276_v53 }
 0x26f   : > { %1772 = vmatprep.subr.bf16.mxu0 %v3851_v54  ;;  %3091 = vmatprep.subr.bf16.mxu1 %v3381_v0 }
 0x272   : > { %1773 = vmatpush1.bf16.msra.mxu0 %v3855_v57  ;;  %3092 = vmatpush3.bf16.msra.mxu1 %v3280_v58 }
 0x273   : > { %2051 = vmatprep.subr.bf16.mxu0 %v3783_v51  ;;  %3097 = vmatprep.subr.bf16.mxu1 %v3381_v0 }
 0x314   : > { %v1500_v63 = vpop.f32.mrf.mxu0  ;;  %v1541_v4 = vpop.f32.mrf.mxu1 }
 0x315   : > { %v1547_v5 = vadd.f32 %v2792_v62, %v1500_v63  ;;  %v1561_v29 = vadd.f32 %v3719_v50, %v1541_v4 }
 0x316   : > { %v1502_v7 = vpop.f32.mrf.mxu0  ;;  %v3075_v9 = vpop.f32.mrf.mxu1 }
 0x317   : > { %v2819_v11 = vmul.f32 -1.442695, %v1547_v5  ;;  %v1554_v23 = vadd.f32 %v2793_v15, %v1502_v7 }
 0x318   : > { %v1504_v12 = vpop.f32.mrf.mxu0  ;;  %v1544_v14 = vpop.f32.mrf.mxu1 }
 0x319   : > { %3317 = vpow2.f32 %v2819_v11  ;;  %v2820_v24 = vmul.f32 -1.442695, %v1554_v23  ;;  %v1595_v11 = vld [vmem:[%s1593_s18 + $0x8] sm:$0xff] }
 0x31a   : > { %v1505_v21 = vpop.f32.mrf.mxu0  ;;  %v3076_v22 = vpop.f32.mrf.mxu1 }
 0x31b   : > { %3319 = vpow2.f32 %v2820_v24 }
 0x326   : > { %v3318_v25 = vpop.eup %3317 }
 0x327   : > { %v1551_v26 = vadd.f32 1.0, %v3318_v25 }
 0x328   : > { %v3320_v27 = vpop.eup %3319 }
 0x329   : > { %3321 = vrcp.f32 %v1551_v26  ;;  %v1558_v28 = vadd.f32 1.0, %v3320_v27 }
 0x32b   : > { %3323 = vrcp.f32 %v1558_v28 }
 0x336   : > { %v3322_v30 = vpop.eup %3321 }
 0x337   : > { %v1562_v31 = vmul.f32 %v3322_v30, %v1561_v29  ;;  %v1596_v29 = vld [vmem:[%s1593_s18 + $0x10] sm:$0xff]  ;;  %s378_s18 = scalar_lea.vmem %s4000_s8, %s2700_s17 }
 0x338   : > { %v3324_v37 = vpop.eup %3323 }
 0x339   : > { %v1563_v36 = vadd.f32 %v2794_v34, %v1562_v31  ;;  %v1565_v38 = vsub.f32 1.0, %v3324_v37  ;;  %v1567_v32 = vmul.f32 %v3324_v37, %v3775_v48  ;;  %v3281_v48 = vld [vmem:[%s3532_s15 + $0xb0] ss:$12 sps:$4 sm:$0xff]  }
 0x33b   : > { %3325 = vtanh.f32 %v1563_v36 }
 0x348   : > { %v3326_v39 = vpop.eup %3325 }
 0x349   : > { %v1566_v40 = vmul.f32 %v3326_v39, %v1565_v38 }
 0x34b   : > { %v1568_v41 = vadd.f32 %v1567_v32, %v1566_v40  ;;  %v1868_v40 = vpop.permute.xlu0 %1867  ;;  %v1875_v32 = vpop.permute.xlu1 %1874 }
 0x34d   : > { %v1578_v44 = vmul.f32 %v1576_v33, %v1568_v41 }
 0x34f   : > { %v3872_v45 = vadd.f32 %v1585_v43, %v1578_v44  ;;  %2823 = vst [vmem:[%s2606_s11 + $0x10] sm:$0xff] %v1578_v44 }
 0x351   : > { %v1597_v35 = vpack.c.bf16 %v3872_v45, %v3872_v45  ;;  %v1877_v33 = vmul.f32 %v1875_v32, %v3872_v45 }
 0x353   : > { %1791 = vmatmul.mubr.bf16.vlgmr.msra.gmra.mxu0 %v1597_v35  ;;  %3094 = vmatmul.mubr.bf16.vlgmr.msra.gmra.mxu1 %v1597_v35 }
 0x354   : > { %2052 = vmatpush1.bf16.msra.mxu0 %v3786_v52  ;;  %2083 = vmatprep.mubr.bf16.mxu0 %v3383_v1 }
 0x355   : > { %2053 = vmatprep.subr.bf16.mxu0 %v3792_v56  ;;  %3113 = vmatprep.mubr.msk.bf16.mxu1 %vm3382_vm0, %v3381_v0 }
 0x356   : > { %3098 = vmatpush3.bf16.msra.mxu1 %v3281_v48 }
 0x357   : > { %3099 = vmatprep.subr.bf16.mxu1 %v3381_v0 }
 0x358   : > { %2054 = vmatpush1.bf16.msra.mxu0 %v3796_v59 }
 0x359   : > { %2055 = vmatprep.subr.bf16.mxu0 %v3805_v2 }
 0x35a   : > { %3100 = vmatpush3.bf16.msra.mxu1 %v3282_v49 }
 0x35b   : > { %3101 = vmatprep.subr.bf16.mxu1 %v3381_v0 }
 0x35c   : > { %2056 = vmatpush1.bf16.msra.mxu0 %v3802_v61 }
 0x35d   : > { %2057 = vmatprep.subr.bf16.mxu0 %v3810_v6 }
 0x35e   : > { %3102 = vmatpush3.bf16.msra.mxu1 %v3283_v55 }
 0x35f   : > { %3103 = vmatprep.subr.bf16.mxu1 %v3381_v0 }
 0x360   : > { %2058 = vmatpush1.bf16.msra.mxu0 %v3815_v8 }
 0x361   : > { %2059 = vmatprep.subr.bf16.mxu0 %v3821_v13 }
 0x362   : > { %3104 = vmatpush3.bf16.msra.mxu1 %v3284_v60 }
 0x363   : > { %3105 = vmatprep.subr.bf16.mxu1 %v3381_v0 }
 0x364   : > { %2060 = vmatpush1.bf16.msra.mxu0 %v3825_v16 }
 0x365   : > { %2061 = vmatprep.subr.bf16.mxu0 %v3831_v18 }
 0x366   : > { %3106 = vmatpush3.bf16.msra.mxu1 %v3285_v3 }
 0x367   : > { %3107 = vmatprep.subr.bf16.mxu1 %v3381_v0 }
 0x368   : > { %2062 = vmatpush1.bf16.msra.mxu0 %v3835_v19 }
 0x369   : > { %2063 = vmatprep.subr.bf16.mxu0 %v3841_v46 }
 0x36c   : > { %2064 = vmatpush1.bf16.msra.mxu0 %v3845_v47 }
 0x36d   : > { %2065 = vmatprep.subr.bf16.mxu0 %v3851_v54 }
 0x370   : > { %2066 = vmatpush1.bf16.msra.mxu0 %v3855_v57 }
 0x371   : > { %2344 = vmatprep.subr.bf16.mxu0 %v3783_v51  ;;  %v3286_v51 = vld [vmem:[%s3532_s15 + $0x38] ss:$12 sps:$4 sm:$0xff]  }
 0x372   : > { %3108 = vmatpush3.bf16.msra.mxu1 %v3286_v51 }
 0x373   : > { %3109 = vmatprep.subr.bf16.mxu1 %v3381_v0 }
 0x376   : > { %3110 = vmatpush3.bf16.msra.mxu1 %v3287_v10 }
 0x377   : > { %3111 = vmatprep.subr.bf16.mxu1 %v3381_v0 }
 0x37a   : > { %3112 = vmatpush3.bf16.msra.mxu1 %v3288_v17 }
 0x37b   : > { %3117 = vmatprep.subr.bf16.mxu1 %v3381_v0 }
 0x413   : > { %v1792_v53 = vpop.f32.mrf.mxu0  ;;  %v1833_v58 = vpop.f32.mrf.mxu1 }
 0x414   : > { %v1839_v62 = vadd.f32 %v1792_v53, %v1594_v20  ;;  %v1853_v26 = vadd.f32 %v3719_v50, %v1833_v58  ;;  %v2856_v53 = vld [vmem:[%s2614_s23 + $0x70] sm:$0xff] }
 0x415   : > { %v1794_v63 = vpop.f32.mrf.mxu0  ;;  %v3095_v4 = vpop.f32.mrf.mxu1 }
 0x416   : > { %v2849_v5 = vmul.f32 -1.442695, %v1839_v62  ;;  %v1846_v15 = vadd.f32 %v1794_v63, %v1595_v11  ;;  %v2161_v11 = vpop.permute.xlu0 %2160 }
 0x417   : > { %v1796_v7 = vpop.f32.mrf.mxu0  ;;  %v1836_v9 = vpop.f32.mrf.mxu1 }
 0x418   : > { %3327 = vpow2.f32 %v2849_v5  ;;  %v2850_v21 = vmul.f32 -1.442695, %v1846_v15 }
 0x419   : > { %v1797_v12 = vpop.f32.mrf.mxu0  ;;  %v3096_v14 = vpop.f32.mrf.mxu1 }
 0x41a   : > { %3329 = vpow2.f32 %v2850_v21  ;;  %v2168_v12 = vpop.permute.xlu1 %2167 }
 0x425   : > { %v3328_v22 = vpop.eup %3327 }
 0x426   : > { %v1843_v23 = vadd.f32 1.0, %v3328_v22 }
 0x427   : > { %v3330_v24 = vpop.eup %3329 }
 0x428   : > { %3331 = vrcp.f32 %v1843_v23  ;;  %v1850_v25 = vadd.f32 1.0, %v3330_v24  ;;  %v2887_v23 = vld [vmem:[%s2622_s25 + $0x78] sm:$0xff] }
 0x42a   : > { %3333 = vrcp.f32 %v1850_v25 }
 0x435   : > { %v3332_v27 = vpop.eup %3331 }
 0x436   : > { %v1854_v28 = vmul.f32 %v3332_v27, %v1853_v26 }
 0x437   : > { %v3334_v31 = vpop.eup %3333 }
 0x438   : > { %v1855_v30 = vadd.f32 %v1854_v28, %v1596_v29  ;;  %v1857_v34 = vsub.f32 1.0, %v3334_v31  ;;  %v1859_v38 = vmul.f32 %v3334_v31, %v3872_v45  ;;  %v2855_v45 = vld [vmem:[%s2614_s23 + $0x68] sm:$0xff] }
 0x43a   : > { %3335 = vtanh.f32 %v1855_v30 }
 0x447   : > { %v3336_v36 = vpop.eup %3335 }
 0x448   : > { %v1858_v37 = vmul.f32 %v3336_v36, %v1857_v34  ;;  %v2888_v34 = vld [vmem:[%s2622_s25 + $0x80] sm:$0xff] }
 0x44a   : > { %v1860_v39 = vadd.f32 %v1859_v38, %v1858_v37 }
 0x44c   : > { %v1870_v41 = vmul.f32 %v1868_v40, %v1860_v39 }
 0x44e   : > { %v3917_v42 = vadd.f32 %v1877_v33, %v1870_v41  ;;  %1881 = vst [vmem:[%s1880_s21] sm:$0xff] %v1870_v41 }
 0x450   : > { %v1890_v43 = vpack.c.bf16 %v3917_v42, %v3917_v42  ;;  %v2170_v15 = vmul.f32 %v2168_v12, %v3917_v42 }
 0x452   : > { %2084 = vmatmul.mubr.bf16.vlgmr.msra.gmra.mxu0 %v1890_v43  ;;  %3114 = vmatmul.mubr.bf16.vlgmr.msra.gmra.mxu1 %v1890_v43 }
 0x453   : > { %2345 = vmatpush1.bf16.msra.mxu0 %v3786_v52  ;;  %2376 = vmatprep.mubr.bf16.mxu0 %v3383_v1  ;;  %v3289_v1 = vld [vmem:[%s3532_s15 + $0xb0] ss:$12 sps:$4 sm:$0xff]   ;;  %v3290_v52 = vld [vmem:[%s3532_s15 + $0x98] ss:$12 sps:$4 sm:$0xff]  }
 0x454   : > { %2346 = vmatprep.subr.bf16.mxu0 %v3792_v56  ;;  %3133 = vmatprep.mubr.msk.bf16.mxu1 %vm3382_vm0, %v3381_v0  ;;  %v3291_v56 = vld [vmem:[%s3532_s15 + $0x80] ss:$12 sps:$4 sm:$0xff]  }
 0x455   : > { %3118 = vmatpush3.bf16.msra.mxu1 %v3289_v1 }
 0x456   : > { %3119 = vmatprep.subr.bf16.mxu1 %v3381_v0 }
 0x457   : > { %2347 = vmatpush1.bf16.msra.mxu0 %v3796_v59  ;;  %v3292_v59 = vld [vmem:[%s3532_s15 + $0x68] ss:$12 sps:$4 sm:$0xff]  }
 0x458   : > { %2348 = vmatprep.subr.bf16.mxu0 %v3805_v2  ;;  %v3294_v2 = vld [vmem:[%s3532_s15 + $0x38] ss:$12 sps:$4 sm:$0xff]  }
 0x459   : > { %3120 = vmatpush3.bf16.msra.mxu1 %v3290_v52  ;;  %v2889_v52 = vld [vmem:[%s2622_s25 + $0x88] sm:$0xff] }
 0x45a   : > { %3121 = vmatprep.subr.bf16.mxu1 %v3381_v0 }
 0x45b   : > { %2349 = vmatpush1.bf16.msra.mxu0 %v3802_v61  ;;  %v3293_v61 = vld [vmem:[%s3532_s15 + $0x50] ss:$12 sps:$4 sm:$0xff]  }
 0x45c   : > { %2350 = vmatprep.subr.bf16.mxu0 %v3810_v6  ;;  %v3295_v6 = vld [vmem:[%s3532_s15 + $0x20] ss:$12 sps:$4 sm:$0xff]  }
 0x45d   : > { %3122 = vmatpush3.bf16.msra.mxu1 %v3291_v56 }
 0x45e   : > { %3123 = vmatprep.subr.bf16.mxu1 %v3381_v0 }
 0x45f   : > { %2351 = vmatpush1.bf16.msra.mxu0 %v3815_v8  ;;  %v3296_v8 = vld [vmem:[%s3532_s15 + $0x8] ss:$12 sps:$4 sm:$0xff]   ;;  %s2884_s15 = smul.u32 4294967272, %s3442_s30 }
 0x460   : > { %2352 = vmatprep.subr.bf16.mxu0 %v3821_v13  ;;  %v2854_v13 = vld [vmem:[%s2614_s23 + $0x60] sm:$0xff] }
 0x461   : > { %3124 = vmatpush3.bf16.msra.mxu1 %v3292_v59  ;;  %s2618_s27 = scalar_lea.vmem %s3725_s22, %s2884_s15 [#allocation3] }
 0x462   : > { %3125 = vmatprep.subr.bf16.mxu1 %v3381_v0 }
 0x463   : > { %2353 = vmatpush1.bf16.msra.mxu0 %v3825_v16 }
 0x464   : > { %2354 = vmatprep.subr.bf16.mxu0 %v3831_v18 }
 0x465   : > { %3126 = vmatpush3.bf16.msra.mxu1 %v3293_v61 }
 0x466   : > { %3127 = vmatprep.subr.bf16.mxu1 %v3381_v0 }
 0x467   : > { %2355 = vmatpush1.bf16.msra.mxu0 %v3835_v19 }
 0x468   : > { %2356 = vmatprep.subr.bf16.mxu0 %v3841_v46 }
 0x469   : > { %3128 = vmatpush3.bf16.msra.mxu1 %v3294_v2 }
 0x46a   : > { %3129 = vmatprep.subr.bf16.mxu1 %v3381_v0 }
 0x46b   : > { %2357 = vmatpush1.bf16.msra.mxu0 %v3845_v47 }
 0x46c   : > { %2358 = vmatprep.subr.bf16.mxu0 %v3851_v54 }
 0x46d   : > { %3130 = vmatpush3.bf16.msra.mxu1 %v3295_v6 }
 0x46e   : > { %3131 = vmatprep.subr.bf16.mxu1 %v3381_v0 }
 0x46f   : > { %2359 = vmatpush1.bf16.msra.mxu0 %v3855_v57 }
 0x471   : > { %3132 = vmatpush3.bf16.msra.mxu1 %v3296_v8 }
 0x512   : > { %v2085_v16 = vpop.f32.mrf.mxu0  ;;  %v2126_v18 = vpop.f32.mrf.mxu1 }
 0x513   : > { %v2132_v19 = vadd.f32 %v2854_v13, %v2085_v16  ;;  %v2146_v10 = vadd.f32 %v3719_v50, %v2126_v18  ;;  %v2454_v16 = vpop.permute.xlu0 %2453  ;;  %v2461_v18 = vpop.permute.xlu1 %2460 }
 0x514   : > { %v2087_v46 = vpop.f32.mrf.mxu0  ;;  %v3115_v47 = vpop.f32.mrf.mxu1 }
 0x515   : > { %v2881_v54 = vmul.f32 -1.442695, %v2132_v19  ;;  %v2139_v49 = vadd.f32 %v2855_v45, %v2087_v46 }
 0x516   : > { %v2089_v57 = vpop.f32.mrf.mxu0  ;;  %v2129_v44 = vpop.f32.mrf.mxu1 }
 0x517   : > { %3337 = vpow2.f32 %v2881_v54  ;;  %v2882_v55 = vmul.f32 -1.442695, %v2139_v49 }
 0x518   : > { %v2090_v35 = vpop.f32.mrf.mxu0  ;;  %v3116_v48 = vpop.f32.mrf.mxu1 }
 0x519   : > { %3339 = vpow2.f32 %v2882_v55 }
 0x524   : > { %v3338_v0 = vpop.eup %3337 }
 0x525   : > { %v2136_v60 = vadd.f32 1.0, %v3338_v0 }
 0x526   : > { %v3340_v3 = vpop.eup %3339 }
 0x527   : > { %3341 = vrcp.f32 %v2136_v60  ;;  %v2143_v51 = vadd.f32 1.0, %v3340_v3 }
 0x529   : > { %3343 = vrcp.f32 %v2143_v51 }
 0x534   : > { %v3342_v17 = vpop.eup %3341 }
 0x535   : > { %v2147_v20 = vmul.f32 %v3342_v17, %v2146_v10 }
 0x536   : > { %v3344_v62 = vpop.eup %3343 }
 0x537   : > { %v2148_v58 = vadd.f32 %v2856_v53, %v2147_v20  ;;  %v2150_v63 = vsub.f32 1.0, %v3344_v62  ;;  %v2152_v7 = vmul.f32 %v3344_v62, %v3917_v42 }
 0x539   : > { %3345 = vtanh.f32 %v2148_v58 }
 0x546   : > { %v3346_v4 = vpop.eup %3345 }
 0x547   : > { %v2151_v5 = vmul.f32 %v3346_v4, %v2150_v63 }
 0x549   : > { %v2153_v9 = vadd.f32 %v2152_v7, %v2151_v5 }
 0x54b   : > { %v2163_v14 = vmul.f32 %v2161_v11, %v2153_v9 }
 0x54d   : > { %v2171_v21 = vadd.f32 %v2170_v15, %v2163_v14  ;;  %2885 = vst [vmem:[%s2618_s27 + $0x20] sm:$0xff] %v2163_v14 }
 0x54f   : > { %v2183_v22 = vpack.c.bf16 %v2171_v21, %v2171_v21  ;;  %v2463_v19 = vmul.f32 %v2461_v18, %v2171_v21 }
 0x551   : > { %2377 = vmatmul.mubr.bf16.vlgmr.msra.gmra.mxu0 %v2183_v22  ;;  %3134 = vmatmul.mubr.bf16.vlgmr.msra.gmra.mxu1 %v2183_v22 }
 0x611   : > { %v2378_v24 = vpop.f32.mrf.mxu0  ;;  %v2419_v25 = vpop.f32.mrf.mxu1 }
 0x612   : > { %v2425_v26 = vadd.f32 %v2887_v23, %v2378_v24  ;;  %v2439_v42 = vadd.f32 %v3719_v50, %v2419_v25 }
 0x613   : > { %v2380_v27 = vpop.f32.mrf.mxu0  ;;  %v3135_v28 = vpop.f32.mrf.mxu1 }
 0x614   : > { %v2914_v29 = vmul.f32 -1.442695, %v2425_v26  ;;  %v2432_v38 = vadd.f32 %v2888_v34, %v2380_v27 }
 0x615   : > { %v2382_v30 = vpop.f32.mrf.mxu0  ;;  %v2422_v31 = vpop.f32.mrf.mxu1 }
 0x616   : > { %3347 = vpow2.f32 %v2914_v29  ;;  %v2915_v39 = vmul.f32 -1.442695, %v2432_v38 }
 0x617   : > { %v2383_v36 = vpop.f32.mrf.mxu0  ;;  %v3136_v37 = vpop.f32.mrf.mxu1 }
 0x618   : > { %3349 = vpow2.f32 %v2915_v39 }
 0x623   : > { %v3348_v40 = vpop.eup %3347 }
 0x624   : > { %v2429_v32 = vadd.f32 1.0, %v3348_v40 }
 0x625   : > { %v3350_v41 = vpop.eup %3349 }
 0x626   : > { %3351 = vrcp.f32 %v2429_v32  ;;  %v2436_v33 = vadd.f32 1.0, %v3350_v41 }
 0x628   : > { %3353 = vrcp.f32 %v2436_v33 }
 0x633   : > { %v3352_v43 = vpop.eup %3351 }
 0x634   : > { %v2440_v1 = vmul.f32 %v3352_v43, %v2439_v42 }
 0x635   : > { %v3354_v59 = vpop.eup %3353 }
 0x636   : > { %v2441_v56 = vadd.f32 %v2889_v52, %v2440_v1  ;;  %v2443_v61 = vsub.f32 1.0, %v3354_v59  ;;  %v2445_v8 = vmul.f32 %v3354_v59, %v2171_v21 }
 0x638   : > { %3355 = vtanh.f32 %v2441_v56 }
 0x645   : > { %v3356_v2 = vpop.eup %3355 }
 0x646   : > { %v2444_v6 = vmul.f32 %v3356_v2, %v2443_v61 }
 0x648   : > { %v2446_v13 = vadd.f32 %v2445_v8, %v2444_v6 }
 0x64a   : > { %v2456_v46 = vmul.f32 %v2454_v16, %v2446_v13  ;;  %2479 = sbr.rel (!%p3454_p4) target bundleno = 1623 (0x657), region = 52 }
 0x64c   : > { %v2464_v50 = vadd.f32 %v2463_v19, %v2456_v46  ;;  %2918 = vst [vmem:[%s2626_s29 + $0x28] sm:$0xff] %v2456_v46 }
 0x64e   : > { %2468 = vst [vmem:[%s378_s18] sm:$0xff] %v2464_v50 }
 0x653   : > { %v2520_v47 = vld [vmem:[%s3725_s22] sm:$0xff]  ;;  %v2522_v54 = vld [vmem:[%s3725_s22 + $0x8] sm:$0xff]  ;;  %v2524_v57 = vld [vmem:[%s3725_s22 + $0x10] sm:$0xff] }
 0x654   : > { %2521 = vst [vmem:[%s2481_s16] sm:$0xff] %v2520_v47  ;;  %2523 = vst [vmem:[%s2481_s16 + $0x10] sm:$0xff] %v2522_v54  ;;  %v2526_v44 = vld [vmem:[%s3725_s22 + $0x18] sm:$0xff]  ;;  %v2528_v45 = vld [vmem:[%s3725_s22 + $0x20] sm:$0xff] }
 0x655   : > { %2525 = vst [vmem:[%s2481_s16 + $0x20] sm:$0xff] %v2524_v57  ;;  %v2530_v35 = vld [vmem:[%s3725_s22 + $0x28] sm:$0xff]  ;;  %2527 = vst [vmem:[%s2481_s16 + $0x30] sm:$0xff] %v2526_v44 }
 0x656   : > { %2529 = vst [vmem:[%s2481_s16 + $0x40] sm:$0xff] %v2528_v45  ;;  %2531 = vst [vmem:[%s2481_s16 + $0x50] sm:$0xff] %v2530_v35 }
 0x657 PF: > { %p16_p8 = scmp.ge.s32.totalorder %s3444_s9, 4   ;;  %s4002_s27 = smov %s3375_s28 }
 0x658   : > { %s4003_s28 = smov %s3452_s12  ;;  %s4004_s29 = smov %s3444_s9 }
 0x659   :  { %18 = sbr.rel (!%p16_p8) target bundleno = 2 (0x2), region = 152 }

// kernel: encoder_rnn_forward.3
= control target key start
LH: loop header
LB: loop body
LE: loop exit
PB: predicated region body
PF: predicated region fallthrough
CT: control target
= control target key end

     0   :  { %s3650_s27 = smov 0   ;;  %s3652_s28 = smov 0   ;;  %s4243_s0 = inlined_call_operand.vmem [shape: f32[6,8,256], index: 0, kind: input, shape index: {}]   ;;  %s4244_s1 = inlined_call_operand.vmem [shape: s32[8,1], index: 1, kind: input, shape index: {}]   ;;  %s4245_s2 = inlined_call_operand.vmem [shape: f32[2,8,128], index: 2, kind: input, shape index: {}]   ;;  %s4246_s3 = inlined_call_operand.vmem [shape: bf16[2,256,384], index: 3, kind: input, shape index: {}]   ;;  %s4247_s4 = inlined_call_operand.vmem [shape: bf16[2,128,384], index: 4, kind: input, shape index: {}]   ;;  %s4248_s5 = inlined_call_operand.vmem [shape: f32[2,1,384], index: 5, kind: input, shape index: {}]   ;;  %s4249_s6 = inlined_call_operand.vmem [shape: f32[2,1,128], index: 6, kind: input, shape index: {}]   ;;  %s4250_s7 = inlined_call_operand.vmem [shape: f32[6,8,256], index: 7, kind: output, shape index: {0}]   ;;  %s4251_s8 = inlined_call_operand.vmem [shape: f32[2,8,128], index: 8, kind: output, shape index: {1}]  }
   0x1   :  { %s3654_s29 = smov 0  }
   0x2 LB: > { %s3663_s30 = sadd.s32 4294967295, %s3600_s29   ;;  %s3665_s9 = sadd.s32 1, %s3600_s29   ;;  %s3600_s29 = sphi %s3654_s29, %s4255_s29   ;;  %s3596_s28 = sphi %s3652_s28, %s4254_s28   ;;  %s3592_s27 = sphi %s3650_s27, %s4253_s27  }
   0x3   : > { %s195_s10 = ssub.s32 %s3600_s29, %s3665_s9  ;;  %s198_s11 = sadd.s32 1, %s3596_s28 }
   0x4   : > { %p196_p0 = scmp.eq.s32.totalorder %s195_s10, 0  ;;  %p208_p1 = scmp.ne.s32.totalorder %s3596_s28, %s3592_s27 }
   0x5   : > { %p209_p2 = scmp.eq.s32.totalorder %s3663_s30, 1  ;;  %p2868_p3 = scmp.ge.s32.totalorder %s3600_s29, 1 }
   0x6   : > { %s3673_s12 = scalar_select %p196_p0, %s3596_s28, %s198_s11  }
   0x7   : > { %p3675_p4 = por %p209_p2, %p208_p1  ;;  %p301_p5 = scmp.lt.s32.totalorder %s3600_s29, 3 }
   0x9   : > { %p302_p6 = pnand %p2868_p3, %p301_p5 }
   0xa   : > { %p354_p7 = scmp.lt.s32.totalorder (!%p302_p6), %s3663_s30, 1  ;;  %s876_s18 = smul.u32 (!%p302_p6), 5, %s3663_s30 }
   0xb   : > { %305 = sbr.rel (%p302_p6) target bundleno = 1655 (0x677), region = 48  ;;  %s1467_s20 = sadd.s32 (!%p302_p6), 2, %s3663_s30 }
   0xc   : > { %s3707_s29 = ssub.s32 (!%p302_p6), 3, %s3663_s30  ;;  %s2051_s10 = smul.u32 (!%p302_p6), 4294967293, %s3663_s30 }
   0xd   : > { %s2344_s14 = smul.u32 (!%p302_p6), 4294967291, %s3663_s30 }
   0xe   : > { %s2052_s11 = sadd.s32 (!%p302_p6), 4, %s2051_s10  ;;  %s1174_s16 = smul.u32 (!%p302_p6), 3, %s3663_s30 }
   0xf   : > { %s2345_s15 = sadd.s32 (!%p302_p6), 5, %s2344_s14  ;;  %s3115_s10 = smul.u32 (!%p302_p6), 120, %s3663_s30 }
  0x10   : > { %v381_v0 = vld [vmem:[%s4243_s0 + $0x8] sm:$0xff]  ;;  %v383_v1 = vld [vmem:[%s4243_s0 + $0x18] sm:$0xff]  ;;  %v3602_v3 = vmov 0   ;;  %s3690_s19 = scalar_select %p354_p7, %s3663_s30, 1  ;;  %v1153_v4 = vstv %s876_s18  ;;  %v3697_v5 = vld [vmem:[%s4244_s1] sm:$0xff]  ;;  %v3603_v6 = vmov 0.0  }
  0x11   : > { %v393_v2 = vpack.c.bf16 %v383_v1, %v381_v0  ;;  %3356 = vset.pattern.permute.xlu0 %v3602_v3  ;;  %3357 = vset.pattern.permute.xlu1 %v3602_v3  ;;  %vm1154_vm0 = vcmp.gt.s32.totalorder %v3697_v5, %v1153_v4  ;;  %v1738_v8 = vstv %s1467_s20  ;;  %v2030_v13 = vstv %s3707_s29  ;;  %s1175_s17 = sadd.s32 1, %s1174_s16  ;;  %v380_v57 = vld [vmem:[%s4243_s0] sm:$0xff]  ;;  %v382_v58 = vld [vmem:[%s4243_s0 + $0x10] sm:$0xff]  ;;  %s879_s14 = scalar_lea.vmem [#allocation2], %s3115_s10 }
  0x12   : > { %s3326_s21 = smul.u32 384, %s3690_s19  ;;  %v2950_v7 = vsel %vm1154_vm0, 1.0, %v3603_v6  ;;  %vm1739_vm1 = vcmp.gt.s32.totalorder %v3697_v5, %v1738_v8  ;;  %vm2031_vm2 = vcmp.gt.s32.totalorder %v3697_v5, %v2030_v13  ;;  %v2323_v24 = vstv %s2052_s11  ;;  %v385_v60 = vld [vmem:[%s4243_s0 + $0x28] sm:$0xff]  ;;  %v387_v63 = vld [vmem:[%s4243_s0 + $0x38] sm:$0xff]  ;;  %s2869_s11 = sshll.u32 %s3690_s19, 3 }
  0x13   : > { %830 = vmatprep.mubr.bf16.mxu1 %v393_v2  ;;  %767 = vmatprep.mubr.bf16.mxu0 %v393_v2  ;;  %v1163_v10 = vsub.f32 1.0, %v2950_v7  ;;  %v3717_v16 = vsel %vm1739_vm1, 1.0, %v3603_v6  ;;  %v3725_v19 = vsel %vm2031_vm2, 1.0, %v3603_v6  ;;  %vm2324_vm3 = vcmp.gt.s32.totalorder %v3697_v5, %v2323_v24  ;;  %s3327_s18 = smul.u32 192, %s3690_s19  ;;  %s357_s20 = scalar_lea.vmem %s4245_s2, %s2869_s11 }
  0x14   : > { %s3703_s26 = scalar_lea.vmem %s4246_s3, %s3326_s21  ;;  %1159 = vperm.xlu0 %3356, %v2950_v7   ;;  %v3737_v27 = vsel %vm2324_vm3, 1.0, %v3603_v6  ;;  %v2616_v34 = vstv %s2345_s15  ;;  %v1446_v38 = vstv %s1175_s17  ;;  %v1748_v47 = vsub.f32 1.0, %v3717_v16  ;;  %s3328_s21 = smul.u32 3, %s3690_s19 }
  0x15   : > { %v3358_v9 = vld [vmem:[%s3703_s26 + $0xac] ss:$12 sps:$4 sm:$0xff]   ;;  %v3360_v11 = vld [vmem:[%s3703_s26 + $0xa8] ss:$12 sps:$4 sm:$0xff]   ;;  %v3363_v14 = vld [vmem:[%s3703_s26 + $0x90] ss:$12 sps:$4 sm:$0xff]   ;;  %vm2617_vm4 = vcmp.gt.s32.totalorder %v3697_v5, %v2616_v34  ;;  %vm1447_vm5 = vcmp.gt.s32.totalorder %v3697_v5, %v1446_v38  ;;  %s3775_s22 = scalar_lea.vmem %s4247_s4, %s3327_s18  ;;  %v3798_v4 = vpack.c.bf16 %v382_v58, %v380_v57  ;;  %v3803_v7 = vpack.c.bf16 %v387_v63, %v385_v60  ;;  %s374_s17 = scalar_lea.vmem %s4249_s6, %s3690_s19 }
  0x16   : > { %735 = vmatprep.subr.bf16.mxu0 %v3358_v9  ;;  %v3361_v12 = vld [vmem:[%s3703_s26 + $0x94] ss:$12 sps:$4 sm:$0xff]   ;;  %v3364_v15 = vld [vmem:[%s3703_s26 + $0x7c] ss:$12 sps:$4 sm:$0xff]   ;;  %v3366_v17 = vld [vmem:[%s3703_s26 + $0x78] ss:$12 sps:$4 sm:$0xff]   ;;  %s371_s25 = scalar_lea.vmem %s4248_s5, %s3328_s21 }
  0x17   : > { %736 = vmatpush1.bf16.msra.mxu0 %v3360_v11  ;;  %v3367_v18 = vld [vmem:[%s3703_s26 + $0x64] ss:$12 sps:$4 sm:$0xff]   ;;  %v3369_v21 = vld [vmem:[%s3703_s26 + $0x60] ss:$12 sps:$4 sm:$0xff]   ;;  %v3372_v28 = vld [vmem:[%s3703_s26 + $0x48] ss:$12 sps:$4 sm:$0xff]  }
  0x18   : > { %737 = vmatprep.subr.bf16.mxu0 %v3361_v12  ;;  %1166 = vperm.xlu0 %3356, %v1163_v10   ;;  %v3378_v20 = vld [vmem:[%s3703_s26 + $0x170] ss:$12 sps:$4 sm:$0xff]   ;;  %v3370_v23 = vld [vmem:[%s3703_s26 + $0x4c] ss:$12 sps:$4 sm:$0xff]   ;;  %v3373_v29 = vld [vmem:[%s3703_s26 + $0x34] ss:$12 sps:$4 sm:$0xff]  }
  0x19   : > { %3117 = vmatprep.subr.bf16.mxu1 %v3378_v20  ;;  %v3380_v22 = vld [vmem:[%s3703_s26 + $0xb0] ss:$12 sps:$4 sm:$0xff]   ;;  %v3383_v25 = vld [vmem:[%s3703_s26 + $0x158] ss:$12 sps:$4 sm:$0xff]   ;;  %v3388_v30 = vld [vmem:[%s3703_s26 + $0x140] ss:$12 sps:$4 sm:$0xff]  }
  0x1a   : > { %3118 = vmatpush3.bf16.msra.mxu1 %v3380_v22  ;;  %v3385_v26 = vld [vmem:[%s3703_s26 + $0x98] ss:$12 sps:$4 sm:$0xff]   ;;  %v3390_v31 = vld [vmem:[%s3703_s26 + $0x80] ss:$12 sps:$4 sm:$0xff]   ;;  %v3375_v32 = vld [vmem:[%s3703_s26 + $0x30] ss:$12 sps:$4 sm:$0xff]  }
  0x1b   : > { %738 = vmatpush1.bf16.msra.mxu0 %v3363_v14  ;;  %3119 = vmatprep.subr.bf16.mxu1 %v3383_v25  ;;  %v3393_v33 = vld [vmem:[%s3703_s26 + $0x128] ss:$12 sps:$4 sm:$0xff]   ;;  %v3751_v37 = vsel %vm2617_vm4, 1.0, %v3603_v6  ;;  %v3379_v39 = vld [vmem:[%s3703_s26 + $0x18] ss:$12 sps:$4 sm:$0xff]   ;;  %v2982_v43 = vsel %vm1447_vm5, 1.0, %v3603_v6 }
  0x1c   : > { %739 = vmatprep.subr.bf16.mxu0 %v3364_v15  ;;  %1744 = vperm.xlu0 %3356, %v3717_v16   ;;  %v3376_v35 = vld [vmem:[%s3703_s26 + $0x1c] ss:$12 sps:$4 sm:$0xff]   ;;  %v3381_v41 = vld [vmem:[%s3703_s26 + $0x4] ss:$12 sps:$4 sm:$0xff]   ;;  %v3384_v45 = vld [vmem:[%s3703_s26] ss:$12 sps:$4 sm:$0xff]  }
  0x1d   : > { %v3395_v36 = vld [vmem:[%s3703_s26 + $0x68] ss:$12 sps:$4 sm:$0xff]   ;;  %v3398_v40 = vld [vmem:[%s3703_s26 + $0x110] ss:$12 sps:$4 sm:$0xff]   ;;  %v3403_v44 = vld [vmem:[%s3703_s26 + $0xf8] ss:$12 sps:$4 sm:$0xff]   ;;  %1452 = vperm.xlu1 %3357, %v2982_v43  }
  0x1e   : > { %3120 = vmatpush3.bf16.msra.mxu1 %v3385_v26  ;;  %v3400_v42 = vld [vmem:[%s3703_s26 + $0x50] ss:$12 sps:$4 sm:$0xff]   ;;  %v3386_v46 = vld [vmem:[%s3703_s26 + $0x16c] ss:$12 sps:$4 sm:$0xff]   ;;  %v1456_v48 = vsub.f32 1.0, %v2982_v43  ;;  %v2040_v55 = vsub.f32 1.0, %v3725_v19 }
  0x1f   : > { %740 = vmatpush1.bf16.msra.mxu0 %v3366_v17  ;;  %3121 = vmatprep.subr.bf16.mxu1 %v3388_v30  ;;  %v3405_v49 = vld [vmem:[%s3703_s26 + $0x38] ss:$12 sps:$4 sm:$0xff]   ;;  %v3408_v50 = vld [vmem:[%s3703_s26 + $0xe0] ss:$12 sps:$4 sm:$0xff]   ;;  %v3389_v51 = vld [vmem:[%s3703_s26 + $0x168] ss:$12 sps:$4 sm:$0xff]  }
  0x20   : > { %741 = vmatprep.subr.bf16.mxu0 %v3367_v18  ;;  %2036 = vperm.xlu0 %3356, %v3725_v19   ;;  %v3391_v52 = vld [vmem:[%s3703_s26 + $0x154] ss:$12 sps:$4 sm:$0xff]   ;;  %v3394_v56 = vld [vmem:[%s3703_s26 + $0x150] ss:$12 sps:$4 sm:$0xff]   ;;  %v3790_v62 = vld [vmem:[%s3775_s22 + $0xac] ss:$12 sps:$4 sm:$0xff]  }
  0x21   : > { %1459 = vperm.xlu1 %3357, %v1456_v48   ;;  %v3410_v53 = vld [vmem:[%s3703_s26 + $0x20] ss:$12 sps:$4 sm:$0xff]   ;;  %v3413_v54 = vld [vmem:[%s3703_s26 + $0xc8] ss:$12 sps:$4 sm:$0xff]   ;;  %v2333_v0 = vsub.f32 1.0, %v3737_v27  ;;  %v2626_v9 = vsub.f32 1.0, %v3751_v37 }
  0x22   : > { %3122 = vmatpush3.bf16.msra.mxu1 %v3390_v31  ;;  %v3396_v59 = vld [vmem:[%s3703_s26 + $0x13c] ss:$12 sps:$4 sm:$0xff]   ;;  %v3399_v1 = vld [vmem:[%s3703_s26 + $0x138] ss:$12 sps:$4 sm:$0xff]   ;;  %v3807_v8 = vld [vmem:[%s3775_s22 + $0x94] ss:$12 sps:$4 sm:$0xff]  }
  0x23   : > { %742 = vmatpush1.bf16.msra.mxu0 %v3369_v21  ;;  %3123 = vmatprep.subr.bf16.mxu1 %v3393_v33  ;;  %v3415_v61 = vld [vmem:[%s3703_s26 + $0x8] ss:$12 sps:$4 sm:$0xff]   ;;  %v3401_v2 = vld [vmem:[%s3703_s26 + $0x124] ss:$12 sps:$4 sm:$0xff]   ;;  %v3404_v10 = vld [vmem:[%s3703_s26 + $0x120] ss:$12 sps:$4 sm:$0xff]  }
  0x24   : > { %743 = vmatprep.subr.bf16.mxu0 %v3370_v23  ;;  %2329 = vperm.xlu0 %3356, %v3737_v27   ;;  %v3801_v5 = vld [vmem:[%s3775_s22 + $0xa8] ss:$12 sps:$4 sm:$0xff]   ;;  %v384_v11 = vld [vmem:[%s4243_s0 + $0x20] sm:$0xff]  ;;  %v3406_v13 = vld [vmem:[%s3703_s26 + $0x10c] ss:$12 sps:$4 sm:$0xff]   ;;  %vm3604_vm6 = vmmov 0  }
  0x25   : > { %1751 = vperm.xlu1 %3357, %v1748_v47   ;;  %v386_v12 = vld [vmem:[%s4243_s0 + $0x30] sm:$0xff]  ;;  %v389_v14 = vld [vmem:[%s4243_s0 + $0x48] sm:$0xff]  ;;  %v391_v17 = vld [vmem:[%s4243_s0 + $0x58] sm:$0xff]  ;;  %s3015_s15 = sshll.u32 %s3663_s30, 3 }
  0x26   : > { %3124 = vmatpush3.bf16.msra.mxu1 %v3395_v36  ;;  %v3824_v15 = vld [vmem:[%s3775_s22 + $0x90] ss:$12 sps:$4 sm:$0xff]   ;;  %v3409_v18 = vld [vmem:[%s3703_s26 + $0x108] ss:$12 sps:$4 sm:$0xff]   ;;  %v394_v20 = vpack.c.bf16 %v386_v12, %v384_v11  ;;  %v3839_v21 = vld [vmem:[%s3775_s22 + $0x78] ss:$12 sps:$4 sm:$0xff]   ;;  %v397_v22 = vpack.c.bf16 %v391_v17, %v389_v14  ;;  %s2650_s19 = scalar_lea.vmem (%p3675_p4), %s4250_s7, %s3015_s15 }
  0x27   : > { %744 = vmatpush1.bf16.msra.mxu0 %v3372_v28  ;;  %3125 = vmatprep.subr.bf16.mxu1 %v3398_v40  ;;  %v3829_v16 = vld [vmem:[%s3775_s22 + $0x7c] ss:$12 sps:$4 sm:$0xff]   ;;  %v3411_v19 = vld [vmem:[%s3703_s26 + $0xf4] ss:$12 sps:$4 sm:$0xff]   ;;  %v3843_v23 = vld [vmem:[%s3775_s22 + $0x64] ss:$12 sps:$4 sm:$0xff]  }
  0x28   : > { %745 = vmatprep.subr.bf16.mxu0 %v3373_v29  ;;  %2622 = vperm.xlu0 %3356, %v3751_v37   ;;  %v3414_v24 = vld [vmem:[%s3703_s26 + $0xf0] ss:$12 sps:$4 sm:$0xff]   ;;  %v388_v25 = vld [vmem:[%s4243_s0 + $0x40] sm:$0xff]  ;;  %v3861_v31 = vld [vmem:[%s3775_s22 + $0x4c] ss:$12 sps:$4 sm:$0xff]  }
  0x29   : > { %2043 = vperm.xlu1 %3357, %v2040_v55   ;;  %v390_v26 = vld [vmem:[%s4243_s0 + $0x50] sm:$0xff]  ;;  %v3416_v27 = vld [vmem:[%s3703_s26 + $0xdc] ss:$12 sps:$4 sm:$0xff]   ;;  %v3418_v28 = vld [vmem:[%s3703_s26 + $0xd8] ss:$12 sps:$4 sm:$0xff]  }
  0x2a   : > { %3126 = vmatpush3.bf16.msra.mxu1 %v3400_v42  ;;  %v3856_v29 = vld [vmem:[%s3775_s22 + $0x60] ss:$12 sps:$4 sm:$0xff]   ;;  %v3422_v30 = vld [vmem:[%s3703_s26 + $0xc4] ss:$12 sps:$4 sm:$0xff]   ;;  %v396_v33 = vpack.c.bf16 %v390_v26, %v388_v25  ;;  %v3876_v37 = vld [vmem:[%s3775_s22 + $0x1c] ss:$12 sps:$4 sm:$0xff]  }
  0x2b   : > { %746 = vmatpush1.bf16.msra.mxu0 %v3375_v32  ;;  %3127 = vmatprep.subr.bf16.mxu1 %v3403_v44  ;;  %v3864_v32 = vld [vmem:[%s3775_s22 + $0x48] ss:$12 sps:$4 sm:$0xff]   ;;  %v3873_v36 = vld [vmem:[%s3775_s22 + $0x30] ss:$12 sps:$4 sm:$0xff]   ;;  %v3900_v42 = vld [vmem:[%s3775_s22] ss:$12 sps:$4 sm:$0xff]  }
  0x2c   : > { %747 = vmatprep.subr.bf16.mxu0 %v3376_v35  ;;  %v3867_v34 = vld [vmem:[%s3775_s22 + $0x34] ss:$12 sps:$4 sm:$0xff]   ;;  %v3446_v38 = vld [vmem:[%s3775_s22 + $0xb0] ss:$12 sps:$4 sm:$0xff]   ;;  %v3451_v48 = vld [vmem:[%s3775_s22 + $0x38] ss:$12 sps:$4 sm:$0xff]  }
  0x2d   : > { %2336 = vperm.xlu1 %3357, %v2333_v0   ;;  %v3424_v35 = vld [vmem:[%s3703_s26 + $0xc0] ss:$12 sps:$4 sm:$0xff]   ;;  %v3886_v40 = vld [vmem:[%s3775_s22 + $0x4] ss:$12 sps:$4 sm:$0xff]   ;;  %v3461_v58 = vld [vmem:[%s3775_s22 + $0x8] ss:$12 sps:$4 sm:$0xff]  }
  0x2e   : > { %3128 = vmatpush3.bf16.msra.mxu1 %v3405_v49  ;;  %v3902_v43 = vld [vmem:[%s357_s20] sm:$0xff]  ;;  %v3450_v47 = vld [vmem:[%s3775_s22 + $0x50] ss:$12 sps:$4 sm:$0xff]   ;;  %s345_s26 = sand.u32 1, %s3592_s27   ;;  %s2951_s20 = smul.u32 40, %s3663_s30 }
  0x2f   : > { %748 = vmatpush1.bf16.msra.mxu0 %v3379_v39  ;;  %3129 = vmatprep.subr.bf16.mxu1 %v3408_v50  ;;  %v3883_v39 = vld [vmem:[%s3775_s22 + $0x18] ss:$12 sps:$4 sm:$0xff]   ;;  %v3448_v44 = vld [vmem:[%s3775_s22 + $0x80] ss:$12 sps:$4 sm:$0xff]   ;;  %v3453_v50 = vld [vmem:[%s3775_s22 + $0x8] ss:$12 sps:$4 sm:$0xff]  }
  0x30   : > { %749 = vmatprep.subr.bf16.mxu0 %v3381_v41  ;;  %v3447_v41 = vld [vmem:[%s3775_s22 + $0x98] ss:$12 sps:$4 sm:$0xff]   ;;  %v3452_v49 = vld [vmem:[%s3775_s22 + $0x20] ss:$12 sps:$4 sm:$0xff]   ;;  %v3458_v55 = vld [vmem:[%s3775_s22 + $0x50] ss:$12 sps:$4 sm:$0xff]  }
  0x31   : > { %2629 = vperm.xlu1 %3357, %v2626_v9   ;;  %v3460_v57 = vld [vmem:[%s3775_s22 + $0x20] ss:$12 sps:$4 sm:$0xff]   ;;  %s3325_s18 = smul.u32 48, %s345_s26 }
  0x32   : > { %3130 = vmatpush3.bf16.msra.mxu1 %v3410_v53  ;;  %v3456_v53 = vld [vmem:[%s3775_s22 + $0x80] ss:$12 sps:$4 sm:$0xff]   ;;  %s2952_s27 = smul.u32 72, %s3663_s30 }
  0x33   : > { %750 = vmatpush1.bf16.msra.mxu0 %v3384_v45  ;;  %3131 = vmatprep.subr.bf16.mxu1 %v3413_v54  ;;  %v883_v45 = vpack.c.bf16 %v3902_v43, %v3902_v43  ;;  %v3457_v54 = vld [vmem:[%s3775_s22 + $0x68] ss:$12 sps:$4 sm:$0xff]   ;;  %s3976_s21 = scalar_lea.vmem [#allocation3], %s3325_s18  ;;  %s3045_s18 = sshll.u32 %s3707_s29, 3 }
  0x34   : > { %751 = vmatprep.subr.bf16.mxu0 %v3386_v46  ;;  %v3449_v46 = vld [vmem:[%s3775_s22 + $0x68] ss:$12 sps:$4 sm:$0xff]   ;;  %s1172_s23 = scalar_lea.vmem %s3976_s21, %s2951_s20 [#allocation3]  ;;  %s2765_s24 = scalar_lea.vmem [#allocation2], %s2952_s27 }
  0x35   : > { %s2775_s16 = scalar_lea.vmem %s3976_s21, %s3015_s15 [#allocation3]  ;;  %s2049_s20 = scalar_lea.vmem %s3976_s21, %s3045_s18 [#allocation3] }
  0x36   : > { %3132 = vmatpush3.bf16.msra.mxu1 %v3415_v61 }
  0x37   : > { %752 = vmatpush2.bf16.msra.mxu0 %v3389_v51  ;;  %1044 = vmatprep.subr.bf16.mxu1 %v3790_v62  ;;  %v3454_v51 = vld [vmem:[%s3775_s22 + $0xb0] ss:$12 sps:$4 sm:$0xff]  }
  0x38   : > { %753 = vmatprep.subr.bf16.mxu0 %v3391_v52  ;;  %v3455_v52 = vld [vmem:[%s3775_s22 + $0x98] ss:$12 sps:$4 sm:$0xff]  }
  0x39   : > { %831 = vmatmul.mubr.bf16.vlgmr.msra.gmra.mxu1 %v3798_v4 }
  0x3a   : > { %1045 = vmatpush1.bf16.msra.mxu1 %v3801_v5  ;;  %838 = vmatprep.mubr.bf16.mxu1 %v3803_v7 }
  0x3b   : > { %754 = vmatpush2.bf16.msra.mxu0 %v3394_v56  ;;  %1046 = vmatprep.subr.bf16.mxu1 %v3807_v8  ;;  %v3459_v56 = vld [vmem:[%s3775_s22 + $0x38] ss:$12 sps:$4 sm:$0xff]  }
  0x3c   : > { %755 = vmatprep.subr.bf16.mxu0 %v3396_v59  ;;  %v464_v59 = vlaneseq }
  0x3e   : > { %1047 = vmatpush1.bf16.msra.mxu1 %v3824_v15  ;;  %v465_v60 = vshrl.u32 %v464_v59, 7 }
  0x3f   : > { %756 = vmatpush2.bf16.msra.mxu0 %v3399_v1  ;;  %1048 = vmatprep.subr.bf16.mxu1 %v3829_v16 }
  0x40   : > { %757 = vmatprep.subr.bf16.mxu0 %v3401_v2  ;;  %v474_v61 = vsub.s32 2, %v465_v60  ;;  %v470_v25 = vsub.s32 1, %v465_v60 }
  0x41   : > { %839 = vmatmul.mubr.bf16.gmra.mxu1 %v394_v20 }
  0x42   : > { %1049 = vmatpush1.bf16.msra.mxu1 %v3839_v21  ;;  %846 = vmatprep.mubr.bf16.mxu1 %v397_v22 }
  0x43   : > { %758 = vmatpush2.bf16.msra.mxu0 %v3404_v10  ;;  %1050 = vmatprep.subr.bf16.mxu1 %v3843_v23 }
  0x44   : > { %759 = vmatprep.subr.bf16.mxu0 %v3406_v13 }
  0x46   : > { %1051 = vmatpush1.bf16.msra.mxu1 %v3856_v29 }
  0x47   : > { %760 = vmatpush2.bf16.msra.mxu0 %v3409_v18  ;;  %1052 = vmatprep.subr.bf16.mxu1 %v3861_v31 }
  0x48   : > { %761 = vmatprep.subr.bf16.mxu0 %v3411_v19 }
  0x49   : > { %847 = vmatmul.mubr.bf16.gmra.mxu1 %v396_v33 }
  0x4a   : > { %1053 = vmatpush1.bf16.msra.mxu1 %v3864_v32  ;;  %1076 = vmatprep.mubr.bf16.mxu1 %v3602_v3 }
  0x4b   : > { %762 = vmatpush2.bf16.msra.mxu0 %v3414_v24  ;;  %1054 = vmatprep.subr.bf16.mxu1 %v3867_v34 }
  0x4c   : > { %763 = vmatprep.subr.bf16.mxu0 %v3416_v27 }
  0x4e   : > { %1055 = vmatpush1.bf16.msra.mxu1 %v3873_v36 }
  0x4f   : > { %764 = vmatpush2.bf16.msra.mxu0 %v3418_v28  ;;  %1056 = vmatprep.subr.bf16.mxu1 %v3876_v37 }
  0x50   : > { %765 = vmatprep.subr.bf16.mxu0 %v3422_v30 }
  0x52   : > { %1057 = vmatpush1.bf16.msra.mxu1 %v3883_v39 }
  0x53   : > { %766 = vmatpush2.bf16.msra.mxu0 %v3424_v35  ;;  %1058 = vmatprep.subr.bf16.mxu1 %v3886_v40 }
  0x54   : > { %3205 = vmatprep.subr.bf16.mxu0 %v3603_v6 }
  0x56   : > { %768 = vmatmul.mubr.bf16.vlgmr.msra.gmra.mxu0 %v3798_v4  ;;  %1059 = vmatpush1.bf16.msra.mxu1 %v3900_v42 }
  0x57   : > { %777 = vmatprep.mubr.bf16.mxu0 %v3803_v7  ;;  %3206 = vmatpush3.bf16.msra.mxu0 %v3446_v38 }
  0x58   : > { %3207 = vmatprep.subr.bf16.mxu0 %v3603_v6  ;;  %1343 = vmatprep.subr.bf16.mxu1 %v3790_v62 }
  0x59   : > { %1077 = vmatmul.mubr.bf16.vlgmr.msra.gmra.mxu1 %v883_v45 }
  0x5a   : > { %1344 = vmatpush1.bf16.msra.mxu1 %v3801_v5  ;;  %1375 = vmatprep.mubr.bf16.mxu1 %v3602_v3 }
  0x5b   : > { %3208 = vmatpush3.bf16.msra.mxu0 %v3447_v41  ;;  %1345 = vmatprep.subr.bf16.mxu1 %v3807_v8 }
  0x5c   : > { %3209 = vmatprep.subr.bf16.mxu0 %v3603_v6 }
  0x5e   : > { %778 = vmatmul.mubr.bf16.gmra.mxu0 %v394_v20  ;;  %1346 = vmatpush1.bf16.msra.mxu1 %v3824_v15  ;;  %v466_v20 = vsub.s32 0, %v465_v60 }
  0x5f   : > { %787 = vmatprep.mubr.bf16.mxu0 %v397_v22  ;;  %3210 = vmatpush3.bf16.msra.mxu0 %v3448_v44 }
  0x60   : > { %3211 = vmatprep.subr.bf16.mxu0 %v3603_v6  ;;  %1347 = vmatprep.subr.bf16.mxu1 %v3829_v16 }
  0x62   : > { %1348 = vmatpush1.bf16.msra.mxu1 %v3839_v21 }
  0x63   : > { %3212 = vmatpush3.bf16.msra.mxu0 %v3449_v46  ;;  %1349 = vmatprep.subr.bf16.mxu1 %v3843_v23 }
  0x64   : > { %3213 = vmatprep.subr.bf16.mxu0 %v3603_v6 }
  0x66   : > { %788 = vmatmul.mubr.bf16.gmra.mxu0 %v396_v33  ;;  %1350 = vmatpush1.bf16.msra.mxu1 %v3856_v29 }
  0x67   : > { %3214 = vmatpush3.bf16.msra.mxu0 %v3450_v47  ;;  %3221 = vmatprep.mubr.msk.bf16.mxu0 %vm3604_vm6, %v3603_v6 }
  0x68   : > { %3215 = vmatprep.subr.bf16.mxu0 %v3603_v6  ;;  %1351 = vmatprep.subr.bf16.mxu1 %v3861_v31 }
  0x6a   : > { %1352 = vmatpush1.bf16.msra.mxu1 %v3864_v32 }
  0x6b   : > { %3216 = vmatpush3.bf16.msra.mxu0 %v3451_v48  ;;  %1353 = vmatprep.subr.bf16.mxu1 %v3867_v34 }
  0x6c   : > { %3217 = vmatprep.subr.bf16.mxu0 %v3603_v6 }
  0x6e   : > { %1354 = vmatpush1.bf16.msra.mxu1 %v3873_v36 }
  0x6f   : > { %3218 = vmatpush3.bf16.msra.mxu0 %v3452_v49  ;;  %1355 = vmatprep.subr.bf16.mxu1 %v3876_v37 }
  0x70   : > { %3219 = vmatprep.subr.bf16.mxu0 %v3603_v6 }
  0x72   : > { %1356 = vmatpush1.bf16.msra.mxu1 %v3883_v39 }
  0x73   : > { %3220 = vmatpush3.bf16.msra.mxu0 %v3453_v50  ;;  %1357 = vmatprep.subr.bf16.mxu1 %v3886_v40 }
  0x74   : > { %3225 = vmatprep.subr.bf16.mxu0 %v3603_v6 }
  0x76   : > { %3222 = vmatmul.mubr.bf16.vlgmr.msra.gmra.mxu0 %v883_v45  ;;  %1358 = vmatpush1.bf16.msra.mxu1 %v3900_v42 }
  0x77   : > { %3241 = vmatprep.mubr.msk.bf16.mxu0 %vm3604_vm6, %v3603_v6  ;;  %1635 = vmatprep.subr.bf16.mxu1 %v3790_v62  ;;  %v462_v62 = vld [vmem:[%s371_s25] sm:$0x7]  ;;  %s2983_s25 = smul.u32 24, %s3663_s30 }
  0x78   : > { %3226 = vmatpush3.bf16.msra.mxu0 %v3454_v51  ;;  %v475_v0 = vrot.slane %v462_v62, %v474_v61  ;;  %v467_v28 = vrot.slane %v462_v62, %v466_v20  ;;  %v471_v35 = vrot.slane %v462_v62, %v470_v25 }
  0x79   : > { %3227 = vmatprep.subr.bf16.mxu0 %v3603_v6  ;;  %s2769_s10 = scalar_lea.vmem %s3976_s21, %s2983_s25 [#allocation3] }
  0x7c   : > { %3228 = vmatpush3.bf16.msra.mxu0 %v3455_v52 }
  0x7d   : > { %3229 = vmatprep.subr.bf16.mxu0 %v3603_v6 }
  0x80   : > { %3230 = vmatpush3.bf16.msra.mxu0 %v3456_v53 }
  0x81   : > { %3231 = vmatprep.subr.bf16.mxu0 %v3603_v6 }
  0x84   : > { %3232 = vmatpush3.bf16.msra.mxu0 %v3457_v54 }
  0x85   : > { %3233 = vmatprep.subr.bf16.mxu0 %v3603_v6 }
  0x88   : > { %3234 = vmatpush3.bf16.msra.mxu0 %v3458_v55 }
  0x89   : > { %3235 = vmatprep.subr.bf16.mxu0 %v3603_v6 }
  0x8c   : > { %3236 = vmatpush3.bf16.msra.mxu0 %v3459_v56 }
  0x8d   : > { %3237 = vmatprep.subr.bf16.mxu0 %v3603_v6 }
  0x90   : > { %3238 = vmatpush3.bf16.msra.mxu0 %v3460_v57 }
  0x91   : > { %3239 = vmatprep.subr.bf16.mxu0 %v3603_v6 }
  0x94   : > { %3240 = vmatpush3.bf16.msra.mxu0 %v3461_v58 }
  0x95   : > { %3245 = vmatprep.subr.bf16.mxu0 %v3603_v6 }
  0xf9   : > { %v3133_v63 = vpop.f32.mrf.mxu1 }
  0xfb   : > { %v3134_v1 = vpop.f32.mrf.mxu1 }
  0xfc   : > { %v3135_v2 = vadd.f32 %v3134_v1, %v3133_v63 }
  0xfd   : > { %v3136_v4 = vpop.f32.mrf.mxu1 }
  0xfe   : > { %v833_v7 = vadd.f32 %v3135_v2, %v475_v0 }
  0xff   : > { %v3137_v9 = vpop.f32.mrf.mxu1 }
 0x100   : > { %857 = vst [vmem:[#allocation2 + $0x10] sm:$0xff] %v833_v7  ;;  %v3138_v10 = vadd.f32 %v3137_v9, %v3136_v4 }
 0x101   : > { %v3139_v11 = vpop.f32.mrf.mxu1 }
 0x102   : > { %v836_v12 = vadd.f32 %v3138_v10, %v475_v0 }
 0x103   : > { %v3140_v13 = vpop.f32.mrf.mxu1 }
 0x104   : > { %860 = vst [vmem:[#allocation2 + $0x28] sm:$0xff] %v836_v12  ;;  %v3141_v14 = vadd.f32 %v3140_v13, %v3139_v11 }
 0x105   : > { %v3142_v17 = vpop.f32.mrf.mxu1 }
 0x106   : > { %v841_v18 = vadd.f32 %v3141_v14, %v475_v0 }
 0x107   : > { %v3143_v19 = vpop.f32.mrf.mxu1 }
 0x108   : > { %863 = vst [vmem:[#allocation2 + $0x40] sm:$0xff] %v841_v18  ;;  %v3144_v22 = vadd.f32 %v3143_v19, %v3142_v17 }
 0x109   : > { %v3145_v24 = vpop.f32.mrf.mxu1 }
 0x10a   : > { %v844_v26 = vadd.f32 %v3144_v22, %v475_v0 }
 0x10b   : > { %v3146_v27 = vpop.f32.mrf.mxu1 }
 0x10c   : > { %866 = vst [vmem:[#allocation2 + $0x58] sm:$0xff] %v844_v26  ;;  %v3147_v30 = vadd.f32 %v3146_v27, %v3145_v24 }
 0x10d   : > { %v3148_v33 = vpop.f32.mrf.mxu1 }
 0x10e   : > { %v849_v38 = vadd.f32 %v3147_v30, %v475_v0 }
 0x10f   : > { %v3149_v44 = vpop.f32.mrf.mxu1 }
 0x110   : > { %869 = vst [vmem:[#allocation2 + $0x70] sm:$0xff] %v849_v38  ;;  %v3150_v46 = vadd.f32 %v3149_v44, %v3148_v33 }
 0x112   : > { %v852_v49 = vadd.f32 %v3150_v46, %v475_v0 }
 0x114   : > { %872 = vst [vmem:[#allocation2 + $0x88] sm:$0xff] %v852_v49  ;;  %v1160_v49 = vpop.permute.xlu0 %1159 }
 0x116   : > { %v769_v41 = vpop.f32.mrf.mxu0 }
 0x117   : > { %v770_v45 = vadd.f32 %v769_v41, %v467_v28 }
 0x118   : > { %v771_v47 = vpop.f32.mrf.mxu0 }
 0x119   : > { %855 = vst [vmem:[#allocation2] sm:$0xff] %v770_v45  ;;  %v772_v48 = vadd.f32 %v771_v47, %v471_v35  ;;  %v1078_v57 = vpop.f32.mrf.mxu1 }
 0x11a   : > { %v773_v50 = vpop.f32.mrf.mxu0 }
 0x11b   : > { %856 = vst [vmem:[#allocation2 + $0x8] sm:$0xff] %v772_v48  ;;  %v774_v51 = vadd.f32 %v773_v50, %v467_v28  ;;  %v1080_v60 = vpop.f32.mrf.mxu1 }
 0x11c   : > { %v775_v52 = vpop.f32.mrf.mxu0 }
 0x11d   : > { %858 = vst [vmem:[#allocation2 + $0x18] sm:$0xff] %v774_v51  ;;  %v776_v53 = vadd.f32 %v775_v52, %v471_v35  ;;  %v1082_v63 = vpop.f32.mrf.mxu1 }
 0x11e   : > { %v779_v54 = vpop.f32.mrf.mxu0 }
 0x11f   : > { %859 = vst [vmem:[#allocation2 + $0x20] sm:$0xff] %v776_v53  ;;  %v780_v55 = vadd.f32 %v779_v54, %v467_v28  ;;  %v1083_v2 = vpop.f32.mrf.mxu1 }
 0x120   : > { %v781_v56 = vpop.f32.mrf.mxu0 }
 0x121   : > { %861 = vst [vmem:[#allocation2 + $0x30] sm:$0xff] %v780_v55  ;;  %v782_v58 = vadd.f32 %v781_v56, %v471_v35  ;;  %v1167_v55 = vpop.permute.xlu0 %1166 }
 0x122   : > { %v783_v59 = vpop.f32.mrf.mxu0 }
 0x123   : > { %862 = vst [vmem:[#allocation2 + $0x38] sm:$0xff] %v782_v58  ;;  %v784_v61 = vadd.f32 %v783_v59, %v467_v28 }
 0x124   : > { %v785_v62 = vpop.f32.mrf.mxu0 }
 0x125   : > { %864 = vst [vmem:[#allocation2 + $0x48] sm:$0xff] %v784_v61  ;;  %v786_v0 = vadd.f32 %v785_v62, %v471_v35 }
 0x126   : > { %v789_v1 = vpop.f32.mrf.mxu0 }
 0x127   : > { %865 = vst [vmem:[#allocation2 + $0x50] sm:$0xff] %v786_v0  ;;  %v790_v4 = vadd.f32 %v789_v1, %v467_v28 }
 0x128   : > { %v791_v7 = vpop.f32.mrf.mxu0 }
 0x129   : > { %867 = vst [vmem:[#allocation2 + $0x60] sm:$0xff] %v790_v4  ;;  %v792_v9 = vadd.f32 %v791_v7, %v471_v35 }
 0x12a   : > { %v793_v10 = vpop.f32.mrf.mxu0 }
 0x12b   : > { %868 = vst [vmem:[#allocation2 + $0x68] sm:$0xff] %v792_v9  ;;  %v794_v11 = vadd.f32 %v793_v10, %v467_v28 }
 0x12c   : > { %v795_v12 = vpop.f32.mrf.mxu0 }
 0x12d   : > { %870 = vst [vmem:[#allocation2 + $0x78] sm:$0xff] %v794_v11  ;;  %v796_v13 = vadd.f32 %v795_v12, %v471_v35  ;;  %v3970_v35 = vld [vmem:[%s374_s17] ss:$0 sm:$0xff]  ;;  %s3116_s17 = smul.u32 24, %s3707_s29 }
 0x12e   : > { %s3046_s29 = smul.u32 4294967224, %s3663_s30 }
 0x12f   : > { %871 = vst [vmem:[#allocation2 + $0x80] sm:$0xff] %v796_v13  ;;  %s1762_s26 = scalar_lea.vmem [#allocation2], %s3116_s17 }
 0x136   : > { %v880_v14 = vld [vmem:[%s879_s14] sm:$0xff]  ;;  %v1119_v17 = vpop.f32.mrf.mxu0  ;;  %v881_v22 = vld [vmem:[%s879_s14 + $0x8] sm:$0xff]  ;;  %v882_v46 = vld [vmem:[%s879_s14 + $0x10] sm:$0xff]  ;;  %s2772_s14 = scalar_lea.vmem [#allocation2], %s2983_s25 }
 0x137   : > { %v1125_v18 = vadd.f32 %v1078_v57, %v880_v14  ;;  %v1132_v26 = vadd.f32 %v1080_v60, %v881_v22  ;;  %v1145_v41 = vadd.f32 %v3970_v35, %v1119_v17  ;;  %v1169_v57 = vmul.f32 %v1167_v55, %v3902_v43  ;;  %v2954_v61 = vld [vmem:[%s2765_s24 + $0x20] sm:$0xff]  ;;  %v2955_v13 = vld [vmem:[%s2765_s24 + $0x28] sm:$0xff] }
 0x138   : > { %v3223_v19 = vpop.f32.mrf.mxu0  ;;  %v4076_v55 = vld [vmem:[%s3775_s22 + $0x48] ss:$12 sps:$4 sm:$0xff]  }
 0x139   : > { %v2947_v20 = vmul.f32 -1.442695, %v1125_v18  ;;  %v2948_v27 = vmul.f32 -1.442695, %v1132_v26  ;;  %v1453_v18 = vpop.permute.xlu1 %1452 }
 0x13a   : > { %v1122_v24 = vpop.f32.mrf.mxu0 }
 0x13b   : > { %3518 = vpow2.f32 %v2947_v20 }
 0x13c   : > { %v3224_v25 = vpop.f32.mrf.mxu0  ;;  %3520 = vpow2.f32 %v2948_v27 }
 0x13d   : > { %v1460_v25 = vpop.permute.xlu1 %1459 }
 0x148   : > { %v3519_v28 = vpop.eup %3518 }
 0x149   : > { %v1129_v30 = vadd.f32 1.0, %v3519_v28  ;;  %v3521_v33 = vpop.eup %3520 }
 0x14a   : > { %v1136_v38 = vadd.f32 1.0, %v3521_v33 }
 0x14b   : > { %3522 = vrcp.f32 %v1129_v30 }
 0x14c   : > { %3524 = vrcp.f32 %v1136_v38  ;;  %v4034_v38 = vld [vmem:[%s3775_s22 + $0xac] ss:$12 sps:$4 sm:$0xff]  }
 0x158   : > { %v3523_v44 = vpop.eup %3522 }
 0x159   : > { %v1146_v45 = vmul.f32 %v3523_v44, %v1145_v41  ;;  %v3525_v48 = vpop.eup %3524  ;;  %v4037_v41 = vld [vmem:[%s3775_s22 + $0xa8] ss:$12 sps:$4 sm:$0xff]   ;;  %v3473_v44 = vld [vmem:[%s3775_s22 + $0xb0] ss:$12 sps:$4 sm:$0xff]  }
 0x15a   : > { %v1149_v50 = vsub.f32 1.0, %v3525_v48  ;;  %v1151_v53 = vmul.f32 %v3525_v48, %v3902_v43  ;;  %v4053_v48 = vld [vmem:[%s3775_s22 + $0x78] ss:$12 sps:$4 sm:$0xff]  }
 0x15b   : > { %v1147_v47 = vadd.f32 %v1146_v45, %v882_v46  ;;  %v4043_v45 = vld [vmem:[%s3775_s22 + $0x94] ss:$12 sps:$4 sm:$0xff]   ;;  %v4047_v46 = vld [vmem:[%s3775_s22 + $0x90] ss:$12 sps:$4 sm:$0xff]  }
 0x15d   : > { %3526 = vtanh.f32 %v1147_v47  ;;  %v3477_v47 = vld [vmem:[%s3775_s22 + $0x98] ss:$12 sps:$4 sm:$0xff]  }
 0x16a   : > { %v3527_v51 = vpop.eup %3526 }
 0x16b   : > { %v1150_v52 = vmul.f32 %v3527_v51, %v1149_v50  ;;  %v3481_v50 = vld [vmem:[%s3775_s22 + $0x80] ss:$12 sps:$4 sm:$0xff]   ;;  %v4061_v51 = vld [vmem:[%s3775_s22 + $0x64] ss:$12 sps:$4 sm:$0xff]  }
 0x16d   : > { %v1152_v54 = vadd.f32 %v1151_v53, %v1150_v52  ;;  %v4066_v52 = vld [vmem:[%s3775_s22 + $0x60] ss:$12 sps:$4 sm:$0xff]   ;;  %v3485_v53 = vld [vmem:[%s3775_s22 + $0x68] ss:$12 sps:$4 sm:$0xff]  }
 0x16f   : > { %v1162_v56 = vmul.f32 %v1160_v49, %v1152_v54  ;;  %v4056_v49 = vld [vmem:[%s3775_s22 + $0x7c] ss:$12 sps:$4 sm:$0xff]   ;;  %v4072_v54 = vld [vmem:[%s3775_s22 + $0x4c] ss:$12 sps:$4 sm:$0xff]  }
 0x171   : > { %1173 = vst [vmem:[%s1172_s23] sm:$0xff] %v1162_v56  ;;  %v3980_v58 = vadd.f32 %v1169_v57, %v1162_v56  ;;  %v3489_v56 = vld [vmem:[%s3775_s22 + $0x50] ss:$12 sps:$4 sm:$0xff]   ;;  %v4082_v57 = vld [vmem:[%s3775_s22 + $0x34] ss:$12 sps:$4 sm:$0xff]   ;;  %s2783_s23 = scalar_lea.vmem [#allocation2], %s3046_s29 }
 0x173   : > { %v1182_v59 = vpack.c.bf16 %v3980_v58, %v3980_v58  ;;  %v1462_v27 = vmul.f32 %v1460_v25, %v3980_v58 }
 0x175   : > { %1376 = vmatmul.mubr.bf16.vlgmr.msra.gmra.mxu1 %v1182_v59  ;;  %3242 = vmatmul.mubr.bf16.vlgmr.msra.gmra.mxu0 %v1182_v59  ;;  %v3493_v59 = vld [vmem:[%s3775_s22 + $0x38] ss:$12 sps:$4 sm:$0xff]  }
 0x176   : > { %1636 = vmatpush1.bf16.msra.mxu1 %v3801_v5  ;;  %1667 = vmatprep.mubr.bf16.mxu1 %v3602_v3  ;;  %v3462_v5 = vld [vmem:[%s3775_s22 + $0xb0] ss:$12 sps:$4 sm:$0xff]  }
 0x177   : > { %1637 = vmatprep.subr.bf16.mxu1 %v3807_v8  ;;  %3261 = vmatprep.mubr.msk.bf16.mxu0 %vm3604_vm6, %v3603_v6  ;;  %v3463_v8 = vld [vmem:[%s3775_s22 + $0x98] ss:$12 sps:$4 sm:$0xff]  }
 0x178   : > { %3246 = vmatpush3.bf16.msra.mxu0 %v3462_v5  ;;  %v4092_v5 = vld [vmem:[%s3775_s22 + $0x1c] ss:$12 sps:$4 sm:$0xff]  }
 0x179   : > { %3247 = vmatprep.subr.bf16.mxu0 %v3603_v6 }
 0x17a   : > { %1638 = vmatpush1.bf16.msra.mxu1 %v3824_v15  ;;  %v3464_v15 = vld [vmem:[%s3775_s22 + $0x80] ss:$12 sps:$4 sm:$0xff]  }
 0x17b   : > { %1639 = vmatprep.subr.bf16.mxu1 %v3829_v16  ;;  %v3465_v16 = vld [vmem:[%s3775_s22 + $0x68] ss:$12 sps:$4 sm:$0xff]  }
 0x17c   : > { %3248 = vmatpush3.bf16.msra.mxu0 %v3463_v8  ;;  %v4096_v8 = vld [vmem:[%s3775_s22 + $0x18] ss:$12 sps:$4 sm:$0xff]  }
 0x17d   : > { %3249 = vmatprep.subr.bf16.mxu0 %v3603_v6 }
 0x17e   : > { %1640 = vmatpush1.bf16.msra.mxu1 %v3839_v21  ;;  %v3466_v21 = vld [vmem:[%s3775_s22 + $0x50] ss:$12 sps:$4 sm:$0xff]  }
 0x17f   : > { %1641 = vmatprep.subr.bf16.mxu1 %v3843_v23  ;;  %v3467_v23 = vld [vmem:[%s3775_s22 + $0x38] ss:$12 sps:$4 sm:$0xff]  }
 0x180   : > { %3250 = vmatpush3.bf16.msra.mxu0 %v3464_v15  ;;  %v3497_v15 = vld [vmem:[%s3775_s22 + $0x20] ss:$12 sps:$4 sm:$0xff]  }
 0x181   : > { %3251 = vmatprep.subr.bf16.mxu0 %v3603_v6 }
 0x182   : > { %1642 = vmatpush1.bf16.msra.mxu1 %v3856_v29  ;;  %v3468_v29 = vld [vmem:[%s3775_s22 + $0x20] ss:$12 sps:$4 sm:$0xff]  }
 0x183   : > { %1643 = vmatprep.subr.bf16.mxu1 %v3861_v31  ;;  %v3469_v31 = vld [vmem:[%s3775_s22 + $0x8] ss:$12 sps:$4 sm:$0xff]  }
 0x184   : > { %3252 = vmatpush3.bf16.msra.mxu0 %v3465_v16  ;;  %v4102_v16 = vld [vmem:[%s3775_s22 + $0x4] ss:$12 sps:$4 sm:$0xff]  }
 0x185   : > { %3253 = vmatprep.subr.bf16.mxu0 %v3603_v6 }
 0x186   : > { %1644 = vmatpush1.bf16.msra.mxu1 %v3864_v32  ;;  %v2953_v32 = vld [vmem:[%s2765_s24 + $0x18] sm:$0xff]  ;;  %s3079_s24 = smul.u32 4294967176, %s3663_s30 }
 0x187   : > { %1645 = vmatprep.subr.bf16.mxu1 %v3867_v34 }
 0x188   : > { %3254 = vmatpush3.bf16.msra.mxu0 %v3466_v21  ;;  %v4106_v21 = vld [vmem:[%s3775_s22] ss:$12 sps:$4 sm:$0xff]   ;;  %s2791_s25 = scalar_lea.vmem [#allocation2], %s3079_s24 }
 0x189   : > { %3255 = vmatprep.subr.bf16.mxu0 %v3603_v6 }
 0x18a   : > { %1646 = vmatpush1.bf16.msra.mxu1 %v3873_v36 }
 0x18b   : > { %1647 = vmatprep.subr.bf16.mxu1 %v3876_v37 }
 0x18c   : > { %3256 = vmatpush3.bf16.msra.mxu0 %v3467_v23  ;;  %v3501_v23 = vld [vmem:[%s3775_s22 + $0x8] ss:$12 sps:$4 sm:$0xff]  }
 0x18d   : > { %3257 = vmatprep.subr.bf16.mxu0 %v3603_v6 }
 0x18e   : > { %1648 = vmatpush1.bf16.msra.mxu1 %v3883_v39 }
 0x18f   : > { %1649 = vmatprep.subr.bf16.mxu1 %v3886_v40 }
 0x190   : > { %3258 = vmatpush3.bf16.msra.mxu0 %v3468_v29  ;;  %v2985_v29 = vld [vmem:[%s2772_s14 + $0x30] sm:$0xff] }
 0x191   : > { %3259 = vmatprep.subr.bf16.mxu0 %v3603_v6 }
 0x192   : > { %1650 = vmatpush1.bf16.msra.mxu1 %v3900_v42 }
 0x193   : > { %1927 = vmatprep.subr.bf16.mxu1 %v4034_v38 }
 0x194   : > { %3260 = vmatpush3.bf16.msra.mxu0 %v3469_v31 }
 0x195   : > { %3265 = vmatprep.subr.bf16.mxu0 %v3603_v6 }
 0x235   : > { %v1377_v34 = vpop.f32.mrf.mxu1  ;;  %v1418_v36 = vpop.f32.mrf.mxu0 }
 0x236   : > { %v1424_v37 = vadd.f32 %v2953_v32, %v1377_v34  ;;  %v1438_v10 = vadd.f32 %v3970_v35, %v1418_v36 }
 0x237   : > { %v1379_v39 = vpop.f32.mrf.mxu1  ;;  %v3243_v40 = vpop.f32.mrf.mxu0 }
 0x238   : > { %v2980_v42 = vmul.f32 -1.442695, %v1424_v37  ;;  %v1431_v0 = vadd.f32 %v2954_v61, %v1379_v39 }
 0x239   : > { %v1381_v43 = vpop.f32.mrf.mxu1  ;;  %v1421_v60 = vpop.f32.mrf.mxu0 }
 0x23a   : > { %3528 = vpow2.f32 %v2980_v42  ;;  %v2981_v1 = vmul.f32 -1.442695, %v1431_v0  ;;  %v2986_v43 = vld [vmem:[%s2772_s14 + $0x38] sm:$0xff] }
 0x23b   : > { %v1382_v62 = vpop.f32.mrf.mxu1  ;;  %v3244_v63 = vpop.f32.mrf.mxu0 }
 0x23c   : > { %3530 = vpow2.f32 %v2981_v1 }
 0x247   : > { %v3529_v2 = vpop.eup %3528 }
 0x248   : > { %v1428_v4 = vadd.f32 1.0, %v3529_v2 }
 0x249   : > { %v3531_v7 = vpop.eup %3530 }
 0x24a   : > { %3532 = vrcp.f32 %v1428_v4  ;;  %v1435_v9 = vadd.f32 1.0, %v3531_v7 }
 0x24c   : > { %3534 = vrcp.f32 %v1435_v9 }
 0x257   : > { %v3533_v11 = vpop.eup %3532 }
 0x258   : > { %v1439_v12 = vmul.f32 %v3533_v11, %v1438_v10  ;;  %v2987_v11 = vld [vmem:[%s2772_s14 + $0x40] sm:$0xff] }
 0x259   : > { %v3535_v17 = vpop.eup %3534 }
 0x25a   : > { %v1440_v14 = vadd.f32 %v2955_v13, %v1439_v12  ;;  %v1442_v19 = vsub.f32 1.0, %v3535_v17  ;;  %v1444_v24 = vmul.f32 %v3535_v17, %v3980_v58  ;;  %v4086_v58 = vld [vmem:[%s3775_s22 + $0x30] ss:$12 sps:$4 sm:$0xff]  }
 0x25c   : > { %3536 = vtanh.f32 %v1440_v14 }
 0x269   : > { %v3537_v20 = vpop.eup %3536 }
 0x26a   : > { %v1443_v22 = vmul.f32 %v3537_v20, %v1442_v19 }
 0x26c   : > { %v1445_v26 = vadd.f32 %v1444_v24, %v1443_v22  ;;  %v1745_v22 = vpop.permute.xlu0 %1744  ;;  %v1752_v24 = vpop.permute.xlu1 %1751 }
 0x26e   : > { %v1455_v28 = vmul.f32 %v1453_v18, %v1445_v26 }
 0x270   : > { %v4026_v30 = vadd.f32 %v1462_v27, %v1455_v28  ;;  %2984 = vst [vmem:[%s2769_s10 + $0x8] sm:$0xff] %v1455_v28  ;;  %s3110_s10 = smul.u32 4294967256, %s3663_s30 }
 0x272   : > { %v1474_v33 = vpack.c.bf16 %v4026_v30, %v4026_v30  ;;  %v1754_v25 = vmul.f32 %v1752_v24, %v4026_v30  ;;  %s2795_s14 = scalar_lea.vmem %s3976_s21, %s3110_s10 [#allocation3] }
 0x274   : > { %1668 = vmatmul.mubr.bf16.vlgmr.msra.gmra.mxu1 %v1474_v33  ;;  %3262 = vmatmul.mubr.bf16.vlgmr.msra.gmra.mxu0 %v1474_v33  ;;  %v3503_v33 = vld [vmem:[%s3775_s22 + $0x98] ss:$12 sps:$4 sm:$0xff]  }
 0x275   : > { %1959 = vmatprep.mubr.bf16.mxu1 %v3602_v3  ;;  %3281 = vmatprep.mubr.msk.bf16.mxu0 %vm3604_vm6, %v3603_v6 }
 0x276   : > { %1928 = vmatpush1.bf16.msra.mxu1 %v4037_v41  ;;  %3266 = vmatpush3.bf16.msra.mxu0 %v3473_v44  ;;  %v3504_v44 = vld [vmem:[%s3775_s22 + $0x80] ss:$12 sps:$4 sm:$0xff]  }
 0x277   : > { %3267 = vmatprep.subr.bf16.mxu0 %v3603_v6  ;;  %1929 = vmatprep.subr.bf16.mxu1 %v4043_v45 }
 0x27a   : > { %1930 = vmatpush1.bf16.msra.mxu1 %v4047_v46  ;;  %3268 = vmatpush3.bf16.msra.mxu0 %v3477_v47  ;;  %v3505_v47 = vld [vmem:[%s3775_s22 + $0x68] ss:$12 sps:$4 sm:$0xff]  }
 0x27b   : > { %3269 = vmatprep.subr.bf16.mxu0 %v3603_v6  ;;  %1931 = vmatprep.subr.bf16.mxu1 %v4056_v49 }
 0x27e   : > { %1932 = vmatpush1.bf16.msra.mxu1 %v4053_v48  ;;  %3270 = vmatpush3.bf16.msra.mxu0 %v3481_v50  ;;  %v3506_v50 = vld [vmem:[%s3775_s22 + $0x50] ss:$12 sps:$4 sm:$0xff]  }
 0x27f   : > { %1933 = vmatprep.subr.bf16.mxu1 %v4061_v51  ;;  %3271 = vmatprep.subr.bf16.mxu0 %v3603_v6 }
 0x282   : > { %1934 = vmatpush1.bf16.msra.mxu1 %v4066_v52  ;;  %3272 = vmatpush3.bf16.msra.mxu0 %v3485_v53  ;;  %v3508_v53 = vld [vmem:[%s3775_s22 + $0x20] ss:$12 sps:$4 sm:$0xff]  }
 0x283   : > { %1935 = vmatprep.subr.bf16.mxu1 %v4072_v54  ;;  %3273 = vmatprep.subr.bf16.mxu0 %v3603_v6 }
 0x286   : > { %1936 = vmatpush1.bf16.msra.mxu1 %v4076_v55  ;;  %3274 = vmatpush3.bf16.msra.mxu0 %v3489_v56  ;;  %v3509_v56 = vld [vmem:[%s3775_s22 + $0x8] ss:$12 sps:$4 sm:$0xff]  }
 0x287   : > { %1937 = vmatprep.subr.bf16.mxu1 %v4082_v57  ;;  %3275 = vmatprep.subr.bf16.mxu0 %v3603_v6 }
 0x28a   : > { %1938 = vmatpush1.bf16.msra.mxu1 %v4086_v58  ;;  %3276 = vmatpush3.bf16.msra.mxu0 %v3493_v59  ;;  %v1763_v59 = vld [vmem:[%s1762_s26] sm:$0xff] }
 0x28b   : > { %1939 = vmatprep.subr.bf16.mxu1 %v4092_v5  ;;  %3277 = vmatprep.subr.bf16.mxu0 %v3603_v6 }
 0x28e   : > { %1940 = vmatpush1.bf16.msra.mxu1 %v4096_v8  ;;  %3278 = vmatpush3.bf16.msra.mxu0 %v3497_v15 }
 0x28f   : > { %1941 = vmatprep.subr.bf16.mxu1 %v4102_v16  ;;  %3279 = vmatprep.subr.bf16.mxu0 %v3603_v6 }
 0x292   : > { %1942 = vmatpush1.bf16.msra.mxu1 %v4106_v21  ;;  %3280 = vmatpush3.bf16.msra.mxu0 %v3501_v23 }
 0x293   : > { %2220 = vmatprep.subr.bf16.mxu1 %v4034_v38  ;;  %3285 = vmatprep.subr.bf16.mxu0 %v3603_v6 }
 0x334   : > { %v1669_v31 = vpop.f32.mrf.mxu1  ;;  %v1710_v32 = vpop.f32.mrf.mxu0 }
 0x335   : > { %v1716_v34 = vadd.f32 %v2985_v29, %v1669_v31  ;;  %v1730_v7 = vadd.f32 %v3970_v35, %v1710_v32 }
 0x336   : > { %v1671_v36 = vpop.f32.mrf.mxu1  ;;  %v3263_v37 = vpop.f32.mrf.mxu0 }
 0x337   : > { %v3012_v39 = vmul.f32 -1.442695, %v1716_v34  ;;  %v1723_v62 = vadd.f32 %v2986_v43, %v1671_v36 }
 0x338   : > { %v1673_v40 = vpop.f32.mrf.mxu1  ;;  %v1713_v42 = vpop.f32.mrf.mxu0 }
 0x339   : > { %3538 = vpow2.f32 %v3012_v39  ;;  %v3013_v63 = vmul.f32 -1.442695, %v1723_v62  ;;  %v1764_v39 = vld [vmem:[%s1762_s26 + $0x8] sm:$0xff] }
 0x33a   : > { %v1674_v60 = vpop.f32.mrf.mxu1  ;;  %v3264_v61 = vpop.f32.mrf.mxu0 }
 0x33b   : > { %3540 = vpow2.f32 %v3013_v63 }
 0x346   : > { %v3539_v0 = vpop.eup %3538 }
 0x347   : > { %v1720_v1 = vadd.f32 1.0, %v3539_v0 }
 0x348   : > { %v3541_v2 = vpop.eup %3540 }
 0x349   : > { %3542 = vrcp.f32 %v1720_v1  ;;  %v1727_v4 = vadd.f32 1.0, %v3541_v2 }
 0x34b   : > { %3544 = vrcp.f32 %v1727_v4 }
 0x356   : > { %v3543_v9 = vpop.eup %3542 }
 0x357   : > { %v1731_v10 = vmul.f32 %v3543_v9, %v1730_v7  ;;  %v1765_v7 = vld [vmem:[%s1762_s26 + $0x10] sm:$0xff]  ;;  %s378_s26 = scalar_lea.vmem %s4251_s8, %s2869_s11 }
 0x358   : > { %v3545_v13 = vpop.eup %3544 }
 0x359   : > { %v1732_v12 = vadd.f32 %v2987_v11, %v1731_v10  ;;  %v1734_v14 = vsub.f32 1.0, %v3545_v13  ;;  %v1736_v19 = vmul.f32 %v3545_v13, %v4026_v30  ;;  %v3502_v30 = vld [vmem:[%s3775_s22 + $0xb0] ss:$12 sps:$4 sm:$0xff]  }
 0x35b   : > { %3546 = vtanh.f32 %v1732_v12 }
 0x368   : > { %v3547_v17 = vpop.eup %3546 }
 0x369   : > { %v1735_v18 = vmul.f32 %v3547_v17, %v1734_v14 }
 0x36b   : > { %v1737_v20 = vadd.f32 %v1736_v19, %v1735_v18  ;;  %v2037_v18 = vpop.permute.xlu0 %2036  ;;  %v2044_v19 = vpop.permute.xlu1 %2043 }
 0x36d   : > { %v1747_v26 = vmul.f32 %v1745_v22, %v1737_v20 }
 0x36f   : > { %v4123_v27 = vadd.f32 %v1754_v25, %v1747_v26  ;;  %3016 = vst [vmem:[%s2775_s16 + $0x10] sm:$0xff] %v1747_v26 }
 0x371   : > { %v1766_v28 = vpack.c.bf16 %v4123_v27, %v4123_v27  ;;  %v2046_v22 = vmul.f32 %v2044_v19, %v4123_v27 }
 0x373   : > { %1960 = vmatmul.mubr.bf16.vlgmr.msra.gmra.mxu1 %v1766_v28  ;;  %3282 = vmatmul.mubr.bf16.vlgmr.msra.gmra.mxu0 %v1766_v28 }
 0x374   : > { %2221 = vmatpush1.bf16.msra.mxu1 %v4037_v41  ;;  %2252 = vmatprep.mubr.bf16.mxu1 %v3602_v3 }
 0x375   : > { %2222 = vmatprep.subr.bf16.mxu1 %v4043_v45  ;;  %3301 = vmatprep.mubr.msk.bf16.mxu0 %vm3604_vm6, %v3603_v6 }
 0x376   : > { %3286 = vmatpush3.bf16.msra.mxu0 %v3502_v30 }
 0x377   : > { %3287 = vmatprep.subr.bf16.mxu0 %v3603_v6 }
 0x378   : > { %2223 = vmatpush1.bf16.msra.mxu1 %v4047_v46 }
 0x379   : > { %2224 = vmatprep.subr.bf16.mxu1 %v4056_v49 }
 0x37a   : > { %3288 = vmatpush3.bf16.msra.mxu0 %v3503_v33 }
 0x37b   : > { %3289 = vmatprep.subr.bf16.mxu0 %v3603_v6 }
 0x37c   : > { %2225 = vmatpush1.bf16.msra.mxu1 %v4053_v48 }
 0x37d   : > { %2226 = vmatprep.subr.bf16.mxu1 %v4061_v51 }
 0x37e   : > { %3290 = vmatpush3.bf16.msra.mxu0 %v3504_v44 }
 0x37f   : > { %3291 = vmatprep.subr.bf16.mxu0 %v3603_v6 }
 0x380   : > { %2227 = vmatpush1.bf16.msra.mxu1 %v4066_v52 }
 0x381   : > { %2228 = vmatprep.subr.bf16.mxu1 %v4072_v54 }
 0x382   : > { %3292 = vmatpush3.bf16.msra.mxu0 %v3505_v47 }
 0x383   : > { %3293 = vmatprep.subr.bf16.mxu0 %v3603_v6 }
 0x384   : > { %2229 = vmatpush1.bf16.msra.mxu1 %v4076_v55 }
 0x385   : > { %2230 = vmatprep.subr.bf16.mxu1 %v4082_v57 }
 0x386   : > { %3294 = vmatpush3.bf16.msra.mxu0 %v3506_v50 }
 0x387   : > { %3295 = vmatprep.subr.bf16.mxu0 %v3603_v6 }
 0x388   : > { %2231 = vmatpush1.bf16.msra.mxu1 %v4086_v58 }
 0x389   : > { %2232 = vmatprep.subr.bf16.mxu1 %v4092_v5 }
 0x38c   : > { %2233 = vmatpush1.bf16.msra.mxu1 %v4096_v8 }
 0x38d   : > { %2234 = vmatprep.subr.bf16.mxu1 %v4102_v16 }
 0x390   : > { %2235 = vmatpush1.bf16.msra.mxu1 %v4106_v21 }
 0x391   : > { %2513 = vmatprep.subr.bf16.mxu1 %v4034_v38  ;;  %v3507_v38 = vld [vmem:[%s3775_s22 + $0x38] ss:$12 sps:$4 sm:$0xff]  }
 0x392   : > { %3296 = vmatpush3.bf16.msra.mxu0 %v3507_v38 }
 0x393   : > { %3297 = vmatprep.subr.bf16.mxu0 %v3603_v6 }
 0x396   : > { %3298 = vmatpush3.bf16.msra.mxu0 %v3508_v53 }
 0x397   : > { %3299 = vmatprep.subr.bf16.mxu0 %v3603_v6 }
 0x39a   : > { %3300 = vmatpush3.bf16.msra.mxu0 %v3509_v56 }
 0x39b   : > { %3305 = vmatprep.subr.bf16.mxu0 %v3603_v6 }
 0x433   : > { %v1961_v15 = vpop.f32.mrf.mxu1  ;;  %v2002_v23 = vpop.f32.mrf.mxu0 }
 0x434   : > { %v2008_v29 = vadd.f32 %v1961_v15, %v1763_v59  ;;  %v2022_v1 = vadd.f32 %v3970_v35, %v2002_v23  ;;  %v3049_v15 = vld [vmem:[%s2783_s23 + $0x70] sm:$0xff] }
 0x435   : > { %v1963_v31 = vpop.f32.mrf.mxu1  ;;  %v3283_v32 = vpop.f32.mrf.mxu0 }
 0x436   : > { %v3042_v34 = vmul.f32 -1.442695, %v2008_v29  ;;  %v2015_v43 = vadd.f32 %v1963_v31, %v1764_v39  ;;  %v2330_v39 = vpop.permute.xlu0 %2329 }
 0x437   : > { %v1965_v36 = vpop.f32.mrf.mxu1  ;;  %v2005_v37 = vpop.f32.mrf.mxu0 }
 0x438   : > { %3548 = vpow2.f32 %v3042_v34  ;;  %v3043_v60 = vmul.f32 -1.442695, %v2015_v43 }
 0x439   : > { %v1966_v40 = vpop.f32.mrf.mxu1  ;;  %v3284_v42 = vpop.f32.mrf.mxu0 }
 0x43a   : > { %3550 = vpow2.f32 %v3043_v60  ;;  %v2337_v40 = vpop.permute.xlu1 %2336 }
 0x445   : > { %v3549_v61 = vpop.eup %3548 }
 0x446   : > { %v2012_v62 = vadd.f32 1.0, %v3549_v61 }
 0x447   : > { %v3551_v63 = vpop.eup %3550 }
 0x448   : > { %3552 = vrcp.f32 %v2012_v62  ;;  %v2019_v0 = vadd.f32 1.0, %v3551_v63  ;;  %v3080_v62 = vld [vmem:[%s2791_s25 + $0x78] sm:$0xff] }
 0x44a   : > { %3554 = vrcp.f32 %v2019_v0 }
 0x455   : > { %v3553_v2 = vpop.eup %3552 }
 0x456   : > { %v2023_v4 = vmul.f32 %v3553_v2, %v2022_v1 }
 0x457   : > { %v3555_v10 = vpop.eup %3554 }
 0x458   : > { %v2024_v9 = vadd.f32 %v2023_v4, %v1765_v7  ;;  %v2026_v11 = vsub.f32 1.0, %v3555_v10  ;;  %v2028_v14 = vmul.f32 %v3555_v10, %v4123_v27  ;;  %v3048_v27 = vld [vmem:[%s2783_s23 + $0x68] sm:$0xff] }
 0x45a   : > { %3556 = vtanh.f32 %v2024_v9 }
 0x467   : > { %v3557_v12 = vpop.eup %3556 }
 0x468   : > { %v2027_v13 = vmul.f32 %v3557_v12, %v2026_v11  ;;  %v3081_v11 = vld [vmem:[%s2791_s25 + $0x80] sm:$0xff] }
 0x46a   : > { %v2029_v17 = vadd.f32 %v2028_v14, %v2027_v13 }
 0x46c   : > { %v2039_v20 = vmul.f32 %v2037_v18, %v2029_v17 }
 0x46e   : > { %v4168_v24 = vadd.f32 %v2046_v22, %v2039_v20  ;;  %2050 = vst [vmem:[%s2049_s20] sm:$0xff] %v2039_v20 }
 0x470   : > { %v2059_v25 = vpack.c.bf16 %v4168_v24, %v4168_v24  ;;  %v2339_v43 = vmul.f32 %v2337_v40, %v4168_v24 }
 0x472   : > { %2253 = vmatmul.mubr.bf16.vlgmr.msra.gmra.mxu1 %v2059_v25  ;;  %3302 = vmatmul.mubr.bf16.vlgmr.msra.gmra.mxu0 %v2059_v25 }
 0x473   : > { %2514 = vmatpush1.bf16.msra.mxu1 %v4037_v41  ;;  %2545 = vmatprep.mubr.bf16.mxu1 %v3602_v3  ;;  %v3510_v3 = vld [vmem:[%s3775_s22 + $0xb0] ss:$12 sps:$4 sm:$0xff]   ;;  %v3511_v41 = vld [vmem:[%s3775_s22 + $0x98] ss:$12 sps:$4 sm:$0xff]  }
 0x474   : > { %2515 = vmatprep.subr.bf16.mxu1 %v4043_v45  ;;  %3321 = vmatprep.mubr.msk.bf16.mxu0 %vm3604_vm6, %v3603_v6  ;;  %v3512_v45 = vld [vmem:[%s3775_s22 + $0x80] ss:$12 sps:$4 sm:$0xff]  }
 0x475   : > { %3306 = vmatpush3.bf16.msra.mxu0 %v3510_v3 }
 0x476   : > { %3307 = vmatprep.subr.bf16.mxu0 %v3603_v6 }
 0x477   : > { %2516 = vmatpush1.bf16.msra.mxu1 %v4047_v46  ;;  %v3513_v46 = vld [vmem:[%s3775_s22 + $0x68] ss:$12 sps:$4 sm:$0xff]  }
 0x478   : > { %2517 = vmatprep.subr.bf16.mxu1 %v4056_v49  ;;  %v3515_v49 = vld [vmem:[%s3775_s22 + $0x38] ss:$12 sps:$4 sm:$0xff]  }
 0x479   : > { %3308 = vmatpush3.bf16.msra.mxu0 %v3511_v41  ;;  %v3082_v41 = vld [vmem:[%s2791_s25 + $0x88] sm:$0xff] }
 0x47a   : > { %3309 = vmatprep.subr.bf16.mxu0 %v3603_v6 }
 0x47b   : > { %2518 = vmatpush1.bf16.msra.mxu1 %v4053_v48  ;;  %v3514_v48 = vld [vmem:[%s3775_s22 + $0x50] ss:$12 sps:$4 sm:$0xff]  }
 0x47c   : > { %2519 = vmatprep.subr.bf16.mxu1 %v4061_v51  ;;  %v3516_v51 = vld [vmem:[%s3775_s22 + $0x20] ss:$12 sps:$4 sm:$0xff]  }
 0x47d   : > { %3310 = vmatpush3.bf16.msra.mxu0 %v3512_v45 }
 0x47e   : > { %3311 = vmatprep.subr.bf16.mxu0 %v3603_v6 }
 0x47f   : > { %2520 = vmatpush1.bf16.msra.mxu1 %v4066_v52  ;;  %v3517_v52 = vld [vmem:[%s3775_s22 + $0x8] ss:$12 sps:$4 sm:$0xff]   ;;  %s3077_s22 = smul.u32 4294967272, %s3663_s30 }
 0x480   : > { %2521 = vmatprep.subr.bf16.mxu1 %v4072_v54  ;;  %v3047_v54 = vld [vmem:[%s2783_s23 + $0x60] sm:$0xff] }
 0x481   : > { %3312 = vmatpush3.bf16.msra.mxu0 %v3513_v46  ;;  %s2787_s27 = scalar_lea.vmem %s3976_s21, %s3077_s22 [#allocation3] }
 0x482   : > { %3313 = vmatprep.subr.bf16.mxu0 %v3603_v6 }
 0x483   : > { %2522 = vmatpush1.bf16.msra.mxu1 %v4076_v55 }
 0x484   : > { %2523 = vmatprep.subr.bf16.mxu1 %v4082_v57 }
 0x485   : > { %3314 = vmatpush3.bf16.msra.mxu0 %v3514_v48 }
 0x486   : > { %3315 = vmatprep.subr.bf16.mxu0 %v3603_v6 }
 0x487   : > { %2524 = vmatpush1.bf16.msra.mxu1 %v4086_v58 }
 0x488   : > { %2525 = vmatprep.subr.bf16.mxu1 %v4092_v5 }
 0x489   : > { %3316 = vmatpush3.bf16.msra.mxu0 %v3515_v49 }
 0x48a   : > { %3317 = vmatprep.subr.bf16.mxu0 %v3603_v6 }
 0x48b   : > { %2526 = vmatpush1.bf16.msra.mxu1 %v4096_v8 }
 0x48c   : > { %2527 = vmatprep.subr.bf16.mxu1 %v4102_v16 }
 0x48d   : > { %3318 = vmatpush3.bf16.msra.mxu0 %v3516_v51 }
 0x48e   : > { %3319 = vmatprep.subr.bf16.mxu0 %v3603_v6 }
 0x48f   : > { %2528 = vmatpush1.bf16.msra.mxu1 %v4106_v21 }
 0x491   : > { %3320 = vmatpush3.bf16.msra.mxu0 %v3517_v52 }
 0x532   : > { %v2254_v55 = vpop.f32.mrf.mxu1  ;;  %v2295_v57 = vpop.f32.mrf.mxu0 }
 0x533   : > { %v2301_v58 = vadd.f32 %v3047_v54, %v2254_v55  ;;  %v2315_v53 = vadd.f32 %v3970_v35, %v2295_v57  ;;  %v2623_v55 = vpop.permute.xlu0 %2622  ;;  %v2630_v57 = vpop.permute.xlu1 %2629 }
 0x534   : > { %v2256_v5 = vpop.f32.mrf.mxu1  ;;  %v3303_v8 = vpop.f32.mrf.mxu0 }
 0x535   : > { %v3074_v16 = vmul.f32 -1.442695, %v2301_v58  ;;  %v2308_v33 = vadd.f32 %v3048_v27, %v2256_v5 }
 0x536   : > { %v2258_v21 = vpop.f32.mrf.mxu1  ;;  %v2298_v26 = vpop.f32.mrf.mxu0 }
 0x537   : > { %3558 = vpow2.f32 %v3074_v16  ;;  %v3075_v44 = vmul.f32 -1.442695, %v2308_v33 }
 0x538   : > { %v2259_v28 = vpop.f32.mrf.mxu1  ;;  %v3304_v30 = vpop.f32.mrf.mxu0 }
 0x539   : > { %3560 = vpow2.f32 %v3075_v44 }
 0x544   : > { %v3559_v6 = vpop.eup %3558 }
 0x545   : > { %v2305_v47 = vadd.f32 1.0, %v3559_v6 }
 0x546   : > { %v3561_v50 = vpop.eup %3560 }
 0x547   : > { %3562 = vrcp.f32 %v2305_v47  ;;  %v2312_v38 = vadd.f32 1.0, %v3561_v50 }
 0x549   : > { %3564 = vrcp.f32 %v2312_v38 }
 0x554   : > { %v3563_v56 = vpop.eup %3562 }
 0x555   : > { %v2316_v59 = vmul.f32 %v3563_v56, %v2315_v53 }
 0x556   : > { %v3565_v29 = vpop.eup %3564 }
 0x557   : > { %v2317_v23 = vadd.f32 %v3049_v15, %v2316_v59  ;;  %v2319_v31 = vsub.f32 1.0, %v3565_v29  ;;  %v2321_v36 = vmul.f32 %v3565_v29, %v4168_v24 }
 0x559   : > { %3566 = vtanh.f32 %v2317_v23 }
 0x566   : > { %v3567_v32 = vpop.eup %3566 }
 0x567   : > { %v2320_v34 = vmul.f32 %v3567_v32, %v2319_v31 }
 0x569   : > { %v2322_v37 = vadd.f32 %v2321_v36, %v2320_v34 }
 0x56b   : > { %v2332_v42 = vmul.f32 %v2330_v39, %v2322_v37 }
 0x56d   : > { %v2340_v60 = vadd.f32 %v2339_v43, %v2332_v42  ;;  %3078 = vst [vmem:[%s2787_s27 + $0x20] sm:$0xff] %v2332_v42 }
 0x56f   : > { %v2352_v61 = vpack.c.bf16 %v2340_v60, %v2340_v60  ;;  %v2632_v58 = vmul.f32 %v2630_v57, %v2340_v60 }
 0x571   : > { %2546 = vmatmul.mubr.bf16.vlgmr.msra.gmra.mxu1 %v2352_v61  ;;  %3322 = vmatmul.mubr.bf16.vlgmr.msra.gmra.mxu0 %v2352_v61 }
 0x631   : > { %v2547_v63 = vpop.f32.mrf.mxu1  ;;  %v2588_v0 = vpop.f32.mrf.mxu0 }
 0x632   : > { %v2594_v1 = vadd.f32 %v3080_v62, %v2547_v63  ;;  %v2608_v24 = vadd.f32 %v3970_v35, %v2588_v0 }
 0x633   : > { %v2549_v2 = vpop.f32.mrf.mxu1  ;;  %v3323_v4 = vpop.f32.mrf.mxu0 }
 0x634   : > { %v3107_v7 = vmul.f32 -1.442695, %v2594_v1  ;;  %v2601_v14 = vadd.f32 %v3081_v11, %v2549_v2 }
 0x635   : > { %v2551_v9 = vpop.f32.mrf.mxu1  ;;  %v2591_v10 = vpop.f32.mrf.mxu0 }
 0x636   : > { %3568 = vpow2.f32 %v3107_v7  ;;  %v3108_v17 = vmul.f32 -1.442695, %v2601_v14 }
 0x637   : > { %v2552_v12 = vpop.f32.mrf.mxu1  ;;  %v3324_v13 = vpop.f32.mrf.mxu0 }
 0x638   : > { %3570 = vpow2.f32 %v3108_v17 }
 0x643   : > { %v3569_v18 = vpop.eup %3568 }
 0x644   : > { %v2598_v19 = vadd.f32 1.0, %v3569_v18 }
 0x645   : > { %v3571_v20 = vpop.eup %3570 }
 0x646   : > { %3572 = vrcp.f32 %v2598_v19  ;;  %v2605_v22 = vadd.f32 1.0, %v3571_v20 }
 0x648   : > { %3574 = vrcp.f32 %v2605_v22 }
 0x653   : > { %v3573_v25 = vpop.eup %3572 }
 0x654   : > { %v2609_v3 = vmul.f32 %v3573_v25, %v2608_v24 }
 0x655   : > { %v3575_v46 = vpop.eup %3574 }
 0x656   : > { %v2610_v45 = vadd.f32 %v3082_v41, %v2609_v3  ;;  %v2612_v48 = vsub.f32 1.0, %v3575_v46  ;;  %v2614_v52 = vmul.f32 %v3575_v46, %v2340_v60 }
 0x658   : > { %3576 = vtanh.f32 %v2610_v45 }
 0x665   : > { %v3577_v49 = vpop.eup %3576 }
 0x666   : > { %v2613_v51 = vmul.f32 %v3577_v49, %v2612_v48 }
 0x668   : > { %v2615_v54 = vadd.f32 %v2614_v52, %v2613_v51 }
 0x66a   : > { %v2625_v5 = vmul.f32 %v2623_v55, %v2615_v54  ;;  %2648 = sbr.rel (!%p3675_p4) target bundleno = 1655 (0x677), region = 52 }
 0x66c   : > { %v2633_v35 = vadd.f32 %v2632_v58, %v2625_v5  ;;  %3111 = vst [vmem:[%s2795_s14 + $0x28] sm:$0xff] %v2625_v5 }
 0x66e   : > { %2637 = vst [vmem:[%s378_s26] sm:$0xff] %v2633_v35 }
 0x673   : > { %v2689_v8 = vld [vmem:[%s3976_s21] sm:$0xff]  ;;  %v2691_v16 = vld [vmem:[%s3976_s21 + $0x8] sm:$0xff]  ;;  %v2693_v21 = vld [vmem:[%s3976_s21 + $0x10] sm:$0xff] }
 0x674   : > { %2690 = vst [vmem:[%s2650_s19] sm:$0xff] %v2689_v8  ;;  %2692 = vst [vmem:[%s2650_s19 + $0x10] sm:$0xff] %v2691_v16  ;;  %v2695_v26 = vld [vmem:[%s3976_s21 + $0x18] sm:$0xff]  ;;  %v2697_v27 = vld [vmem:[%s3976_s21 + $0x20] sm:$0xff] }
 0x675   : > { %2694 = vst [vmem:[%s2650_s19 + $0x20] sm:$0xff] %v2693_v21  ;;  %v2699_v28 = vld [vmem:[%s3976_s21 + $0x28] sm:$0xff]  ;;  %2696 = vst [vmem:[%s2650_s19 + $0x30] sm:$0xff] %v2695_v26 }
 0x676   : > { %2698 = vst [vmem:[%s2650_s19 + $0x40] sm:$0xff] %v2697_v27  ;;  %2700 = vst [vmem:[%s2650_s19 + $0x50] sm:$0xff] %v2699_v28 }
 0x677 PF: > { %p16_p8 = scmp.ge.s32.totalorder %s3665_s9, 4   ;;  %s4253_s27 = smov %s3596_s28 }
 0x678   : > { %s4254_s28 = smov %s3673_s12  ;;  %s4255_s29 = smov %s3665_s9 }
 0x679   :  { %18 = sbr.rel (!%p16_p8) target bundleno = 2 (0x2), region = 152 }

</bundles_post_ra>
